<compile_context>
chip_gen: v7x
topology: tpu7x:2x2x1
jax: 0.10.0
libtpu: 0.0.40
codegen_flags: <defaults>
</compile_context>

<pallas_src>
import functools

import jax
import jax.numpy as jnp
from jax.experimental import pallas as pl
from jax.experimental.pallas import tpu as pltpu

BN_EPS = 1e-5
EXPANSION = 4
VMEM_LIMIT = 32 * 1024 * 1024


# ------------------------------------------------------------------ kernels
def matmul_stats_kernel(a_ref, w_ref, y_ref, sum_ref, ssq_ref,
                        acc_ref, s_sc, q_sc):
    """Tiled y = a @ w (bf16 in, f32 acc) + per-channel sum / sumsq reduction.

    grid = (M_tiles, K_tiles); K (last axis) is the matmul reduction, M is the
    BN-statistics reduction (both 'arbitrary' -> sequential, scratch-carried).
    """
    i = pl.program_id(0)
    k = pl.program_id(1)
    nk = pl.num_programs(1)

    @pl.when((i == 0) & (k == 0))
    def _():
        s_sc[...] = jnp.zeros_like(s_sc)
        q_sc[...] = jnp.zeros_like(q_sc)

    @pl.when(k == 0)
    def _():
        acc_ref[...] = jnp.zeros_like(acc_ref)

    acc_ref[...] += jnp.dot(a_ref[...], w_ref[...],
                            preferred_element_type=jnp.float32)

    @pl.when(k == nk - 1)
    def _():
        y = acc_ref[...]
        y_ref[...] = y
        s_sc[...] += jnp.sum(y, axis=0, keepdims=True)
        q_sc[...] += jnp.sum(y * y, axis=0, keepdims=True)
        # stats output blocks are grid-resident; final VMEM contents are what
        # gets written back to HBM at the end of the grid.
        sum_ref[...] = s_sc[...]
        ssq_ref[...] = q_sc[...]


def bn_matmul_stats_kernel(yin_ref, sc_ref, sh_ref, w_ref,
                           y_ref, sum_ref, ssq_ref,
                           acc_ref, s_sc, q_sc):
    """Fused: a = relu(y_in*scale + shift) (cast bf16), then tiled a @ w + stats.

    Used for conv3: applies BN2 scale/shift + ReLU to the A operand tile in
    VMEM instead of materializing the activation in HBM.
    """
    i = pl.program_id(0)
    k = pl.program_id(1)
    nk = pl.num_programs(1)

    @pl.when((i == 0) & (k == 0))
    def _():
        s_sc[...] = jnp.zeros_like(s_sc)
        q_sc[...] = jnp.zeros_like(q_sc)

    @pl.when(k == 0)
    def _():
        acc_ref[...] = jnp.zeros_like(acc_ref)

    a = jnp.maximum(yin_ref[...] * sc_ref[...] + sh_ref[...], 0.0)
    acc_ref[...] += jnp.dot(a.astype(jnp.bfloat16), w_ref[...],
                            preferred_element_type=jnp.float32)

    @pl.when(k == nk - 1)
    def _():
        y = acc_ref[...]
        y_ref[...] = y
        s_sc[...] += jnp.sum(y, axis=0, keepdims=True)
        q_sc[...] += jnp.sum(y * y, axis=0, keepdims=True)
        sum_ref[...] = s_sc[...]
        ssq_ref[...] = q_sc[...]


def bn_relu_kernel(y_ref, scale_ref, shift_ref, o_ref):
    y = y_ref[...] * scale_ref[...] + shift_ref[...]
    o_ref[...] = jnp.maximum(y, 0.0).astype(o_ref.dtype)


def bn_add_relu_kernel(y_ref, scale_ref, shift_ref, res_ref, o_ref):
    y = y_ref[...] * scale_ref[...] + shift_ref[...] + res_ref[...]
    o_ref[...] = jnp.maximum(y, 0.0).astype(o_ref.dtype)


# ------------------------------------------------------------------ wrappers
def _choose_tile(dim, target, align):
    """Largest t <= target with dim % t == 0 and t % align == 0 (else full)."""
    for cand in range(min(target, dim), 0, -1):
        if dim % cand == 0 and cand % align == 0:
            return cand
    return dim


def _stats_call(kernel, args, in_specs, M, N, tm, grid):
    return pl.pallas_call(
        kernel,
        grid=grid,
        in_specs=in_specs,
        out_specs=[
            pl.BlockSpec((tm, N), lambda i, k: (i, 0)),
            pl.BlockSpec((1, N), lambda i, k: (0, 0)),
            pl.BlockSpec((1, N), lambda i, k: (0, 0)),
        ],
        out_shape=[
            jax.ShapeDtypeStruct((M, N), jnp.float32),
            jax.ShapeDtypeStruct((1, N), jnp.float32),
            jax.ShapeDtypeStruct((1, N), jnp.float32),
        ],
        scratch_shapes=[
            pltpu.VMEM((tm, N), jnp.float32),
            pltpu.VMEM((1, N), jnp.float32),
            pltpu.VMEM((1, N), jnp.float32),
        ],
        compiler_params=pltpu.CompilerParams(
            dimension_semantics=("arbitrary", "arbitrary"),
            vmem_limit_bytes=VMEM_LIMIT),
    )(*args)


def _matmul_stats(a, w, use_pallas, *, tm_target=256, tk_target=512):
    """Returns (y = a @ w in f32, per-column sum, per-column sum-of-squares)."""
    M, K = a.shape
    _, N = w.shape
    if not use_pallas:  # pure-JAX reference path (same bf16 operands)
        y = jnp.dot(a, w, preferred_element_type=jnp.float32)
        return (y, jnp.sum(y, axis=0, keepdims=True),
                jnp.sum(y * y, axis=0, keepdims=True))

    tm = _choose_tile(M, tm_target, 8)
    tk = _choose_tile(K, tk_target, 128)
    grid = (M // tm, K // tk)
    in_specs = [
        pl.BlockSpec((tm, tk), lambda i, k: (i, k)),
        pl.BlockSpec((tk, N), lambda i, k: (k, 0)),
    ]
    return _stats_call(matmul_stats_kernel, (a, w), in_specs, M, N, tm, grid)


def _bn_matmul_stats(y_in, scale, shift, w, use_pallas, *,
                     tm_target=256, tk_target=512):
    """Fused y = relu(y_in*scale+shift)@w (bf16 MXU) + per-column sum / sumsq."""
    M, K = y_in.shape
    _, N = w.shape
    if not use_pallas:  # reference path mirrors the fused dtype handling
        a = jnp.maximum(y_in * scale + shift, 0.0).astype(jnp.bfloat16)
        y = jnp.dot(a, w, preferred_element_type=jnp.float32)
        return (y, jnp.sum(y, axis=0, keepdims=True),
                jnp.sum(y * y, axis=0, keepdims=True))

    tm = _choose_tile(M, tm_target, 8)
    tk = _choose_tile(K, tk_target, 128)
    grid = (M // tm, K // tk)
    in_specs = [
        pl.BlockSpec((tm, tk), lambda i, k: (i, k)),
        pl.BlockSpec((1, tk), lambda i, k: (0, k)),
        pl.BlockSpec((1, tk), lambda i, k: (0, k)),
        pl.BlockSpec((tk, N), lambda i, k: (k, 0)),
    ]
    return _stats_call(bn_matmul_stats_kernel, (y_in, scale, shift, w),
                       in_specs, M, N, tm, grid)


def _bn_act(y, scale, shift, residual, out_dtype, use_pallas, *, tm_target=256):
    """out = relu(y * scale + shift [+ residual]), tiled & M-parallel."""
    M, N = y.shape
    if not use_pallas:  # reference path
        out = y * scale + shift
        if residual is not None:
            out = out + residual
        return jnp.maximum(out, 0.0).astype(out_dtype)

    tm = _choose_tile(M, tm_target, 8)
    grid = (M // tm,)
    row_spec = pl.BlockSpec((tm, N), lambda i: (i, 0))
    vec_spec = pl.BlockSpec((1, N), lambda i: (0, 0))
    if residual is None:
        kern, args = bn_relu_kernel, (y, scale, shift)
        in_specs = [row_spec, vec_spec, vec_spec]
    else:
        kern, args = bn_add_relu_kernel, (y, scale, shift, residual)
        in_specs = [row_spec, vec_spec, vec_spec, row_spec]
    return pl.pallas_call(
        kern,
        grid=grid,
        in_specs=in_specs,
        out_specs=row_spec,
        out_shape=jax.ShapeDtypeStruct((M, N), out_dtype),
        compiler_params=pltpu.CompilerParams(
            dimension_semantics=("parallel",),
            vmem_limit_bytes=VMEM_LIMIT),
    )(*args)


# ------------------------------------------------------------------ glue
def _pad128(n):
    return ((n + 127) // 128) * 128


def _bn_affine(s, q, count, gamma, beta):
    """Fold training-mode batch stats into per-channel scale/shift."""
    mean = s / count
    var = q / count - mean * mean          # biased variance (PyTorch BN fwd)
    scale = gamma.reshape(1, -1) * jax.lax.rsqrt(var + BN_EPS)
    shift = beta.reshape(1, -1) - mean * scale
    return scale, shift


def _im2col(x, ksize, stride, padding):
    """x: (B,H,W,C) -> patches (B*Ho*Wo, ksize*ksize*C), channel-fastest."""
    B, H, W, C = x.shape
    if padding:
        x = jnp.pad(x, ((0, 0), (padding, padding), (padding, padding), (0, 0)))
    Ho = (H + 2 * padding - ksize) // stride + 1
    Wo = (W + 2 * padding - ksize) // stride + 1
    cols = [x[:, kh:kh + (Ho - 1) * stride + 1:stride,
              kw:kw + (Wo - 1) * stride + 1:stride, :]
            for kh in range(ksize) for kw in range(ksize)]
    patches = jnp.concatenate(cols, axis=-1)
    return patches.reshape(B * Ho * Wo, ksize * ksize * C), Ho, Wo


def _forward_impl(x_nchw, params, *, cfg, use_pallas):
    B, Cin, H, W = x_nchw.shape
    cin_p, width_p, cout4_p = cfg["cin_p"], cfg["width_p"], cfg["cout4_p"]
    stride = cfg["stride"]

    x = jnp.transpose(x_nchw, (0, 2, 3, 1))                      # NHWC
    x = jnp.pad(x, ((0, 0), (0, 0), (0, 0), (0, cin_p - Cin)))   # lane-pad C
    M = B * H * W
    identity = x.reshape(M, cin_p)                               # downsample=None

    # conv1 (1x1, bias=False) + BN1 + ReLU
    a1 = identity.astype(jnp.bfloat16)
    y1, s1, q1 = _matmul_stats(a1, params["w1"], use_pallas)
    sc1, sh1 = _bn_affine(s1, q1, M, params["g1"], params["b1"])
    a2 = _bn_act(y1, sc1, sh1, None, jnp.bfloat16, use_pallas)

    # conv2 (3x3, stride, pad=1, bias=False) + BN2 stats
    patches, Ho, Wo = _im2col(a2.reshape(B, H, W, width_p), 3, stride, 1)
    M2 = B * Ho * Wo
    y2, s2, q2 = _matmul_stats(patches, params["w2"], use_pallas)
    sc2, sh2 = _bn_affine(s2, q2, M2, params["g2"], params["b2"])

    # conv3 (1x1, bias=False): BN2-apply + ReLU fused into the matmul A-load
    y3, s3, q3 = _bn_matmul_stats(y2, sc2, sh2, params["w3"], use_pallas)
    sc3, sh3 = _bn_affine(s3, q3, M2, params["g3"], params["b3"])

    # BN3 + residual add + ReLU
    out = _bn_act(y3, sc3, sh3, identity, jnp.float32, use_pallas)

    out = out.reshape(B, Ho, Wo, cout4_p)[..., :cfg["cout4"]]
    return jnp.transpose(out, (0, 3, 1, 2))                      # back to NCHW


# ------------------------------------------------------------------ params
def _conv_weight(key, ksize, cin, cout):
    bound = 1.0 / float(cin * ksize * ksize) ** 0.5
    return jax.random.uniform(key, (ksize, ksize, cin, cout),
                              jnp.float32, -bound, bound)


def _pad_weight(w, cin_p, cout_p):
    kh, kw, cin, cout = w.shape
    w = jnp.pad(w, ((0, 0), (0, 0), (0, cin_p - cin), (0, cout_p - cout)))
    return w.reshape(kh * kw * cin_p, cout_p).astype(jnp.bfloat16)


def _pad_vec(v, n_p, fill):
    return jnp.pad(v, (0, n_p - v.shape[0]), constant_values=fill)


def build_bottleneck(key, in_channel, out_channel, stride=1,
                     groups=1, width_per_group=64):
    assert groups == 1  # TODO(synk): grouped conv (groups > 1) not implemented
    width = int(out_channel * (width_per_group / 64.0)) * groups
    cout4 = out_channel * EXPANSION
    # Module default downsample=None: identity path requires these.
    assert stride == 1 and in_channel == cout4, \
        "downsample=None path needs stride=1 and in_channel == out_channel*4"
    # TODO(synk): downsample submodule and BN running-stat updates not modeled.

    cin_p, width_p, cout4_p = _pad128(in_channel), _pad128(width), _pad128(cout4)
    k1, k2, k3 = jax.random.split(key, 3)
    params = dict(
        w1=_pad_weight(_conv_weight(k1, 1, in_channel, width), cin_p, width_p),
        w2=_pad_weight(_conv_weight(k2, 3, width, width), width_p, width_p),
        w3=_pad_weight(_conv_weight(k3, 1, width, cout4), width_p, cout4_p),
        g1=_pad_vec(jnp.ones((width,), jnp.float32), width_p, 1.0),
        b1=_pad_vec(jnp.zeros((width,), jnp.float32), width_p, 0.0),
        g2=_pad_vec(jnp.ones((width,), jnp.float32), width_p, 1.0),
        b2=_pad_vec(jnp.zeros((width,), jnp.float32), width_p, 0.0),
        g3=_pad_vec(jnp.ones((cout4,), jnp.float32), cout4_p, 1.0),
        b3=_pad_vec(jnp.zeros((cout4,), jnp.float32), cout4_p, 0.0),
    )
    cfg = dict(in_channel=in_channel, width=width, cout4=cout4,
               cin_p=cin_p, width_p=width_p, cout4_p=cout4_p, stride=stride)

    forward = jax.jit(functools.partial(_forward_impl, cfg=cfg, use_pallas=True))
    reference = jax.jit(functools.partial(_forward_impl, cfg=cfg, use_pallas=False))
    return params, forward, reference


# ------------------------------------------------------------------ main
if __name__ == "__main__":
    key = jax.random.PRNGKey(0)
    pkey, xkey = jax.random.split(key)

    batch, in_channel, height, width = 2, 64, 16, 16
    out_channel = 16          # expansion 4 -> 64 output channels == in_channel

    params, forward, reference = build_bottleneck(pkey, in_channel, out_channel,
                                                  stride=1)
    x = jax.random.normal(xkey, (batch, in_channel, height, width), jnp.float32)

    out = jax.block_until_ready(forward(x, params))

    assert out.shape == (batch, out_channel * EXPANSION, height, width), out.shape
    assert bool(jnp.all(jnp.isfinite(out)))

    ref = jax.block_until_ready(reference(x, params))
    max_err = float(jnp.max(jnp.abs(out - ref)))
    assert max_err < 1e-2, f"mismatch vs reference: {max_err}"

    print("KERNEL_OK")
</pallas_src>

<mosaic_0001>
module attributes {stable_mosaic.version = 11 : i64} {
  func.func @matmul_stats_kernel(%arg0: i32, %arg1: i32, %arg2: memref<256x128xbf16, #tpu.memory_space<vmem>>, %arg3: memref<128x128xbf16, #tpu.memory_space<vmem>>, %arg4: memref<256x128xf32, #tpu.memory_space<vmem>>, %arg5: memref<1x128xf32, #tpu.memory_space<vmem>>, %arg6: memref<1x128xf32, #tpu.memory_space<vmem>>, %arg7: memref<256x128xf32, #tpu.memory_space<vmem>>, %arg8: memref<1x128xf32, #tpu.memory_space<vmem>>, %arg9: memref<1x128xf32, #tpu.memory_space<vmem>>) attributes {dimension_semantics = [#tpu.dimension_semantics<arbitrary>, #tpu.dimension_semantics<arbitrary>], iteration_bounds = array<i64: 2, 1>, scalar_prefetch = 0 : i64, scratch_operands = 3 : i64, tpu.core_type = #tpu.core_type<tc>, window_params = [{transform_indices = @transform_0, window_bounds = array<i64: 256, 128>}, {transform_indices = @transform_1, window_bounds = array<i64: 128, 128>}, {transform_indices = @transform_2, window_bounds = array<i64: 256, 128>}, {pipeline_mode = #tpu.pipeline_mode<synchronous>, transform_indices = @transform_3, window_bounds = array<i64: 1, 128>}, {pipeline_mode = #tpu.pipeline_mode<synchronous>, transform_indices = @transform_4, window_bounds = array<i64: 1, 128>}]} {
    %c0_i32 = arith.constant 0 : i32
    %0 = arith.cmpi eq, %arg0, %c0_i32 : i32
    %c0_i32_0 = arith.constant 0 : i32
    %1 = arith.cmpi eq, %arg1, %c0_i32_0 : i32
    %2 = arith.andi %0, %1 : i1
    %3 = arith.extui %2 : i1 to i32
    %c0_i32_1 = arith.constant 0 : i32
    %4 = arith.cmpi ne, %3, %c0_i32_1 : i32
    scf.if %4 {
      %cst_13 = arith.constant 0.000000e+00 : f32
      %17 = vector.broadcast %cst_13 : f32 to vector<1x128xf32>
      %c0_14 = arith.constant 0 : index
      %c0_15 = arith.constant 0 : index
      %18 = vector.load %arg8[%c0_14, %c0_15] : memref<1x128xf32, #tpu.memory_space<vmem>>, vector<1x128xf32>
      tpu.vector_store %arg8[%c0_14, %c0_15], %17 {strides = array<i32>} : memref<1x128xf32, #tpu.memory_space<vmem>>, vector<1x128xf32>,
      %cst_16 = arith.constant 0.000000e+00 : f32
      %19 = vector.broadcast %cst_16 : f32 to vector<1x128xf32>
      %c0_17 = arith.constant 0 : index
      %c0_18 = arith.constant 0 : index
      %20 = vector.load %arg9[%c0_17, %c0_18] : memref<1x128xf32, #tpu.memory_space<vmem>>, vector<1x128xf32>
      tpu.vector_store %arg9[%c0_17, %c0_18], %19 {strides = array<i32>} : memref<1x128xf32, #tpu.memory_space<vmem>>, vector<1x128xf32>,
    } else {
    }
    %c0_i32_2 = arith.constant 0 : i32
    %5 = arith.cmpi eq, %arg1, %c0_i32_2 : i32
    %6 = arith.extui %5 : i1 to i32
    %c0_i32_3 = arith.constant 0 : i32
    %7 = arith.cmpi ne, %6, %c0_i32_3 : i32
    scf.if %7 {
      %cst_13 = arith.constant 0.000000e+00 : f32
      %17 = vector.broadcast %cst_13 : f32 to vector<256x128xf32>
      %c0_14 = arith.constant 0 : index
      %c0_15 = arith.constant 0 : index
      %18 = vector.load %arg7[%c0_14, %c0_15] : memref<256x128xf32, #tpu.memory_space<vmem>>, vector<256x128xf32>
      tpu.vector_store %arg7[%c0_14, %c0_15], %17 {strides = array<i32>} : memref<256x128xf32, #tpu.memory_space<vmem>>, vector<256x128xf32>,
    } else {
    }
    %c0 = arith.constant 0 : index
    %c0_4 = arith.constant 0 : index
    %8 = vector.load %arg7[%c0, %c0_4] : memref<256x128xf32, #tpu.memory_space<vmem>>, vector<256x128xf32>
    %c0_5 = arith.constant 0 : index
    %c0_6 = arith.constant 0 : index
    %9 = vector.load %arg2[%c0_5, %c0_6] : memref<256x128xbf16, #tpu.memory_space<vmem>>, vector<256x128xbf16>
    %c0_7 = arith.constant 0 : index
    %c0_8 = arith.constant 0 : index
    %10 = vector.load %arg3[%c0_7, %c0_8] : memref<128x128xbf16, #tpu.memory_space<vmem>>, vector<128x128xbf16>
    %cst = arith.constant dense<0.000000e+00> : vector<256x128xf32>
    %11 = tpu.matmul %9, %10, %cst {dimension_numbers = #tpu.dot_dimension_numbers<[1], [0], [0], [1], [0, 0, 1, 1], [], []>} : vector<256x128xbf16>, vector<128x128xbf16>, vector<256x128xf32> -> vector<256x128xf32>
    %12 = arith.addf %8, %11 : vector<256x128xf32>
    %c0_9 = arith.constant 0 : index
    %c0_10 = arith.constant 0 : index
    %13 = vector.load %arg7[%c0_9, %c0_10] : memref<256x128xf32, #tpu.memory_space<vmem>>, vector<256x128xf32>
    tpu.vector_store %arg7[%c0_9, %c0_10], %12 {strides = array<i32>} : memref<256x128xf32, #tpu.memory_space<vmem>>, vector<256x128xf32>,
    %c0_i32_11 = arith.constant 0 : i32
    %14 = arith.cmpi eq, %arg1, %c0_i32_11 : i32
    %15 = arith.extui %14 : i1 to i32
    %c0_i32_12 = arith.constant 0 : i32
    %16 = arith.cmpi ne, %15, %c0_i32_12 : i32
    scf.if %16 {
      %c0_13 = arith.constant 0 : index
      %c0_14 = arith.constant 0 : index
      %17 = vector.load %arg7[%c0_13, %c0_14] : memref<256x128xf32, #tpu.memory_space<vmem>>, vector<256x128xf32>
      %c0_15 = arith.constant 0 : index
      %c0_16 = arith.constant 0 : index
      %18 = vector.load %arg4[%c0_15, %c0_16] : memref<256x128xf32, #tpu.memory_space<vmem>>, vector<256x128xf32>
      tpu.vector_store %arg4[%c0_15, %c0_16], %17 {strides = array<i32>} : memref<256x128xf32, #tpu.memory_space<vmem>>, vector<256x128xf32>,
      %c0_17 = arith.constant 0 : index
      %c0_18 = arith.constant 0 : index
      %19 = vector.load %arg8[%c0_17, %c0_18] : memref<1x128xf32, #tpu.memory_space<vmem>>, vector<1x128xf32>
      %cst_19 = arith.constant dense<0.000000e+00> : vector<128xf32>
      %20 = vector.multi_reduction <add>, %17, %cst_19 [0] : vector<256x128xf32> to vector<128xf32>
      %21 = vector.shape_cast %20 : vector<128xf32> to vector<1x128xf32>
      %22 = arith.addf %19, %21 : vector<1x128xf32>
      %c0_20 = arith.constant 0 : index
      %c0_21 = arith.constant 0 : index
      %23 = vector.load %arg8[%c0_20, %c0_21] : memref<1x128xf32, #tpu.memory_space<vmem>>, vector<1x128xf32>
      tpu.vector_store %arg8[%c0_20, %c0_21], %22 {strides = array<i32>} : memref<1x128xf32, #tpu.memory_space<vmem>>, vector<1x128xf32>,
      %c0_22 = arith.constant 0 : index
      %c0_23 = arith.constant 0 : index
      %24 = vector.load %arg9[%c0_22, %c0_23] : memref<1x128xf32, #tpu.memory_space<vmem>>, vector<1x128xf32>
      %25 = arith.mulf %17, %17 : vector<256x128xf32>
      %cst_24 = arith.constant dense<0.000000e+00> : vector<128xf32>
      %26 = vector.multi_reduction <add>, %25, %cst_24 [0] : vector<256x128xf32> to vector<128xf32>
      %27 = vector.shape_cast %26 : vector<128xf32> to vector<1x128xf32>
      %28 = arith.addf %24, %27 : vector<1x128xf32>
      %c0_25 = arith.constant 0 : index
      %c0_26 = arith.constant 0 : index
      %29 = vector.load %arg9[%c0_25, %c0_26] : memref<1x128xf32, #tpu.memory_space<vmem>>, vector<1x128xf32>
      tpu.vector_store %arg9[%c0_25, %c0_26], %28 {strides = array<i32>} : memref<1x128xf32, #tpu.memory_space<vmem>>, vector<1x128xf32>,
      %c0_27 = arith.constant 0 : index
      %c0_28 = arith.constant 0 : index
      %30 = vector.load %arg8[%c0_27, %c0_28] : memref<1x128xf32, #tpu.memory_space<vmem>>, vector<1x128xf32>
      %c0_29 = arith.constant 0 : index
      %c0_30 = arith.constant 0 : index
      %31 = vector.load %arg5[%c0_29, %c0_30] : memref<1x128xf32, #tpu.memory_space<vmem>>, vector<1x128xf32>
      tpu.vector_store %arg5[%c0_29, %c0_30], %30 {strides = array<i32>} : memref<1x128xf32, #tpu.memory_space<vmem>>, vector<1x128xf32>,
      %c0_31 = arith.constant 0 : index
      %c0_32 = arith.constant 0 : index
      %32 = vector.load %arg9[%c0_31, %c0_32] : memref<1x128xf32, #tpu.memory_space<vmem>>, vector<1x128xf32>
      %c0_33 = arith.constant 0 : index
      %c0_34 = arith.constant 0 : index
      %33 = vector.load %arg6[%c0_33, %c0_34] : memref<1x128xf32, #tpu.memory_space<vmem>>, vector<1x128xf32>
      tpu.vector_store %arg6[%c0_33, %c0_34], %32 {strides = array<i32>} : memref<1x128xf32, #tpu.memory_space<vmem>>, vector<1x128xf32>,
    } else {
    }
    return
  }
  func.func @transform_0(%arg0: i32, %arg1: i32) -> (i32, i32) {
    %c0_i32 = arith.constant 0 : i32
    return %arg0, %arg1 : i32, i32
  }
  func.func @transform_1(%arg0: i32, %arg1: i32) -> (i32, i32) {
    %c0_i32 = arith.constant 0 : i32
    %c0_i32_0 = arith.constant 0 : i32
    return %arg1, %c0_i32 : i32, i32
  }
  func.func @transform_2(%arg0: i32, %arg1: i32) -> (i32, i32) {
    %c0_i32 = arith.constant 0 : i32
    %c0_i32_0 = arith.constant 0 : i32
    return %arg0, %c0_i32 : i32, i32
  }
  func.func @transform_3(%arg0: i32, %arg1: i32) -> (i32, i32) {
    %c0_i32 = arith.constant 0 : i32
    %c0_i32_0 = arith.constant 0 : i32
    %c0_i32_1 = arith.constant 0 : i32
    return %c0_i32, %c0_i32_0 : i32, i32
  }
  func.func @transform_4(%arg0: i32, %arg1: i32) -> (i32, i32) {
    %c0_i32 = arith.constant 0 : i32
    %c0_i32_0 = arith.constant 0 : i32
    %c0_i32_1 = arith.constant 0 : i32
    return %c0_i32, %c0_i32_0 : i32, i32
  }
}

module attributes {stable_mosaic.version = 11 : i64} {
  func.func @bn_relu_kernel(%arg0: i32, %arg1: memref<256x128xf32, #tpu.memory_space<vmem>>, %arg2: memref<1x128xf32, #tpu.memory_space<vmem>>, %arg3: memref<1x128xf32, #tpu.memory_space<vmem>>, %arg4: memref<256x128xbf16, #tpu.memory_space<vmem>>) attributes {dimension_semantics = [#tpu.dimension_semantics<parallel>], iteration_bounds = array<i64: 2>, scalar_prefetch = 0 : i64, scratch_operands = 0 : i64, tpu.core_type = #tpu.core_type<tc>, window_params = [{transform_indices = @transform_0, window_bounds = array<i64: 256, 128>}, {pipeline_mode = #tpu.pipeline_mode<synchronous>, transform_indices = @transform_1, window_bounds = array<i64: 1, 128>}, {pipeline_mode = #tpu.pipeline_mode<synchronous>, transform_indices = @transform_2, window_bounds = array<i64: 1, 128>}, {transform_indices = @transform_3, window_bounds = array<i64: 256, 128>}]} {
    %c0 = arith.constant 0 : index
    %c0_0 = arith.constant 0 : index
    %0 = vector.load %arg1[%c0, %c0_0] : memref<256x128xf32, #tpu.memory_space<vmem>>, vector<256x128xf32>
    %c0_1 = arith.constant 0 : index
    %c0_2 = arith.constant 0 : index
    %1 = vector.load %arg2[%c0_1, %c0_2] : memref<1x128xf32, #tpu.memory_space<vmem>>, vector<1x128xf32>
    %2 = vector.broadcast %1 : vector<1x128xf32> to vector<256x128xf32>
    %3 = arith.mulf %0, %2 : vector<256x128xf32>
    %c0_3 = arith.constant 0 : index
    %c0_4 = arith.constant 0 : index
    %4 = vector.load %arg3[%c0_3, %c0_4] : memref<1x128xf32, #tpu.memory_space<vmem>>, vector<1x128xf32>
    %5 = vector.broadcast %4 : vector<1x128xf32> to vector<256x128xf32>
    %6 = arith.addf %3, %5 : vector<256x128xf32>
    %cst = arith.constant 0.000000e+00 : f32
    %7 = vector.broadcast %cst : f32 to vector<256x128xf32>
    %8 = arith.maximumf %6, %7 : vector<256x128xf32>
    %9 = arith.truncf %8 : vector<256x128xf32> to vector<256x128xbf16>
    %c0_5 = arith.constant 0 : index
    %c0_6 = arith.constant 0 : index
    %10 = vector.load %arg4[%c0_5, %c0_6] : memref<256x128xbf16, #tpu.memory_space<vmem>>, vector<256x128xbf16>
    tpu.vector_store %arg4[%c0_5, %c0_6], %9 {strides = array<i32>} : memref<256x128xbf16, #tpu.memory_space<vmem>>, vector<256x128xbf16>,
    return
  }
  func.func @transform_0(%arg0: i32) -> (i32, i32) {
    %c0_i32 = arith.constant 0 : i32
    %c0_i32_0 = arith.constant 0 : i32
    return %arg0, %c0_i32 : i32, i32
  }
  func.func @transform_1(%arg0: i32) -> (i32, i32) {
    %c0_i32 = arith.constant 0 : i32
    %c0_i32_0 = arith.constant 0 : i32
    %c0_i32_1 = arith.constant 0 : i32
    return %c0_i32, %c0_i32_0 : i32, i32
  }
  func.func @transform_2(%arg0: i32) -> (i32, i32) {
    %c0_i32 = arith.constant 0 : i32
    %c0_i32_0 = arith.constant 0 : i32
    %c0_i32_1 = arith.constant 0 : i32
    return %c0_i32, %c0_i32_0 : i32, i32
  }
  func.func @transform_3(%arg0: i32) -> (i32, i32) {
    %c0_i32 = arith.constant 0 : i32
    %c0_i32_0 = arith.constant 0 : i32
    return %arg0, %c0_i32 : i32, i32
  }
}

module attributes {stable_mosaic.version = 11 : i64} {
  func.func @matmul_stats_kernel(%arg0: i32, %arg1: i32, %arg2: memref<256x384xbf16, #tpu.memory_space<vmem>>, %arg3: memref<384x128xbf16, #tpu.memory_space<vmem>>, %arg4: memref<256x128xf32, #tpu.memory_space<vmem>>, %arg5: memref<1x128xf32, #tpu.memory_space<vmem>>, %arg6: memref<1x128xf32, #tpu.memory_space<vmem>>, %arg7: memref<256x128xf32, #tpu.memory_space<vmem>>, %arg8: memref<1x128xf32, #tpu.memory_space<vmem>>, %arg9: memref<1x128xf32, #tpu.memory_space<vmem>>) attributes {dimension_semantics = [#tpu.dimension_semantics<arbitrary>, #tpu.dimension_semantics<arbitrary>], iteration_bounds = array<i64: 2, 3>, scalar_prefetch = 0 : i64, scratch_operands = 3 : i64, tpu.core_type = #tpu.core_type<tc>, window_params = [{transform_indices = @transform_0, window_bounds = array<i64: 256, 384>}, {transform_indices = @transform_1, window_bounds = array<i64: 384, 128>}, {transform_indices = @transform_2, window_bounds = array<i64: 256, 128>}, {pipeline_mode = #tpu.pipeline_mode<synchronous>, transform_indices = @transform_3, window_bounds = array<i64: 1, 128>}, {pipeline_mode = #tpu.pipeline_mode<synchronous>, transform_indices = @transform_4, window_bounds = array<i64: 1, 128>}]} {
    %c0_i32 = arith.constant 0 : i32
    %0 = arith.cmpi eq, %arg0, %c0_i32 : i32
    %c0_i32_0 = arith.constant 0 : i32
    %1 = arith.cmpi eq, %arg1, %c0_i32_0 : i32
    %2 = arith.andi %0, %1 : i1
    %3 = arith.extui %2 : i1 to i32
    %c0_i32_1 = arith.constant 0 : i32
    %4 = arith.cmpi ne, %3, %c0_i32_1 : i32
    scf.if %4 {
      %cst_12 = arith.constant 0.000000e+00 : f32
      %17 = vector.broadcast %cst_12 : f32 to vector<1x128xf32>
      %c0_13 = arith.constant 0 : index
      %c0_14 = arith.constant 0 : index
      %18 = vector.load %arg8[%c0_13, %c0_14] : memref<1x128xf32, #tpu.memory_space<vmem>>, vector<1x128xf32>
      tpu.vector_store %arg8[%c0_13, %c0_14], %17 {strides = array<i32>} : memref<1x128xf32, #tpu.memory_space<vmem>>, vector<1x128xf32>,
      %cst_15 = arith.constant 0.000000e+00 : f32
      %19 = vector.broadcast %cst_15 : f32 to vector<1x128xf32>
      %c0_16 = arith.constant 0 : index
      %c0_17 = arith.constant 0 : index
      %20 = vector.load %arg9[%c0_16, %c0_17] : memref<1x128xf32, #tpu.memory_space<vmem>>, vector<1x128xf32>
      tpu.vector_store %arg9[%c0_16, %c0_17], %19 {strides = array<i32>} : memref<1x128xf32, #tpu.memory_space<vmem>>, vector<1x128xf32>,
    } else {
    }
    %c0_i32_2 = arith.constant 0 : i32
    %5 = arith.cmpi eq, %arg1, %c0_i32_2 : i32
    %6 = arith.extui %5 : i1 to i32
    %c0_i32_3 = arith.constant 0 : i32
    %7 = arith.cmpi ne, %6, %c0_i32_3 : i32
    scf.if %7 {
      %cst_12 = arith.constant 0.000000e+00 : f32
      %17 = vector.broadcast %cst_12 : f32 to vector<256x128xf32>
      %c0_13 = arith.constant 0 : index
      %c0_14 = arith.constant 0 : index
      %18 = vector.load %arg7[%c0_13, %c0_14] : memref<256x128xf32, #tpu.memory_space<vmem>>, vector<256x128xf32>
      tpu.vector_store %arg7[%c0_13, %c0_14], %17 {strides = array<i32>} : memref<256x128xf32, #tpu.memory_space<vmem>>, vector<256x128xf32>,
    } else {
    }
    %c0 = arith.constant 0 : index
    %c0_4 = arith.constant 0 : index
    %8 = vector.load %arg7[%c0, %c0_4] : memref<256x128xf32, #tpu.memory_space<vmem>>, vector<256x128xf32>
    %c0_5 = arith.constant 0 : index
    %c0_6 = arith.constant 0 : index
    %9 = vector.load %arg2[%c0_5, %c0_6] : memref<256x384xbf16, #tpu.memory_space<vmem>>, vector<256x384xbf16>
    %c0_7 = arith.constant 0 : index
    %c0_8 = arith.constant 0 : index
    %10 = vector.load %arg3[%c0_7, %c0_8] : memref<384x128xbf16, #tpu.memory_space<vmem>>, vector<384x128xbf16>
    %cst = arith.constant dense<0.000000e+00> : vector<256x128xf32>
    %11 = tpu.matmul %9, %10, %cst {dimension_numbers = #tpu.dot_dimension_numbers<[1], [0], [0], [1], [0, 0, 1, 1], [], []>} : vector<256x384xbf16>, vector<384x128xbf16>, vector<256x128xf32> -> vector<256x128xf32>
    %12 = arith.addf %8, %11 : vector<256x128xf32>
    %c0_9 = arith.constant 0 : index
    %c0_10 = arith.constant 0 : index
    %13 = vector.load %arg7[%c0_9, %c0_10] : memref<256x128xf32, #tpu.memory_space<vmem>>, vector<256x128xf32>
    tpu.vector_store %arg7[%c0_9, %c0_10], %12 {strides = array<i32>} : memref<256x128xf32, #tpu.memory_space<vmem>>, vector<256x128xf32>,
    %c2_i32 = arith.constant 2 : i32
    %14 = arith.cmpi eq, %arg1, %c2_i32 : i32
    %15 = arith.extui %14 : i1 to i32
    %c0_i32_11 = arith.constant 0 : i32
    %16 = arith.cmpi ne, %15, %c0_i32_11 : i32
    scf.if %16 {
      %c0_12 = arith.constant 0 : index
      %c0_13 = arith.constant 0 : index
      %17 = vector.load %arg7[%c0_12, %c0_13] : memref<256x128xf32, #tpu.memory_space<vmem>>, vector<256x128xf32>
      %c0_14 = arith.constant 0 : index
      %c0_15 = arith.constant 0 : index
      %18 = vector.load %arg4[%c0_14, %c0_15] : memref<256x128xf32, #tpu.memory_space<vmem>>, vector<256x128xf32>
      tpu.vector_store %arg4[%c0_14, %c0_15], %17 {strides = array<i32>} : memref<256x128xf32, #tpu.memory_space<vmem>>, vector<256x128xf32>,
      %c0_16 = arith.constant 0 : index
      %c0_17 = arith.constant 0 : index
      %19 = vector.load %arg8[%c0_16, %c0_17] : memref<1x128xf32, #tpu.memory_space<vmem>>, vector<1x128xf32>
      %cst_18 = arith.constant dense<0.000000e+00> : vector<128xf32>
      %20 = vector.multi_reduction <add>, %17, %cst_18 [0] : vector<256x128xf32> to vector<128xf32>
      %21 = vector.shape_cast %20 : vector<128xf32> to vector<1x128xf32>
      %22 = arith.addf %19, %21 : vector<1x128xf32>
      %c0_19 = arith.constant 0 : index
      %c0_20 = arith.constant 0 : index
      %23 = vector.load %arg8[%c0_19, %c0_20] : memref<1x128xf32, #tpu.memory_space<vmem>>, vector<1x128xf32>
      tpu.vector_store %arg8[%c0_19, %c0_20], %22 {strides = array<i32>} : memref<1x128xf32, #tpu.memory_space<vmem>>, vector<1x128xf32>,
      %c0_21 = arith.constant 0 : index
      %c0_22 = arith.constant 0 : index
      %24 = vector.load %arg9[%c0_21, %c0_22] : memref<1x128xf32, #tpu.memory_space<vmem>>, vector<1x128xf32>
      %25 = arith.mulf %17, %17 : vector<256x128xf32>
      %cst_23 = arith.constant dense<0.000000e+00> : vector<128xf32>
      %26 = vector.multi_reduction <add>, %25, %cst_23 [0] : vector<256x128xf32> to vector<128xf32>
      %27 = vector.shape_cast %26 : vector<128xf32> to vector<1x128xf32>
      %28 = arith.addf %24, %27 : vector<1x128xf32>
      %c0_24 = arith.constant 0 : index
      %c0_25 = arith.constant 0 : index
      %29 = vector.load %arg9[%c0_24, %c0_25] : memref<1x128xf32, #tpu.memory_space<vmem>>, vector<1x128xf32>
      tpu.vector_store %arg9[%c0_24, %c0_25], %28 {strides = array<i32>} : memref<1x128xf32, #tpu.memory_space<vmem>>, vector<1x128xf32>,
      %c0_26 = arith.constant 0 : index
      %c0_27 = arith.constant 0 : index
      %30 = vector.load %arg8[%c0_26, %c0_27] : memref<1x128xf32, #tpu.memory_space<vmem>>, vector<1x128xf32>
      %c0_28 = arith.constant 0 : index
      %c0_29 = arith.constant 0 : index
      %31 = vector.load %arg5[%c0_28, %c0_29] : memref<1x128xf32, #tpu.memory_space<vmem>>, vector<1x128xf32>
      tpu.vector_store %arg5[%c0_28, %c0_29], %30 {strides = array<i32>} : memref<1x128xf32, #tpu.memory_space<vmem>>, vector<1x128xf32>,
      %c0_30 = arith.constant 0 : index
      %c0_31 = arith.constant 0 : index
      %32 = vector.load %arg9[%c0_30, %c0_31] : memref<1x128xf32, #tpu.memory_space<vmem>>, vector<1x128xf32>
      %c0_32 = arith.constant 0 : index
      %c0_33 = arith.constant 0 : index
      %33 = vector.load %arg6[%c0_32, %c0_33] : memref<1x128xf32, #tpu.memory_space<vmem>>, vector<1x128xf32>
      tpu.vector_store %arg6[%c0_32, %c0_33], %32 {strides = array<i32>} : memref<1x128xf32, #tpu.memory_space<vmem>>, vector<1x128xf32>,
    } else {
    }
    return
  }
  func.func @transform_0(%arg0: i32, %arg1: i32) -> (i32, i32) {
    %c0_i32 = arith.constant 0 : i32
    return %arg0, %arg1 : i32, i32
  }
  func.func @transform_1(%arg0: i32, %arg1: i32) -> (i32, i32) {
    %c0_i32 = arith.constant 0 : i32
    %c0_i32_0 = arith.constant 0 : i32
    return %arg1, %c0_i32 : i32, i32
  }
  func.func @transform_2(%arg0: i32, %arg1: i32) -> (i32, i32) {
    %c0_i32 = arith.constant 0 : i32
    %c0_i32_0 = arith.constant 0 : i32
    return %arg0, %c0_i32 : i32, i32
  }
  func.func @transform_3(%arg0: i32, %arg1: i32) -> (i32, i32) {
    %c0_i32 = arith.constant 0 : i32
    %c0_i32_0 = arith.constant 0 : i32
    %c0_i32_1 = arith.constant 0 : i32
    return %c0_i32, %c0_i32_0 : i32, i32
  }
  func.func @transform_4(%arg0: i32, %arg1: i32) -> (i32, i32) {
    %c0_i32 = arith.constant 0 : i32
    %c0_i32_0 = arith.constant 0 : i32
    %c0_i32_1 = arith.constant 0 : i32
    return %c0_i32, %c0_i32_0 : i32, i32
  }
}

module attributes {stable_mosaic.version = 11 : i64} {
  func.func @bn_matmul_stats_kernel(%arg0: i32, %arg1: i32, %arg2: memref<256x128xf32, #tpu.memory_space<vmem>>, %arg3: memref<1x128xf32, #tpu.memory_space<vmem>>, %arg4: memref<1x128xf32, #tpu.memory_space<vmem>>, %arg5: memref<128x128xbf16, #tpu.memory_space<vmem>>, %arg6: memref<256x128xf32, #tpu.memory_space<vmem>>, %arg7: memref<1x128xf32, #tpu.memory_space<vmem>>, %arg8: memref<1x128xf32, #tpu.memory_space<vmem>>, %arg9: memref<256x128xf32, #tpu.memory_space<vmem>>, %arg10: memref<1x128xf32, #tpu.memory_space<vmem>>, %arg11: memref<1x128xf32, #tpu.memory_space<vmem>>) attributes {dimension_semantics = [#tpu.dimension_semantics<arbitrary>, #tpu.dimension_semantics<arbitrary>], iteration_bounds = array<i64: 2, 1>, scalar_prefetch = 0 : i64, scratch_operands = 3 : i64, tpu.core_type = #tpu.core_type<tc>, window_params = [{transform_indices = @transform_0, window_bounds = array<i64: 256, 128>}, {transform_indices = @transform_1, window_bounds = array<i64: 1, 128>}, {transform_indices = @transform_2, window_bounds = array<i64: 1, 128>}, {transform_indices = @transform_3, window_bounds = array<i64: 128, 128>}, {transform_indices = @transform_4, window_bounds = array<i64: 256, 128>}, {pipeline_mode = #tpu.pipeline_mode<synchronous>, transform_indices = @transform_5, window_bounds = array<i64: 1, 128>}, {pipeline_mode = #tpu.pipeline_mode<synchronous>, transform_indices = @transform_6, window_bounds = array<i64: 1, 128>}]} {
    %c0_i32 = arith.constant 0 : i32
    %0 = arith.cmpi eq, %arg0, %c0_i32 : i32
    %c0_i32_0 = arith.constant 0 : i32
    %1 = arith.cmpi eq, %arg1, %c0_i32_0 : i32
    %2 = arith.andi %0, %1 : i1
    %3 = arith.extui %2 : i1 to i32
    %c0_i32_1 = arith.constant 0 : i32
    %4 = arith.cmpi ne, %3, %c0_i32_1 : i32
    scf.if %4 {
      %cst_18 = arith.constant 0.000000e+00 : f32
      %26 = vector.broadcast %cst_18 : f32 to vector<1x128xf32>
      %c0_19 = arith.constant 0 : index
      %c0_20 = arith.constant 0 : index
      %27 = vector.load %arg10[%c0_19, %c0_20] : memref<1x128xf32, #tpu.memory_space<vmem>>, vector<1x128xf32>
      tpu.vector_store %arg10[%c0_19, %c0_20], %26 {strides = array<i32>} : memref<1x128xf32, #tpu.memory_space<vmem>>, vector<1x128xf32>,
      %cst_21 = arith.constant 0.000000e+00 : f32
      %28 = vector.broadcast %cst_21 : f32 to vector<1x128xf32>
      %c0_22 = arith.constant 0 : index
      %c0_23 = arith.constant 0 : index
      %29 = vector.load %arg11[%c0_22, %c0_23] : memref<1x128xf32, #tpu.memory_space<vmem>>, vector<1x128xf32>
      tpu.vector_store %arg11[%c0_22, %c0_23], %28 {strides = array<i32>} : memref<1x128xf32, #tpu.memory_space<vmem>>, vector<1x128xf32>,
    } else {
    }
    %c0_i32_2 = arith.constant 0 : i32
    %5 = arith.cmpi eq, %arg1, %c0_i32_2 : i32
    %6 = arith.extui %5 : i1 to i32
    %c0_i32_3 = arith.constant 0 : i32
    %7 = arith.cmpi ne, %6, %c0_i32_3 : i32
    scf.if %7 {
      %cst_18 = arith.constant 0.000000e+00 : f32
      %26 = vector.broadcast %cst_18 : f32 to vector<256x128xf32>
      %c0_19 = arith.constant 0 : index
      %c0_20 = arith.constant 0 : index
      %27 = vector.load %arg9[%c0_19, %c0_20] : memref<256x128xf32, #tpu.memory_space<vmem>>, vector<256x128xf32>
      tpu.vector_store %arg9[%c0_19, %c0_20], %26 {strides = array<i32>} : memref<256x128xf32, #tpu.memory_space<vmem>>, vector<256x128xf32>,
    } else {
    }
    %c0 = arith.constant 0 : index
    %c0_4 = arith.constant 0 : index
    %8 = vector.load %arg2[%c0, %c0_4] : memref<256x128xf32, #tpu.memory_space<vmem>>, vector<256x128xf32>
    %c0_5 = arith.constant 0 : index
    %c0_6 = arith.constant 0 : index
    %9 = vector.load %arg3[%c0_5, %c0_6] : memref<1x128xf32, #tpu.memory_space<vmem>>, vector<1x128xf32>
    %10 = vector.broadcast %9 : vector<1x128xf32> to vector<256x128xf32>
    %11 = arith.mulf %8, %10 : vector<256x128xf32>
    %c0_7 = arith.constant 0 : index
    %c0_8 = arith.constant 0 : index
    %12 = vector.load %arg4[%c0_7, %c0_8] : memref<1x128xf32, #tpu.memory_space<vmem>>, vector<1x128xf32>
    %13 = vector.broadcast %12 : vector<1x128xf32> to vector<256x128xf32>
    %14 = arith.addf %11, %13 : vector<256x128xf32>
    %cst = arith.constant 0.000000e+00 : f32
    %15 = vector.broadcast %cst : f32 to vector<256x128xf32>
    %16 = arith.maximumf %14, %15 : vector<256x128xf32>
    %c0_9 = arith.constant 0 : index
    %c0_10 = arith.constant 0 : index
    %17 = vector.load %arg9[%c0_9, %c0_10] : memref<256x128xf32, #tpu.memory_space<vmem>>, vector<256x128xf32>
    %18 = arith.truncf %16 : vector<256x128xf32> to vector<256x128xbf16>
    %c0_11 = arith.constant 0 : index
    %c0_12 = arith.constant 0 : index
    %19 = vector.load %arg5[%c0_11, %c0_12] : memref<128x128xbf16, #tpu.memory_space<vmem>>, vector<128x128xbf16>
    %cst_13 = arith.constant dense<0.000000e+00> : vector<256x128xf32>
    %20 = tpu.matmul %18, %19, %cst_13 {dimension_numbers = #tpu.dot_dimension_numbers<[1], [0], [0], [1], [0, 0, 1, 1], [], []>} : vector<256x128xbf16>, vector<128x128xbf16>, vector<256x128xf32> -> vector<256x128xf32>
    %21 = arith.addf %17, %20 : vector<256x128xf32>
    %c0_14 = arith.constant 0 : index
    %c0_15 = arith.constant 0 : index
    %22 = vector.load %arg9[%c0_14, %c0_15] : memref<256x128xf32, #tpu.memory_space<vmem>>, vector<256x128xf32>
    tpu.vector_store %arg9[%c0_14, %c0_15], %21 {strides = array<i32>} : memref<256x128xf32, #tpu.memory_space<vmem>>, vector<256x128xf32>,
    %c0_i32_16 = arith.constant 0 : i32
    %23 = arith.cmpi eq, %arg1, %c0_i32_16 : i32
    %24 = arith.extui %23 : i1 to i32
    %c0_i32_17 = arith.constant 0 : i32
    %25 = arith.cmpi ne, %24, %c0_i32_17 : i32
    scf.if %25 {
      %c0_18 = arith.constant 0 : index
      %c0_19 = arith.constant 0 : index
      %26 = vector.load %arg9[%c0_18, %c0_19] : memref<256x128xf32, #tpu.memory_space<vmem>>, vector<256x128xf32>
      %c0_20 = arith.constant 0 : index
      %c0_21 = arith.constant 0 : index
      %27 = vector.load %arg6[%c0_20, %c0_21] : memref<256x128xf32, #tpu.memory_space<vmem>>, vector<256x128xf32>
      tpu.vector_store %arg6[%c0_20, %c0_21], %26 {strides = array<i32>} : memref<256x128xf32, #tpu.memory_space<vmem>>, vector<256x128xf32>,
      %c0_22 = arith.constant 0 : index
      %c0_23 = arith.constant 0 : index
      %28 = vector.load %arg10[%c0_22, %c0_23] : memref<1x128xf32, #tpu.memory_space<vmem>>, vector<1x128xf32>
      %cst_24 = arith.constant dense<0.000000e+00> : vector<128xf32>
      %29 = vector.multi_reduction <add>, %26, %cst_24 [0] : vector<256x128xf32> to vector<128xf32>
      %30 = vector.shape_cast %29 : vector<128xf32> to vector<1x128xf32>
      %31 = arith.addf %28, %30 : vector<1x128xf32>
      %c0_25 = arith.constant 0 : index
      %c0_26 = arith.constant 0 : index
      %32 = vector.load %arg10[%c0_25, %c0_26] : memref<1x128xf32, #tpu.memory_space<vmem>>, vector<1x128xf32>
      tpu.vector_store %arg10[%c0_25, %c0_26], %31 {strides = array<i32>} : memref<1x128xf32, #tpu.memory_space<vmem>>, vector<1x128xf32>,
      %c0_27 = arith.constant 0 : index
      %c0_28 = arith.constant 0 : index
      %33 = vector.load %arg11[%c0_27, %c0_28] : memref<1x128xf32, #tpu.memory_space<vmem>>, vector<1x128xf32>
      %34 = arith.mulf %26, %26 : vector<256x128xf32>
      %cst_29 = arith.constant dense<0.000000e+00> : vector<128xf32>
      %35 = vector.multi_reduction <add>, %34, %cst_29 [0] : vector<256x128xf32> to vector<128xf32>
      %36 = vector.shape_cast %35 : vector<128xf32> to vector<1x128xf32>
      %37 = arith.addf %33, %36 : vector<1x128xf32>
      %c0_30 = arith.constant 0 : index
      %c0_31 = arith.constant 0 : index
      %38 = vector.load %arg11[%c0_30, %c0_31] : memref<1x128xf32, #tpu.memory_space<vmem>>, vector<1x128xf32>
      tpu.vector_store %arg11[%c0_30, %c0_31], %37 {strides = array<i32>} : memref<1x128xf32, #tpu.memory_space<vmem>>, vector<1x128xf32>,
      %c0_32 = arith.constant 0 : index
      %c0_33 = arith.constant 0 : index
      %39 = vector.load %arg10[%c0_32, %c0_33] : memref<1x128xf32, #tpu.memory_space<vmem>>, vector<1x128xf32>
      %c0_34 = arith.constant 0 : index
      %c0_35 = arith.constant 0 : index
      %40 = vector.load %arg7[%c0_34, %c0_35] : memref<1x128xf32, #tpu.memory_space<vmem>>, vector<1x128xf32>
      tpu.vector_store %arg7[%c0_34, %c0_35], %39 {strides = array<i32>} : memref<1x128xf32, #tpu.memory_space<vmem>>, vector<1x128xf32>,
      %c0_36 = arith.constant 0 : index
      %c0_37 = arith.constant 0 : index
      %41 = vector.load %arg11[%c0_36, %c0_37] : memref<1x128xf32, #tpu.memory_space<vmem>>, vector<1x128xf32>
      %c0_38 = arith.constant 0 : index
      %c0_39 = arith.constant 0 : index
      %42 = vector.load %arg8[%c0_38, %c0_39] : memref<1x128xf32, #tpu.memory_space<vmem>>, vector<1x128xf32>
      tpu.vector_store %arg8[%c0_38, %c0_39], %41 {strides = array<i32>} : memref<1x128xf32, #tpu.memory_space<vmem>>, vector<1x128xf32>,
    } else {
    }
    return
  }
  func.func @transform_0(%arg0: i32, %arg1: i32) -> (i32, i32) {
    %c0_i32 = arith.constant 0 : i32
    return %arg0, %arg1 : i32, i32
  }
  func.func @transform_1(%arg0: i32, %arg1: i32) -> (i32, i32) {
    %c0_i32 = arith.constant 0 : i32
    %c0_i32_0 = arith.constant 0 : i32
    return %c0_i32, %arg1 : i32, i32
  }
  func.func @transform_2(%arg0: i32, %arg1: i32) -> (i32, i32) {
    %c0_i32 = arith.constant 0 : i32
    %c0_i32_0 = arith.constant 0 : i32
    return %c0_i32, %arg1 : i32, i32
  }
  func.func @transform_3(%arg0: i32, %arg1: i32) -> (i32, i32) {
    %c0_i32 = arith.constant 0 : i32
    %c0_i32_0 = arith.constant 0 : i32
    return %arg1, %c0_i32 : i32, i32
  }
  func.func @transform_4(%arg0: i32, %arg1: i32) -> (i32, i32) {
    %c0_i32 = arith.constant 0 : i32
    %c0_i32_0 = arith.constant 0 : i32
    return %arg0, %c0_i32 : i32, i32
  }
  func.func @transform_5(%arg0: i32, %arg1: i32) -> (i32, i32) {
    %c0_i32 = arith.constant 0 : i32
    %c0_i32_0 = arith.constant 0 : i32
    %c0_i32_1 = arith.constant 0 : i32
    return %c0_i32, %c0_i32_0 : i32, i32
  }
  func.func @transform_6(%arg0: i32, %arg1: i32) -> (i32, i32) {
    %c0_i32 = arith.constant 0 : i32
    %c0_i32_0 = arith.constant 0 : i32
    %c0_i32_1 = arith.constant 0 : i32
    return %c0_i32, %c0_i32_0 : i32, i32
  }
}

module attributes {stable_mosaic.version = 11 : i64} {
  func.func @bn_add_relu_kernel(%arg0: i32, %arg1: memref<256x128xf32, #tpu.memory_space<vmem>>, %arg2: memref<1x128xf32, #tpu.memory_space<vmem>>, %arg3: memref<1x128xf32, #tpu.memory_space<vmem>>, %arg4: memref<256x128xf32, #tpu.memory_space<vmem>>, %arg5: memref<256x128xf32, #tpu.memory_space<vmem>>) attributes {dimension_semantics = [#tpu.dimension_semantics<parallel>], iteration_bounds = array<i64: 2>, scalar_prefetch = 0 : i64, scratch_operands = 0 : i64, tpu.core_type = #tpu.core_type<tc>, window_params = [{transform_indices = @transform_0, window_bounds = array<i64: 256, 128>}, {pipeline_mode = #tpu.pipeline_mode<synchronous>, transform_indices = @transform_1, window_bounds = array<i64: 1, 128>}, {pipeline_mode = #tpu.pipeline_mode<synchronous>, transform_indices = @transform_2, window_bounds = array<i64: 1, 128>}, {transform_indices = @transform_3, window_bounds = array<i64: 256, 128>}, {transform_indices = @transform_4, window_bounds = array<i64: 256, 128>}]} {
    %c0 = arith.constant 0 : index
    %c0_0 = arith.constant 0 : index
    %0 = vector.load %arg1[%c0, %c0_0] : memref<256x128xf32, #tpu.memory_space<vmem>>, vector<256x128xf32>
    %c0_1 = arith.constant 0 : index
    %c0_2 = arith.constant 0 : index
    %1 = vector.load %arg2[%c0_1, %c0_2] : memref<1x128xf32, #tpu.memory_space<vmem>>, vector<1x128xf32>
    %2 = vector.broadcast %1 : vector<1x128xf32> to vector<256x128xf32>
    %3 = arith.mulf %0, %2 : vector<256x128xf32>
    %c0_3 = arith.constant 0 : index
    %c0_4 = arith.constant 0 : index
    %4 = vector.load %arg3[%c0_3, %c0_4] : memref<1x128xf32, #tpu.memory_space<vmem>>, vector<1x128xf32>
    %5 = vector.broadcast %4 : vector<1x128xf32> to vector<256x128xf32>
    %6 = arith.addf %3, %5 : vector<256x128xf32>
    %c0_5 = arith.constant 0 : index
    %c0_6 = arith.constant 0 : index
    %7 = vector.load %arg4[%c0_5, %c0_6] : memref<256x128xf32, #tpu.memory_space<vmem>>, vector<256x128xf32>
    %8 = arith.addf %6, %7 : vector<256x128xf32>
    %cst = arith.constant 0.000000e+00 : f32
    %9 = vector.broadcast %cst : f32 to vector<256x128xf32>
    %10 = arith.maximumf %8, %9 : vector<256x128xf32>
    %c0_7 = arith.constant 0 : index
    %c0_8 = arith.constant 0 : index
    %11 = vector.load %arg5[%c0_7, %c0_8] : memref<256x128xf32, #tpu.memory_space<vmem>>, vector<256x128xf32>
    tpu.vector_store %arg5[%c0_7, %c0_8], %10 {strides = array<i32>} : memref<256x128xf32, #tpu.memory_space<vmem>>, vector<256x128xf32>,
    return
  }
  func.func @transform_0(%arg0: i32) -> (i32, i32) {
    %c0_i32 = arith.constant 0 : i32
    %c0_i32_0 = arith.constant 0 : i32
    return %arg0, %c0_i32 : i32, i32
  }
  func.func @transform_1(%arg0: i32) -> (i32, i32) {
    %c0_i32 = arith.constant 0 : i32
    %c0_i32_0 = arith.constant 0 : i32
    %c0_i32_1 = arith.constant 0 : i32
    return %c0_i32, %c0_i32_0 : i32, i32
  }
  func.func @transform_2(%arg0: i32) -> (i32, i32) {
    %c0_i32 = arith.constant 0 : i32
    %c0_i32_0 = arith.constant 0 : i32
    %c0_i32_1 = arith.constant 0 : i32
    return %c0_i32, %c0_i32_0 : i32, i32
  }
  func.func @transform_3(%arg0: i32) -> (i32, i32) {
    %c0_i32 = arith.constant 0 : i32
    %c0_i32_0 = arith.constant 0 : i32
    return %arg0, %c0_i32 : i32, i32
  }
  func.func @transform_4(%arg0: i32) -> (i32, i32) {
    %c0_i32 = arith.constant 0 : i32
    %c0_i32_0 = arith.constant 0 : i32
    return %arg0, %c0_i32 : i32, i32
  }
}

</mosaic_0001>

<bundles_post_ra>
// kernel: _forward_impl.6
= control target key start
LH: loop header
LB: loop body
LE: loop exit
PB: predicated region body
PF: predicated region fallthrough
CT: control target
= control target key end

     0   :  { %s740_s12 = smov 0   ;;  %s887_s0 = inlined_call_operand.vmem [shape: f32[512,128], index: 0, kind: input, shape index: {}]   ;;  %s888_s1 = inlined_call_operand.vmem [shape: f32[1,128], index: 1, kind: input, shape index: {}]   ;;  %s889_s2 = inlined_call_operand.vmem [shape: f32[1,128], index: 2, kind: input, shape index: {}]   ;;  %s890_s3 = inlined_call_operand.vmem [shape: bf16[512,128], index: 3, kind: output, shape index: {}]  }
   0x1 LB: > { %s532_s13 = sadd.s32 4294967295, %s718_s12   ;;  %p536_p0 = scmp.ge.s32.totalorder %s718_s12, 1  ;;  %s718_s12 = sphi %s740_s12, %s13_s12  }
   0x2   : > { %p138_p1 = scmp.lt.s32.totalorder %s718_s12, 3 }
   0x4   : > { %p139_p2 = pnand %p536_p0, %p138_p1 }
   0x5   : > { %s537_s14 = sshll.u32 (!%p139_p2), %s532_s13, 5  ;;  %v754_v0 = vld [vmem:[%s888_s1] ss:$0 sm:$0xff] (!%p139_p2) }
   0x6   : > { %142 = sbr.rel (%p139_p2) target bundleno = 51 (0x33), region = 32  ;;  %p163_p3 = scmp.lt.s32.totalorder (!%p139_p2), %s537_s14, 63  ;;  %v764_v1 = vld [vmem:[%s889_s2] ss:$0 sm:$0xff] (!%p139_p2) }
   0xd   : > { %s892_s14 = smov (!%p163_p3, %s537_s14), 63 }
   0xe   : > { %s538_s15 = sshll.u32 %s892_s14, 3  ;;  %s540_s23 = sshll.u32 %s892_s14, 2 }
   0xf   : > { %s759_s20 = scalar_lea.vmem %s887_s0, %s538_s15  ;;  %s796_s26 = scalar_lea.vmem %s890_s3, %s540_s23 }
  0x10   : > { %v174_v2 = vld [vmem:[%s759_s20] sm:$0xff]  ;;  %v175_v3 = vld [vmem:[%s759_s20 + $0x8] sm:$0xff]  ;;  %v176_v4 = vld [vmem:[%s759_s20 + $0x10] sm:$0xff] }
  0x11   : > { %v213_v5 = vmul.f32 %v754_v0, %v174_v2  ;;  %v214_v6 = vmul.f32 %v754_v0, %v175_v3  ;;  %v177_v7 = vld [vmem:[%s759_s20 + $0x18] sm:$0xff]  ;;  %v215_v8 = vmul.f32 %v754_v0, %v176_v4  ;;  %v178_v9 = vld [vmem:[%s759_s20 + $0x20] sm:$0xff]  ;;  %v179_v10 = vld [vmem:[%s759_s20 + $0x28] sm:$0xff] }
  0x12   : > { %v216_v11 = vmul.f32 %v754_v0, %v177_v7  ;;  %v217_v12 = vmul.f32 %v754_v0, %v178_v9  ;;  %v218_v13 = vmul.f32 %v754_v0, %v179_v10  ;;  %v180_v14 = vld [vmem:[%s759_s20 + $0x30] sm:$0xff]  ;;  %v181_v15 = vld [vmem:[%s759_s20 + $0x38] sm:$0xff]  ;;  %v182_v24 = vld [vmem:[%s759_s20 + $0x40] sm:$0xff] }
  0x13   : > { %v252_v16 = vadd.f32 %v764_v1, %v213_v5  ;;  %v253_v17 = vadd.f32 %v764_v1, %v214_v6  ;;  %v254_v18 = vadd.f32 %v764_v1, %v215_v8  ;;  %v219_v19 = vmul.f32 %v754_v0, %v180_v14  ;;  %v183_v25 = vld [vmem:[%s759_s20 + $0x48] sm:$0xff]  ;;  %v184_v30 = vld [vmem:[%s759_s20 + $0x50] sm:$0xff]  ;;  %v185_v35 = vld [vmem:[%s759_s20 + $0x58] sm:$0xff] }
  0x14   : > { %v255_v20 = vadd.f32 %v764_v1, %v216_v11  ;;  %v256_v21 = vadd.f32 %v764_v1, %v217_v12  ;;  %v257_v22 = vadd.f32 %v764_v1, %v218_v13  ;;  %v220_v23 = vmul.f32 %v754_v0, %v181_v15  ;;  %v186_v36 = vld [vmem:[%s759_s20 + $0x60] sm:$0xff]  ;;  %v187_v41 = vld [vmem:[%s759_s20 + $0x68] sm:$0xff]  ;;  %v188_v42 = vld [vmem:[%s759_s20 + $0x70] sm:$0xff] }
  0x15   : > { %v284_v26 = vmax.f32 %v252_v16, 0.0  ;;  %v285_v27 = vmax.f32 %v253_v17, 0.0  ;;  %v286_v28 = vmax.f32 %v254_v18, 0.0  ;;  %v258_v29 = vadd.f32 %v764_v1, %v219_v19  ;;  %v189_v51 = vld [vmem:[%s759_s20 + $0x78] sm:$0xff]  ;;  %v190_v56 = vld [vmem:[%s759_s20 + $0x80] sm:$0xff]  ;;  %v191_v61 = vld [vmem:[%s759_s20 + $0x88] sm:$0xff] }
  0x16   : > { %v287_v31 = vmax.f32 %v255_v20, 0.0  ;;  %v288_v32 = vmax.f32 %v256_v21, 0.0  ;;  %v289_v33 = vmax.f32 %v257_v22, 0.0  ;;  %v259_v34 = vadd.f32 %v764_v1, %v220_v23  ;;  %v192_v4 = vld [vmem:[%s759_s20 + $0x90] sm:$0xff]  ;;  %v193_v5 = vld [vmem:[%s759_s20 + $0x98] sm:$0xff]  ;;  %v194_v10 = vld [vmem:[%s759_s20 + $0xa0] sm:$0xff] }
  0x17   : > { %v612_v37 = vpack.c.bf16 %v285_v27, %v284_v26  ;;  %v290_v38 = vmax.f32 %v258_v29, 0.0  ;;  %v221_v39 = vmul.f32 %v754_v0, %v182_v24  ;;  %v222_v40 = vmul.f32 %v754_v0, %v183_v25  ;;  %v195_v15 = vld [vmem:[%s759_s20 + $0xa8] sm:$0xff]  ;;  %v196_v20 = vld [vmem:[%s759_s20 + $0xb0] sm:$0xff]  ;;  %v197_v25 = vld [vmem:[%s759_s20 + $0xb8] sm:$0xff] }
  0x18   : > { %v617_v43 = vpack.c.bf16 %v287_v31, %v286_v28  ;;  %v622_v44 = vpack.c.bf16 %v289_v33, %v288_v32  ;;  %v291_v45 = vmax.f32 %v259_v34, 0.0  ;;  %v223_v46 = vmul.f32 %v754_v0, %v184_v30  ;;  %v198_v30 = vld [vmem:[%s759_s20 + $0xc0] sm:$0xff] }
  0x19   : > { %613 = vst [vmem:[%s796_s26] sm:$0xff] %v612_v37   ;;  %v260_v47 = vadd.f32 %v764_v1, %v221_v39  ;;  %v261_v48 = vadd.f32 %v764_v1, %v222_v40  ;;  %v224_v49 = vmul.f32 %v754_v0, %v185_v35  ;;  %v225_v50 = vmul.f32 %v754_v0, %v186_v36  ;;  %v199_v35 = vld [vmem:[%s759_s20 + $0xc8] sm:$0xff]  ;;  %v200_v40 = vld [vmem:[%s759_s20 + $0xd0] sm:$0xff] }
  0x1a   : > { %689 = vst [vmem:[%s796_s26 + $0x8] sm:$0xff] %v617_v43   ;;  %690 = vst [vmem:[%s796_s26 + $0x10] sm:$0xff] %v622_v44   ;;  %v627_v52 = vpack.c.bf16 %v291_v45, %v290_v38  ;;  %v262_v53 = vadd.f32 %v764_v1, %v223_v46  ;;  %v226_v54 = vmul.f32 %v754_v0, %v187_v41  ;;  %v201_v41 = vld [vmem:[%s759_s20 + $0xd8] sm:$0xff]  ;;  %v202_v46 = vld [vmem:[%s759_s20 + $0xe0] sm:$0xff] }
  0x1b   : > { %v227_v55 = vmul.f32 %v754_v0, %v188_v42  ;;  %v292_v57 = vmax.f32 %v260_v47, 0.0  ;;  %v293_v58 = vmax.f32 %v261_v48, 0.0  ;;  %v263_v59 = vadd.f32 %v764_v1, %v224_v49 }
  0x1c   : > { %v264_v60 = vadd.f32 %v764_v1, %v225_v50  ;;  %691 = vst [vmem:[%s796_s26 + $0x18] sm:$0xff] %v627_v52   ;;  %v294_v62 = vmax.f32 %v262_v53, 0.0  ;;  %v265_v63 = vadd.f32 %v764_v1, %v226_v54  ;;  %v228_v2 = vmul.f32 %v754_v0, %v189_v51  ;;  %v203_v51 = vld [vmem:[%s759_s20 + $0xe8] sm:$0xff] }
  0x1d   : > { %v266_v3 = vadd.f32 %v764_v1, %v227_v55  ;;  %v632_v6 = vpack.c.bf16 %v293_v58, %v292_v57  ;;  %v295_v7 = vmax.f32 %v263_v59, 0.0  ;;  %v229_v9 = vmul.f32 %v754_v0, %v190_v56  ;;  %v204_v56 = vld [vmem:[%s759_s20 + $0xf0] sm:$0xff] }
  0x1e   : > { %v296_v8 = vmax.f32 %v264_v60, 0.0  ;;  %v297_v11 = vmax.f32 %v265_v63, 0.0  ;;  %v267_v12 = vadd.f32 %v764_v1, %v228_v2  ;;  %v230_v14 = vmul.f32 %v754_v0, %v191_v61  ;;  %v205_v61 = vld [vmem:[%s759_s20 + $0xf8] sm:$0xff] }
  0x1f   : > { %v298_v13 = vmax.f32 %v266_v3, 0.0  ;;  %692 = vst [vmem:[%s796_s26 + $0x20] sm:$0xff] %v632_v6   ;;  %v637_v16 = vpack.c.bf16 %v295_v7, %v294_v62  ;;  %v268_v17 = vadd.f32 %v764_v1, %v229_v9  ;;  %v231_v18 = vmul.f32 %v754_v0, %v192_v4 }
  0x20   : > { %v232_v19 = vmul.f32 %v754_v0, %v193_v5  ;;  %v642_v21 = vpack.c.bf16 %v297_v11, %v296_v8  ;;  %v299_v22 = vmax.f32 %v267_v12, 0.0  ;;  %v269_v23 = vadd.f32 %v764_v1, %v230_v14 }
  0x21   : > { %v233_v24 = vmul.f32 %v754_v0, %v194_v10  ;;  %693 = vst [vmem:[%s796_s26 + $0x28] sm:$0xff] %v637_v16   ;;  %v300_v26 = vmax.f32 %v268_v17, 0.0  ;;  %v270_v27 = vadd.f32 %v764_v1, %v231_v18  ;;  %v234_v29 = vmul.f32 %v754_v0, %v195_v15 }
  0x22   : > { %v271_v28 = vadd.f32 %v764_v1, %v232_v19  ;;  %694 = vst [vmem:[%s796_s26 + $0x30] sm:$0xff] %v642_v21   ;;  %v647_v31 = vpack.c.bf16 %v299_v22, %v298_v13  ;;  %v301_v32 = vmax.f32 %v269_v23, 0.0  ;;  %v235_v34 = vmul.f32 %v754_v0, %v196_v20 }
  0x23   : > { %v272_v33 = vadd.f32 %v764_v1, %v233_v24  ;;  %v302_v36 = vmax.f32 %v270_v27, 0.0  ;;  %v273_v38 = vadd.f32 %v764_v1, %v234_v29  ;;  %v236_v39 = vmul.f32 %v754_v0, %v197_v25 }
  0x24   : > { %v303_v37 = vmax.f32 %v271_v28, 0.0  ;;  %695 = vst [vmem:[%s796_s26 + $0x38] sm:$0xff] %v647_v31   ;;  %v652_v42 = vpack.c.bf16 %v301_v32, %v300_v26  ;;  %v274_v44 = vadd.f32 %v764_v1, %v235_v34  ;;  %v237_v45 = vmul.f32 %v754_v0, %v198_v30 }
  0x25   : > { %v304_v43 = vmax.f32 %v272_v33, 0.0  ;;  %v305_v48 = vmax.f32 %v273_v38, 0.0  ;;  %v275_v49 = vadd.f32 %v764_v1, %v236_v39  ;;  %v238_v50 = vmul.f32 %v754_v0, %v199_v35 }
  0x26   : > { %v657_v47 = vpack.c.bf16 %v303_v37, %v302_v36  ;;  %696 = vst [vmem:[%s796_s26 + $0x40] sm:$0xff] %v652_v42   ;;  %v306_v52 = vmax.f32 %v274_v44, 0.0  ;;  %v276_v53 = vadd.f32 %v764_v1, %v237_v45  ;;  %v239_v54 = vmul.f32 %v754_v0, %v200_v40 }
  0x27   : > { %v240_v55 = vmul.f32 %v754_v0, %v201_v41  ;;  %v662_v57 = vpack.c.bf16 %v305_v48, %v304_v43  ;;  %v307_v58 = vmax.f32 %v275_v49, 0.0  ;;  %v277_v59 = vadd.f32 %v764_v1, %v238_v50 }
  0x28   : > { %697 = vst [vmem:[%s796_s26 + $0x48] sm:$0xff] %v657_v47   ;;  %v241_v60 = vmul.f32 %v754_v0, %v202_v46  ;;  %v308_v62 = vmax.f32 %v276_v53, 0.0  ;;  %v278_v63 = vadd.f32 %v764_v1, %v239_v54  ;;  %v242_v3 = vmul.f32 %v754_v0, %v203_v51 }
  0x29   : > { %v279_v2 = vadd.f32 %v764_v1, %v240_v55  ;;  %698 = vst [vmem:[%s796_s26 + $0x50] sm:$0xff] %v662_v57   ;;  %v667_v4 = vpack.c.bf16 %v307_v58, %v306_v52  ;;  %v309_v5 = vmax.f32 %v277_v59, 0.0  ;;  %v243_v7 = vmul.f32 %v754_v0, %v204_v56 }
  0x2a   : > { %v280_v6 = vadd.f32 %v764_v1, %v241_v60  ;;  %v310_v8 = vmax.f32 %v278_v63, 0.0  ;;  %v281_v10 = vadd.f32 %v764_v1, %v242_v3  ;;  %v244_v11 = vmul.f32 %v754_v0, %v205_v61 }
  0x2b   : > { %v311_v9 = vmax.f32 %v279_v2, 0.0  ;;  %699 = vst [vmem:[%s796_s26 + $0x58] sm:$0xff] %v667_v4   ;;  %v672_v12 = vpack.c.bf16 %v309_v5, %v308_v62  ;;  %v282_v14 = vadd.f32 %v764_v1, %v243_v7 }
  0x2c   : > { %v312_v13 = vmax.f32 %v280_v6, 0.0  ;;  %v313_v16 = vmax.f32 %v281_v10, 0.0  ;;  %v283_v17 = vadd.f32 %v764_v1, %v244_v11 }
  0x2d   : > { %v677_v15 = vpack.c.bf16 %v311_v9, %v310_v8  ;;  %700 = vst [vmem:[%s796_s26 + $0x60] sm:$0xff] %v672_v12   ;;  %v314_v18 = vmax.f32 %v282_v14, 0.0 }
  0x2e   : > { %v682_v19 = vpack.c.bf16 %v313_v16, %v312_v13  ;;  %v315_v20 = vmax.f32 %v283_v17, 0.0 }
  0x2f   : > { %701 = vst [vmem:[%s796_s26 + $0x68] sm:$0xff] %v677_v15  }
  0x30   : > { %702 = vst [vmem:[%s796_s26 + $0x70] sm:$0xff] %v682_v19   ;;  %v687_v21 = vpack.c.bf16 %v315_v20, %v314_v18 }
  0x32   : > { %703 = vst [vmem:[%s796_s26 + $0x78] sm:$0xff] %v687_v21  }
  0x33 PF: > { %s13_s12 = sadd.s32 1, %s718_s12  }
  0x34   : > { %p10_p4 = scmp.ge.s32.totalorder %s13_s12, 4  }
  0x36   :  { %12 = sbr.rel (!%p10_p4) target bundleno = 1 (0x1), region = 62 }

// kernel: _forward_impl.5
= control target key start
LH: loop header
LB: loop body
LE: loop exit
PB: predicated region body
PF: predicated region fallthrough
CT: control target
= control target key end

     0   :  { %10 = vsyncpa [#allocation6], 0  ;;  %s1287_s15 = smov 0   ;;  %s1289_s16 = smov 0   ;;  %s1499_s0 = inlined_call_operand.vmem [shape: bf16[512,128], index: 0, kind: input, shape index: {}]   ;;  %s1500_s1 = inlined_call_operand.hbm [shape: bf16[128,128], index: 1, kind: input, shape index: {}]   ;;  %s1501_s2 = inlined_call_operand.vmem [shape: f32[512,128], index: 2, kind: output, shape index: {0}]   ;;  %s1502_s3 = inlined_call_operand.vmem [shape: f32[1,128], index: 3, kind: output, shape index: {1}]   ;;  %s1503_s4 = inlined_call_operand.vmem [shape: f32[1,128], index: 4, kind: output, shape index: {2}]  }
   0x1   :  { %s1291_s17 = smov 0  }
   0x2 LB: > { %s1013_s18 = sadd.s32 4294967295, %s1256_s17   ;;  %s28_s19 = sadd.s32 1, %s1252_s16  ;;  %s1256_s17 = sphi %s1291_s17, %s16_s17   ;;  %s1252_s16 = sphi %s1289_s16, %s1513_s16   ;;  %s1248_s15 = sphi %s1287_s15, %s1512_s15  }
   0x3   : > { %p30_p0 = scmp.ge.s32.totalorder %s28_s19, 2  ;;  %p1015_p1 = scmp.ge.s32.totalorder %s1256_s17, 1 }
   0x4   : > { %p155_p2 = scmp.lt.s32.totalorder %s1256_s17, 3  ;;  %p1312_p4 = scmp.eq.s32.totalorder %s1013_s18, 0 }
   0x5   : > { %s1515_s19 = smov (%p30_p0, %s28_s19), 0  ;;  %s1258_s22 = smov [#allocation5]  }
   0x6   : > { %p1308_p3 = pnand %p1015_p1, %p155_p2  ;;  %s170_s23 = sshll.u32 %s1258_s22, 4  ;;  %s171_s23 = int_to_ptr.vmem [resolvable:$true] %s170_s23 }
   0x7   : > { %s1508_s21 = scalar_select %p1312_p4, 1, 0 }
   0x8   : > { %s1507_s20 = scalar_select %p1308_p3, 1, 0 }
   0x9   : > { %p1144_p5 = pneg %p1308_p3  ;;  %s1202_s27 = scalar_lea.hbm %s1500_s1, 1024 }
   0xa   : > { %p1203_p7 = scmp.ne.s32.totalorder %s1500_s1, %s1202_s27  ;;  %p1209_p11 = scmp.lt.u32.totalorder %s1202_s27, %s1500_s1 }
   0xb   : > { %p1320_p6 = pnand %p1312_p4, %p1144_p5 }
   0xd   : > { %p1204_p8 = pneg %p1320_p6 }
   0xf   : > { %p1205_p9 = pnand %p1204_p8, %p1203_p7 }
  0x11   : > { %p1206_p10 = pneg %p1205_p9 }
  0x13   : > { %p1211_p12 = pnand %p1209_p11, %p1206_p10 }
  0x15   : > { %1214 = shalt.err (!%p1211_p12)
}
  0x16   : > { %s1215_s6 = scalar_lea.vmem %s171_s23, 1024  ;;  %p1223_p2 = scmp.lt.s32.totalorder %s171_s23, %s171_s23 }
  0x17   : > { %p1216_p13 = scmp.ne.s32.totalorder %s171_s23, %s1215_s6  ;;  %p1224_p5 = scmp.lt.s32.totalorder %s1215_s6, %s1215_s6 }
  0x19   : > { %p1218_p0 = pnand %p1216_p13, %p1204_p8  ;;  %p1225_p4 = por %p1224_p5, %p1223_p2 }
  0x1b   : > { %p1219_p1 = pneg %p1218_p0 }
  0x1d   : > { %p1226_p3 = pnand %p1225_p4, %p1219_p1 }
  0x1f   : > { %1229 = shalt.err (!%p1226_p3)
}
  0x20   : > { %s1259_s7 = smov 64   ;;  %s1260_s8 = smov 4  }
  0x21   : > { %1147 = dma.hbm_to_vmem [thread:$0]  (!%p1320_p6), %s1500_s1, 1024, %s171_s23, [#allocation6], %s1259_s7, %s1259_s7, %s1260_s8  }
  0x22   : > { %p1510_p7 = scmp.ne.s32.totalorder %s1507_s20, 0 }
  0x23   : > { %p1511_p9 = scmp.ne.s32.totalorder (!%p1510_p7), %s1508_s21, 0 }
  0x24   : > { %198 = sbr.rel (%p1510_p7) target bundleno = 388 (0x184), region = 28 }
  0x2b   : > { %1243 = dma.done.wait (%p1511_p9), [#allocation6], 1024  }
  0x2c   : > { %1245 = vsyncadd (%p1511_p9), [#allocation6], 4294966272  ;;  %s1020_s11 = sshll.u32 %s1248_s15, 5  ;;  %p244_p3 = scmp.eq.s32.totalorder %s1248_s15, 0 }
  0x2d   : > { %p228_p4 = scmp.lt.s32.totalorder %s1020_s11, 63  ;;  %v1261_v0 = vmov (%p244_p3), 0.0  }
  0x2e   : > { %249 = sbr.rel (!%p244_p3) target bundleno = 53 (0x35), region = 36  ;;  %250 = vst [vmem:[#allocation3] sm:$0x1] (%p244_p3), %v1261_v0  ;;  %251 = vst [vmem:[#allocation4] sm:$0x1] (%p244_p3), %v1261_v0 }
  0x2f   : > { %s1517_s11 = smov (!%p228_p4, %s1020_s11), 63 }
  0x30   : > { %s1021_s12 = sshll.u32 %s1517_s11, 2  ;;  %s1023_s13 = sshll.u32 %s1517_s11, 3 }
  0x31   : > { %s1351_s22 = scalar_lea.vmem %s1499_s0, %s1021_s12  ;;  %s1356_s24 = scalar_lea.vmem %s1501_s2, %s1023_s13 }
  0x35 PF: > { %v1178_v1 = vld [vmem:[#allocation5] sm:$0xff]   ;;  %v1179_v2 = vld [vmem:[#allocation5 + $0x8] sm:$0xff]   ;;  %v1180_v3 = vld [vmem:[#allocation5 + $0x10] sm:$0xff]  }
  0x36   : > { %1076 = vmatprep.subr.bf16.mxu0 %v1178_v1  ;;  %1124 = vmatprep.subr.bf16.mxu1 %v1178_v1  ;;  %v1181_v4 = vld [vmem:[#allocation5 + $0x18] sm:$0xff]   ;;  %v1182_v6 = vld [vmem:[#allocation5 + $0x20] sm:$0xff]   ;;  %v1183_v7 = vld [vmem:[#allocation5 + $0x28] sm:$0xff]  }
  0x37   : > { %1077 = vmatpush3.bf16.msra.mxu0 %v1178_v1  ;;  %1132 = vmatpush3.bf16.msra.mxu1 %v1178_v1  ;;  %v1186_v5 = vld [vmem:[%s1351_s22] sm:$0xff]   ;;  %v1184_v9 = vld [vmem:[#allocation5 + $0x30] sm:$0xff]   ;;  %v1187_v11 = vld [vmem:[%s1351_s22 + $0x8] sm:$0xff]  }
  0x38   : > { %1078 = vmatprep.subr.bf16.mxu0 %v1179_v2  ;;  %1125 = vmatprep.subr.bf16.mxu1 %v1179_v2  ;;  %v1194_v8 = vld [vmem:[%s1351_s22 + $0x40] sm:$0xff]   ;;  %v1195_v12 = vld [vmem:[%s1351_s22 + $0x48] sm:$0xff]   ;;  %v1188_v13 = vld [vmem:[%s1351_s22 + $0x10] sm:$0xff]  }
  0x39   : > { %1092 = vmatprep.mubr.bf16.mxu0 %v1186_v5  ;;  %1108 = vmatprep.mubr.bf16.mxu1 %v1194_v8  ;;  %v1185_v10 = vld [vmem:[#allocation5 + $0x38] sm:$0xff]   ;;  %v1196_v14 = vld [vmem:[%s1351_s22 + $0x50] sm:$0xff]   ;;  %v1191_v19 = vld [vmem:[%s1351_s22 + $0x28] sm:$0xff]  }
  0x3a   : > { %v1189_v15 = vld [vmem:[%s1351_s22 + $0x18] sm:$0xff]   ;;  %v1190_v17 = vld [vmem:[%s1351_s22 + $0x20] sm:$0xff]   ;;  %v1199_v20 = vld [vmem:[%s1351_s22 + $0x68] sm:$0xff]  }
  0x3b   : > { %1079 = vmatpush3.bf16.msra.mxu0 %v1179_v2  ;;  %1133 = vmatpush3.bf16.msra.mxu1 %v1179_v2  ;;  %v1197_v16 = vld [vmem:[%s1351_s22 + $0x58] sm:$0xff]   ;;  %v1198_v18 = vld [vmem:[%s1351_s22 + $0x60] sm:$0xff]   ;;  %v1192_v21 = vld [vmem:[%s1351_s22 + $0x30] sm:$0xff]  }
  0x3c   : > { %1080 = vmatprep.subr.bf16.mxu0 %v1180_v3  ;;  %1126 = vmatprep.subr.bf16.mxu1 %v1180_v3  ;;  %v1200_v22 = vld [vmem:[%s1351_s22 + $0x70] sm:$0xff]   ;;  %v1193_v23 = vld [vmem:[%s1351_s22 + $0x38] sm:$0xff]  }
  0x3d   : > { %v1201_v24 = vld [vmem:[%s1351_s22 + $0x78] sm:$0xff]  }
  0x3f   : > { %1081 = vmatpush3.bf16.msra.mxu0 %v1180_v3  ;;  %1134 = vmatpush3.bf16.msra.mxu1 %v1180_v3 }
  0x40   : > { %1082 = vmatprep.subr.bf16.mxu0 %v1181_v4  ;;  %1127 = vmatprep.subr.bf16.mxu1 %v1181_v4 }
  0x43   : > { %1083 = vmatpush3.bf16.msra.mxu0 %v1181_v4  ;;  %1135 = vmatpush3.bf16.msra.mxu1 %v1181_v4 }
  0x44   : > { %1084 = vmatprep.subr.bf16.mxu0 %v1182_v6  ;;  %1128 = vmatprep.subr.bf16.mxu1 %v1182_v6 }
  0x47   : > { %1085 = vmatpush3.bf16.msra.mxu0 %v1182_v6  ;;  %1136 = vmatpush3.bf16.msra.mxu1 %v1182_v6 }
  0x48   : > { %1086 = vmatprep.subr.bf16.mxu0 %v1183_v7  ;;  %1129 = vmatprep.subr.bf16.mxu1 %v1183_v7 }
  0x4b   : > { %1087 = vmatpush3.bf16.msra.mxu0 %v1183_v7  ;;  %1137 = vmatpush3.bf16.msra.mxu1 %v1183_v7 }
  0x4c   : > { %1088 = vmatprep.subr.bf16.mxu0 %v1184_v9  ;;  %1130 = vmatprep.subr.bf16.mxu1 %v1184_v9 }
  0x4f   : > { %1089 = vmatpush3.bf16.msra.mxu0 %v1184_v9  ;;  %1138 = vmatpush3.bf16.msra.mxu1 %v1184_v9 }
  0x50   : > { %1090 = vmatprep.subr.bf16.mxu0 %v1185_v10  ;;  %1131 = vmatprep.subr.bf16.mxu1 %v1185_v10 }
  0x53   : > { %1091 = vmatpush3.bf16.msra.mxu0 %v1185_v10  ;;  %1139 = vmatpush3.bf16.msra.mxu1 %v1185_v10 }
  0x56   : > { %1093 = vmatmul.mubr.bf16.vlgmr.msra.gmra.mrb[0].mxu0 %v1187_v11  ;;  %1109 = vmatmul.mubr.bf16.vlgmr.msra.gmra.mrb[0].mxu1 %v1195_v12 }
  0x57   : > { %1096 = vmatprep.mubr.bf16.mxu0 %v1188_v13  ;;  %1112 = vmatprep.mubr.bf16.mxu1 %v1196_v14 }
  0x5e   : > { %1097 = vmatmul.mubr.bf16.gmra.mrb[4].mxu0 %v1189_v15  ;;  %1113 = vmatmul.mubr.bf16.gmra.mrb[4].mxu1 %v1197_v16 }
  0x5f   : > { %1100 = vmatprep.mubr.bf16.mxu0 %v1190_v17  ;;  %1116 = vmatprep.mubr.bf16.mxu1 %v1198_v18 }
  0x66   : > { %1101 = vmatmul.mubr.bf16.gmra.mrb[8].mxu0 %v1191_v19  ;;  %1117 = vmatmul.mubr.bf16.gmra.mrb[8].mxu1 %v1199_v20 }
  0x67   : > { %1104 = vmatprep.mubr.bf16.mxu0 %v1192_v21  ;;  %1120 = vmatprep.mubr.bf16.mxu1 %v1200_v22 }
  0x6e   : > { %1105 = vmatmul.mubr.bf16.gmra.mrb[12].mxu0 %v1193_v23  ;;  %1121 = vmatmul.mubr.bf16.gmra.mrb[12].mxu1 %v1201_v24 }
 0x129   : > { %v1094_v25 = vpop.f32.mrb[0].mxu0  ;;  %v1374_v26 = vpop.f32.mrb[0].mxu1 }
 0x12a   : > { %773 = vst [vmem:[%s1356_s24 + $0x10] sm:$0xff] %v1094_v25  ;;  %v545_v27 = vpop.f32.mrb[1].mxu0  ;;  %789 = vst [vmem:[%s1356_s24 + $0x90] sm:$0xff] %v1374_v26  ;;  %v1379_v28 = vpop.f32.mrb[1].mxu1  ;;  %v846_v36 = vmul.f32 %v1094_v25, %v1094_v25 }
 0x12b   : > { %771 = vst [vmem:[%s1356_s24] sm:$0xff] %v545_v27  ;;  %v1095_v29 = vpop.f32.mrb[2].mxu0  ;;  %787 = vst [vmem:[%s1356_s24 + $0x80] sm:$0xff] %v1379_v28  ;;  %v1384_v30 = vpop.f32.mrb[2].mxu1  ;;  %v844_v33 = vmul.f32 %v545_v27, %v545_v27 }
 0x12c   : > { %774 = vst [vmem:[%s1356_s24 + $0x18] sm:$0xff] %v1095_v29  ;;  %v548_v31 = vpop.f32.mrb[3].mxu0  ;;  %790 = vst [vmem:[%s1356_s24 + $0x98] sm:$0xff] %v1384_v30  ;;  %v1389_v32 = vpop.f32.mrb[3].mxu1  ;;  %v847_v39 = vmul.f32 %v1095_v29, %v1095_v29 }
 0x12d   : > { %772 = vst [vmem:[%s1356_s24 + $0x8] sm:$0xff] %v548_v31  ;;  %v804_v34 = vadd.f32 %v548_v31, %v545_v27  ;;  %v845_v35 = vmul.f32 %v548_v31, %v548_v31  ;;  %788 = vst [vmem:[%s1356_s24 + $0x88] sm:$0xff] %v1389_v32 }
 0x12f   : > { %v805_v37 = vadd.f32 %v1094_v25, %v804_v34  ;;  %v876_v38 = vadd.f32 %v845_v35, %v844_v33 }
 0x131   : > { %v877_v40 = vadd.f32 %v876_v38, %v846_v36  ;;  %v1098_v41 = vpop.f32.mrb[4].mxu0  ;;  %v806_v42 = vadd.f32 %v1095_v29, %v805_v37  ;;  %v1394_v43 = vpop.f32.mrb[4].mxu1 }
 0x132   : > { %777 = vst [vmem:[%s1356_s24 + $0x30] sm:$0xff] %v1098_v41  ;;  %v561_v44 = vpop.f32.mrb[5].mxu0  ;;  %793 = vst [vmem:[%s1356_s24 + $0xb0] sm:$0xff] %v1394_v43  ;;  %v1399_v45 = vpop.f32.mrb[5].mxu1  ;;  %v850_v56 = vmul.f32 %v1098_v41, %v1098_v41 }
 0x133   : > { %775 = vst [vmem:[%s1356_s24 + $0x20] sm:$0xff] %v561_v44  ;;  %v807_v46 = vadd.f32 %v806_v42, %v561_v44  ;;  %v848_v47 = vmul.f32 %v561_v44, %v561_v44  ;;  %v878_v48 = vadd.f32 %v877_v40, %v847_v39  ;;  %v1099_v49 = vpop.f32.mrb[6].mxu0  ;;  %791 = vst [vmem:[%s1356_s24 + $0xa0] sm:$0xff] %v1399_v45  ;;  %v1404_v50 = vpop.f32.mrb[6].mxu1 }
 0x134   : > { %778 = vst [vmem:[%s1356_s24 + $0x38] sm:$0xff] %v1099_v49  ;;  %v564_v51 = vpop.f32.mrb[7].mxu0  ;;  %794 = vst [vmem:[%s1356_s24 + $0xb8] sm:$0xff] %v1404_v50  ;;  %v1409_v52 = vpop.f32.mrb[7].mxu1  ;;  %v851_v59 = vmul.f32 %v1099_v49, %v1099_v49  ;;  %v860_v42 = vmul.f32 %v1379_v28, %v1379_v28 }
 0x135   : > { %v879_v53 = vadd.f32 %v878_v48, %v848_v47  ;;  %776 = vst [vmem:[%s1356_s24 + $0x28] sm:$0xff] %v564_v51  ;;  %v808_v54 = vadd.f32 %v807_v46, %v564_v51  ;;  %v849_v55 = vmul.f32 %v564_v51, %v564_v51  ;;  %792 = vst [vmem:[%s1356_s24 + $0xa8] sm:$0xff] %v1409_v52 }
 0x136   : > { %v862_v51 = vmul.f32 %v1374_v26, %v1374_v26 }
 0x137   : > { %v809_v57 = vadd.f32 %v1098_v41, %v808_v54  ;;  %v880_v58 = vadd.f32 %v879_v53, %v849_v55  ;;  %v863_v55 = vmul.f32 %v1384_v30, %v1384_v30 }
 0x139   : > { %v881_v60 = vadd.f32 %v880_v58, %v850_v56  ;;  %v1102_v61 = vpop.f32.mrb[8].mxu0  ;;  %v810_v62 = vadd.f32 %v1099_v49, %v809_v57  ;;  %v1414_v63 = vpop.f32.mrb[8].mxu1  ;;  %v861_v49 = vmul.f32 %v1389_v32, %v1389_v32 }
 0x13a   : > { %781 = vst [vmem:[%s1356_s24 + $0x50] sm:$0xff] %v1102_v61  ;;  %v577_v0 = vpop.f32.mrb[9].mxu0  ;;  %797 = vst [vmem:[%s1356_s24 + $0xd0] sm:$0xff] %v1414_v63  ;;  %v1419_v1 = vpop.f32.mrb[9].mxu1  ;;  %v854_v12 = vmul.f32 %v1102_v61, %v1102_v61 }
 0x13b   : > { %779 = vst [vmem:[%s1356_s24 + $0x40] sm:$0xff] %v577_v0  ;;  %v811_v2 = vadd.f32 %v810_v62, %v577_v0  ;;  %v852_v3 = vmul.f32 %v577_v0, %v577_v0  ;;  %v882_v4 = vadd.f32 %v881_v60, %v851_v59  ;;  %v1103_v5 = vpop.f32.mrb[10].mxu0  ;;  %795 = vst [vmem:[%s1356_s24 + $0xc0] sm:$0xff] %v1419_v1  ;;  %v1424_v6 = vpop.f32.mrb[10].mxu1 }
 0x13c   : > { %782 = vst [vmem:[%s1356_s24 + $0x58] sm:$0xff] %v1103_v5  ;;  %v580_v7 = vpop.f32.mrb[11].mxu0  ;;  %798 = vst [vmem:[%s1356_s24 + $0xd8] sm:$0xff] %v1424_v6  ;;  %v1429_v8 = vpop.f32.mrb[11].mxu1  ;;  %v855_v15 = vmul.f32 %v1103_v5, %v1103_v5 }
 0x13d   : > { %v883_v9 = vadd.f32 %v882_v4, %v852_v3  ;;  %780 = vst [vmem:[%s1356_s24 + $0x48] sm:$0xff] %v580_v7  ;;  %v812_v10 = vadd.f32 %v811_v2, %v580_v7  ;;  %v853_v11 = vmul.f32 %v580_v7, %v580_v7  ;;  %796 = vst [vmem:[%s1356_s24 + $0xc8] sm:$0xff] %v1429_v8 }
 0x13f   : > { %v813_v13 = vadd.f32 %v1102_v61, %v812_v10  ;;  %v884_v14 = vadd.f32 %v883_v9, %v853_v11  ;;  %v865_v61 = vmul.f32 %v1409_v52, %v1409_v52  ;;  %v869_v9 = vmul.f32 %v1429_v8, %v1429_v8 }
 0x141   : > { %v885_v16 = vadd.f32 %v884_v14, %v854_v12  ;;  %v1106_v17 = vpop.f32.mrb[12].mxu0  ;;  %v814_v18 = vadd.f32 %v1103_v5, %v813_v13  ;;  %v1434_v19 = vpop.f32.mrb[12].mxu1 }
 0x142   : > { %785 = vst [vmem:[%s1356_s24 + $0x70] sm:$0xff] %v1106_v17  ;;  %v593_v20 = vpop.f32.mrb[13].mxu0  ;;  %801 = vst [vmem:[%s1356_s24 + $0xf0] sm:$0xff] %v1434_v19  ;;  %v657_v21 = vpop.f32.mrb[13].mxu1  ;;  %v858_v36 = vmul.f32 %v1106_v17, %v1106_v17 }
 0x143   : > { %783 = vst [vmem:[%s1356_s24 + $0x60] sm:$0xff] %v593_v20  ;;  %v815_v22 = vadd.f32 %v814_v18, %v593_v20  ;;  %v856_v23 = vmul.f32 %v593_v20, %v593_v20  ;;  %v886_v24 = vadd.f32 %v885_v16, %v855_v15  ;;  %v1107_v25 = vpop.f32.mrb[14].mxu0  ;;  %799 = vst [vmem:[%s1356_s24 + $0xe0] sm:$0xff] %v657_v21  ;;  %v1123_v27 = vpop.f32.mrb[14].mxu1 }
 0x144   : > { %786 = vst [vmem:[%s1356_s24 + $0x78] sm:$0xff] %v1107_v25  ;;  %v596_v29 = vpop.f32.mrb[15].mxu0  ;;  %802 = vst [vmem:[%s1356_s24 + $0xf8] sm:$0xff] %v1123_v27  ;;  %v660_v31 = vpop.f32.mrb[15].mxu1  ;;  %v859_v39 = vmul.f32 %v1107_v25, %v1107_v25 }
 0x145   : > { %v887_v33 = vadd.f32 %v886_v24, %v856_v23  ;;  %784 = vst [vmem:[%s1356_s24 + $0x68] sm:$0xff] %v596_v29  ;;  %v816_v34 = vadd.f32 %v815_v22, %v596_v29  ;;  %v857_v35 = vmul.f32 %v596_v29, %v596_v29  ;;  %800 = vst [vmem:[%s1356_s24 + $0xe8] sm:$0xff] %v660_v31 }
 0x146   : > { %v873_v18 = vmul.f32 %v660_v31, %v660_v31 }
 0x147   : > { %v817_v37 = vadd.f32 %v1106_v17, %v816_v34  ;;  %v888_v38 = vadd.f32 %v887_v33, %v857_v35 }
 0x149   : > { %v889_v40 = vadd.f32 %v888_v38, %v858_v36  ;;  %v818_v41 = vadd.f32 %v1107_v25, %v817_v37 }
 0x14b   : > { %v819_v44 = vadd.f32 %v818_v41, %v1379_v28  ;;  %v890_v46 = vadd.f32 %v889_v40, %v859_v39  ;;  %v864_v28 = vmul.f32 %v1399_v45, %v1399_v45  ;;  %v843_v41 = vld [vmem:[#allocation4] sm:$0x1] }
 0x14d   : > { %v891_v47 = vadd.f32 %v890_v46, %v860_v42  ;;  %v820_v48 = vadd.f32 %v819_v44, %v1389_v32 }
 0x14f   : > { %v821_v53 = vadd.f32 %v1374_v26, %v820_v48  ;;  %v892_v54 = vadd.f32 %v891_v47, %v861_v49  ;;  %v866_v26 = vmul.f32 %v1394_v43, %v1394_v43 }
 0x151   : > { %v893_v56 = vadd.f32 %v892_v54, %v862_v51  ;;  %v822_v57 = vadd.f32 %v1384_v30, %v821_v53  ;;  %v867_v30 = vmul.f32 %v1404_v50, %v1404_v50 }
 0x153   : > { %v823_v58 = vadd.f32 %v822_v57, %v1399_v45  ;;  %v894_v59 = vadd.f32 %v893_v56, %v863_v55  ;;  %v868_v45 = vmul.f32 %v1419_v1, %v1419_v1 }
 0x155   : > { %v895_v60 = vadd.f32 %v894_v59, %v864_v28  ;;  %v824_v32 = vadd.f32 %v823_v58, %v1409_v52 }
 0x157   : > { %v825_v62 = vadd.f32 %v1394_v43, %v824_v32  ;;  %v896_v0 = vadd.f32 %v895_v60, %v865_v61  ;;  %v870_v43 = vmul.f32 %v1414_v63, %v1414_v63 }
 0x159   : > { %v897_v2 = vadd.f32 %v896_v0, %v866_v26  ;;  %v826_v3 = vadd.f32 %v1404_v50, %v825_v62  ;;  %v871_v50 = vmul.f32 %v1424_v6, %v1424_v6 }
 0x15b   : > { %v827_v4 = vadd.f32 %v826_v3, %v1419_v1  ;;  %v898_v5 = vadd.f32 %v897_v2, %v867_v30  ;;  %v872_v1 = vmul.f32 %v657_v21, %v657_v21 }
 0x15d   : > { %v899_v7 = vadd.f32 %v898_v5, %v868_v45  ;;  %v828_v52 = vadd.f32 %v827_v4, %v1429_v8  ;;  %v874_v8 = vmul.f32 %v1434_v19, %v1434_v19 }
 0x15f   : > { %v829_v10 = vadd.f32 %v1414_v63, %v828_v52  ;;  %v900_v11 = vadd.f32 %v899_v7, %v869_v9  ;;  %v875_v63 = vmul.f32 %v1123_v27, %v1123_v27 }
 0x161   : > { %v901_v12 = vadd.f32 %v900_v11, %v870_v43  ;;  %v830_v13 = vadd.f32 %v1424_v6, %v829_v10 }
 0x163   : > { %v831_v14 = vadd.f32 %v830_v13, %v657_v21  ;;  %v902_v15 = vadd.f32 %v901_v12, %v871_v50 }
 0x165   : > { %v903_v16 = vadd.f32 %v902_v15, %v872_v1  ;;  %v832_v17 = vadd.f32 %v831_v14, %v660_v31  ;;  %v803_v31 = vld [vmem:[#allocation3] sm:$0x1] }
 0x167   : > { %v833_v20 = vadd.f32 %v1434_v19, %v832_v17  ;;  %v904_v22 = vadd.f32 %v903_v16, %v873_v18 }
 0x169   : > { %v834_v23 = vadd.f32 %v1123_v27, %v833_v20  ;;  %v905_v24 = vadd.f32 %v904_v22, %v874_v8 }
 0x16b   : > { %v835_v25 = vrot.slane %v834_v23, 4  ;;  %v906_v29 = vadd.f32 %v905_v24, %v875_v63 }
 0x16d   : > { %v836_v33 = vadd.f32 %v835_v25, %v834_v23  ;;  %v907_v34 = vrot.slane %v906_v29, 4 }
 0x16f   : > { %v837_v6 = vrot.slane %v836_v33, 2  ;;  %v908_v35 = vadd.f32 %v907_v34, %v906_v29 }
 0x171   : > { %v838_v21 = vadd.f32 %v837_v6, %v836_v33  ;;  %v909_v36 = vrot.slane %v908_v35, 2 }
 0x173   : > { %v839_v37 = vrot.slane %v838_v21, 1  ;;  %v910_v38 = vadd.f32 %v909_v36, %v908_v35 }
 0x175   : > { %v840_v39 = vadd.f32 %v839_v37, %v838_v21  ;;  %v911_v40 = vrot.slane %v910_v38, 1 }
 0x177   : > { %v841_v42 = vadd.f32 %v840_v39, %v803_v31  ;;  %v912_v19 = vadd.f32 %v911_v40, %v910_v38 }
 0x179   : > { %842 = vst [vmem:[#allocation3] sm:$0x1] %v841_v42  ;;  %v913_v44 = vadd.f32 %v912_v19, %v843_v41 }
 0x17b   : > { %914 = vst [vmem:[#allocation4] sm:$0x1] %v913_v44 }
 0x180   : > { %v915_v27 = vld [vmem:[#allocation3] sm:$0x1] }
 0x181   : > { %916 = vst [vmem:[%s1502_s3] sm:$0x1] %v915_v27 }
 0x182   : > { %v917_v46 = vld [vmem:[#allocation4] sm:$0x1] }
 0x183   : > { %918 = vst [vmem:[%s1503_s4] sm:$0x1] %v917_v46 }
 0x184 PF: > { %s16_s17 = sadd.s32 1, %s1256_s17   ;;  %s1512_s15 = smov %s1252_s16 }
 0x185   : > { %p13_p6 = scmp.ge.s32.totalorder %s16_s17, 4   ;;  %s1513_s16 = smov %s1515_s19 }
 0x187   :  { %15 = sbr.rel (!%p13_p6) target bundleno = 2 (0x2), region = 92 }
 0x18e   :  { %953 = vsyncpa [#allocation6], 1 }
 0x18f   :  { %955 = vsyncpa [#allocation6 + $0x1], 1 }

// kernel: _forward_impl.9
= control target key start
LH: loop header
LB: loop body
LE: loop exit
PB: predicated region body
PF: predicated region fallthrough
CT: control target
= control target key end

     0   :  { %s585_s15 = smov 0   ;;  %s786_s0 = inlined_call_operand.vmem [shape: f32[512,128], index: 0, kind: input, shape index: {}]   ;;  %s787_s1 = inlined_call_operand.vmem [shape: f32[1,128], index: 1, kind: input, shape index: {}]   ;;  %s788_s2 = inlined_call_operand.vmem [shape: f32[1,128], index: 2, kind: input, shape index: {}]   ;;  %s789_s3 = inlined_call_operand.vmem [shape: f32[512,128], index: 3, kind: input, shape index: {}]   ;;  %s790_s4 = inlined_call_operand.vmem [shape: f32[512,128], index: 4, kind: output, shape index: {}]  }
   0x1 LB: > { %s529_s16 = sadd.s32 4294967295, %s558_s15   ;;  %p533_p0 = scmp.ge.s32.totalorder %s558_s15, 1  ;;  %s558_s15 = sphi %s585_s15, %s14_s15  }
   0x2   : > { %p174_p1 = scmp.lt.s32.totalorder %s558_s15, 3 }
   0x4   : > { %p175_p2 = pnand %p533_p0, %p174_p1 }
   0x5   : > { %s534_s17 = sshll.u32 (!%p175_p2), %s529_s16, 5  ;;  %v598_v0 = vld [vmem:[%s787_s1] ss:$0 sm:$0xff] (!%p175_p2) }
   0x6   : > { %178 = sbr.rel (%p175_p2) target bundleno = 55 (0x37), region = 36  ;;  %p206_p3 = scmp.lt.s32.totalorder (!%p175_p2), %s534_s17, 63  ;;  %v616_v2 = vld [vmem:[%s788_s2] ss:$0 sm:$0xff] (!%p175_p2) }
   0xd   : > { %s792_s17 = smov (!%p206_p3, %s534_s17), 63 }
   0xe   : > { %s593_s18 = sshll.u32 %s792_s17, 3 }
   0xf   : > { %s604_s23 = scalar_lea.vmem %s786_s0, %s593_s18  ;;  %s610_s26 = scalar_lea.vmem %s789_s3, %s593_s18 }
  0x10   : > { %v223_v1 = vld [vmem:[%s604_s23] sm:$0xff]  ;;  %v224_v3 = vld [vmem:[%s604_s23 + $0x8] sm:$0xff]  ;;  %v225_v7 = vld [vmem:[%s604_s23 + $0x10] sm:$0xff]  ;;  %s646_s5 = scalar_lea.vmem %s790_s4, %s593_s18 }
  0x11   : > { %v262_v4 = vmul.f32 %v598_v0, %v223_v1  ;;  %v333_v5 = vld [vmem:[%s610_s26] sm:$0xff]  ;;  %v263_v6 = vmul.f32 %v598_v0, %v224_v3  ;;  %v334_v8 = vld [vmem:[%s610_s26 + $0x8] sm:$0xff]  ;;  %v264_v9 = vmul.f32 %v598_v0, %v225_v7  ;;  %v226_v10 = vld [vmem:[%s604_s23 + $0x18] sm:$0xff] }
  0x12   : > { %v227_v11 = vld [vmem:[%s604_s23 + $0x20] sm:$0xff]  ;;  %v335_v14 = vld [vmem:[%s610_s26 + $0x10] sm:$0xff]  ;;  %v265_v15 = vmul.f32 %v598_v0, %v226_v10  ;;  %v336_v16 = vld [vmem:[%s610_s26 + $0x18] sm:$0xff] }
  0x13   : > { %v301_v12 = vadd.f32 %v616_v2, %v262_v4  ;;  %v302_v13 = vadd.f32 %v616_v2, %v263_v6  ;;  %v266_v17 = vmul.f32 %v598_v0, %v227_v11  ;;  %v228_v18 = vld [vmem:[%s604_s23 + $0x28] sm:$0xff]  ;;  %v303_v19 = vadd.f32 %v616_v2, %v264_v9  ;;  %v337_v20 = vld [vmem:[%s610_s26 + $0x20] sm:$0xff]  ;;  %v229_v22 = vld [vmem:[%s604_s23 + $0x30] sm:$0xff] }
  0x14   : > { %v267_v21 = vmul.f32 %v598_v0, %v228_v18  ;;  %v230_v23 = vld [vmem:[%s604_s23 + $0x38] sm:$0xff]  ;;  %v304_v26 = vadd.f32 %v616_v2, %v265_v15  ;;  %v338_v28 = vld [vmem:[%s610_s26 + $0x28] sm:$0xff]  ;;  %v268_v31 = vmul.f32 %v598_v0, %v229_v22  ;;  %v231_v33 = vld [vmem:[%s604_s23 + $0x40] sm:$0xff] }
  0x15   : > { %v365_v24 = vadd.f32 %v333_v5, %v301_v12  ;;  %v366_v25 = vadd.f32 %v334_v8, %v302_v13  ;;  %v305_v27 = vadd.f32 %v616_v2, %v266_v17  ;;  %v367_v29 = vadd.f32 %v335_v14, %v303_v19  ;;  %v232_v34 = vld [vmem:[%s604_s23 + $0x48] sm:$0xff]  ;;  %v339_v39 = vld [vmem:[%s610_s26 + $0x30] sm:$0xff]  ;;  %v340_v40 = vld [vmem:[%s610_s26 + $0x38] sm:$0xff] }
  0x16   : > { %v306_v30 = vadd.f32 %v616_v2, %v267_v21  ;;  %v269_v32 = vmul.f32 %v598_v0, %v230_v23  ;;  %v368_v37 = vadd.f32 %v336_v16, %v304_v26  ;;  %v233_v41 = vld [vmem:[%s604_s23 + $0x50] sm:$0xff]  ;;  %v307_v44 = vadd.f32 %v616_v2, %v268_v31  ;;  %v234_v46 = vld [vmem:[%s604_s23 + $0x58] sm:$0xff]  ;;  %v235_v47 = vld [vmem:[%s604_s23 + $0x60] sm:$0xff] }
  0x17   : > { %v397_v35 = vmax.f32 %v365_v24, 0.0  ;;  %v398_v36 = vmax.f32 %v366_v25, 0.0  ;;  %v369_v38 = vadd.f32 %v337_v20, %v305_v27  ;;  %v399_v42 = vmax.f32 %v367_v29, 0.0  ;;  %v236_v52 = vld [vmem:[%s604_s23 + $0x68] sm:$0xff]  ;;  %v341_v56 = vld [vmem:[%s610_s26 + $0x40] sm:$0xff]  ;;  %v343_v61 = vld [vmem:[%s610_s26 + $0x50] sm:$0xff] }
  0x18   : > { %v370_v43 = vadd.f32 %v338_v28, %v306_v30  ;;  %v308_v45 = vadd.f32 %v616_v2, %v269_v32  ;;  %v400_v48 = vmax.f32 %v368_v37, 0.0  ;;  %v270_v50 = vmul.f32 %v598_v0, %v231_v33  ;;  %v342_v57 = vld [vmem:[%s610_s26 + $0x48] sm:$0xff]  ;;  %v237_v1 = vld [vmem:[%s604_s23 + $0x70] sm:$0xff]  ;;  %v238_v3 = vld [vmem:[%s604_s23 + $0x78] sm:$0xff] }
  0x19   : > { %429 = vst [vmem:[%s646_s5] sm:$0xff] %v397_v35  ;;  %430 = vst [vmem:[%s646_s5 + $0x8] sm:$0xff] %v398_v36  ;;  %v401_v49 = vmax.f32 %v369_v38, 0.0  ;;  %v271_v51 = vmul.f32 %v598_v0, %v232_v34  ;;  %v371_v54 = vadd.f32 %v339_v39, %v307_v44  ;;  %v272_v58 = vmul.f32 %v598_v0, %v233_v41  ;;  %v344_v7 = vld [vmem:[%s610_s26 + $0x58] sm:$0xff]  ;;  %v345_v8 = vld [vmem:[%s610_s26 + $0x60] sm:$0xff] }
  0x1a   : > { %431 = vst [vmem:[%s646_s5 + $0x10] sm:$0xff] %v399_v42  ;;  %v402_v53 = vmax.f32 %v370_v43, 0.0  ;;  %v372_v55 = vadd.f32 %v340_v40, %v308_v45  ;;  %432 = vst [vmem:[%s646_s5 + $0x18] sm:$0xff] %v400_v48  ;;  %v309_v59 = vadd.f32 %v616_v2, %v270_v50  ;;  %v273_v62 = vmul.f32 %v598_v0, %v234_v46  ;;  %v346_v14 = vld [vmem:[%s610_s26 + $0x68] sm:$0xff]  ;;  %v239_v19 = vld [vmem:[%s604_s23 + $0x80] sm:$0xff] }
  0x1b   : > { %433 = vst [vmem:[%s646_s5 + $0x20] sm:$0xff] %v401_v49  ;;  %v310_v60 = vadd.f32 %v616_v2, %v271_v51  ;;  %v274_v63 = vmul.f32 %v598_v0, %v235_v47  ;;  %v403_v4 = vmax.f32 %v371_v54, 0.0  ;;  %v311_v6 = vadd.f32 %v616_v2, %v272_v58  ;;  %v240_v20 = vld [vmem:[%s604_s23 + $0x88] sm:$0xff]  ;;  %v347_v25 = vld [vmem:[%s610_s26 + $0x70] sm:$0xff]  ;;  %v348_v26 = vld [vmem:[%s610_s26 + $0x78] sm:$0xff] }
  0x1c   : > { %434 = vst [vmem:[%s646_s5 + $0x28] sm:$0xff] %v402_v53  ;;  %v404_v5 = vmax.f32 %v372_v55, 0.0  ;;  %v275_v9 = vmul.f32 %v598_v0, %v236_v52  ;;  %v373_v10 = vadd.f32 %v341_v56, %v309_v59  ;;  %v312_v12 = vadd.f32 %v616_v2, %v273_v62  ;;  %v241_v27 = vld [vmem:[%s604_s23 + $0x90] sm:$0xff]  ;;  %v242_v32 = vld [vmem:[%s604_s23 + $0x98] sm:$0xff]  ;;  %v243_v33 = vld [vmem:[%s604_s23 + $0xa0] sm:$0xff] }
  0x1d   : > { %v374_v11 = vadd.f32 %v342_v57, %v310_v60  ;;  %v313_v13 = vadd.f32 %v616_v2, %v274_v63  ;;  %435 = vst [vmem:[%s646_s5 + $0x30] sm:$0xff] %v403_v4  ;;  %v375_v15 = vadd.f32 %v343_v61, %v311_v6  ;;  %v276_v17 = vmul.f32 %v598_v0, %v237_v1  ;;  %v244_v38 = vld [vmem:[%s604_s23 + $0xa8] sm:$0xff]  ;;  %v349_v42 = vld [vmem:[%s610_s26 + $0x80] sm:$0xff]  ;;  %v351_v47 = vld [vmem:[%s610_s26 + $0x90] sm:$0xff] }
  0x1e   : > { %436 = vst [vmem:[%s646_s5 + $0x38] sm:$0xff] %v404_v5  ;;  %v314_v16 = vadd.f32 %v616_v2, %v275_v9  ;;  %v277_v18 = vmul.f32 %v598_v0, %v238_v3  ;;  %v405_v21 = vmax.f32 %v373_v10, 0.0  ;;  %v376_v23 = vadd.f32 %v344_v7, %v312_v12  ;;  %v350_v43 = vld [vmem:[%s610_s26 + $0x88] sm:$0xff]  ;;  %v245_v50 = vld [vmem:[%s604_s23 + $0xb0] sm:$0xff]  ;;  %v246_v51 = vld [vmem:[%s604_s23 + $0xb8] sm:$0xff] }
  0x1f   : > { %v406_v22 = vmax.f32 %v374_v11, 0.0  ;;  %v377_v24 = vadd.f32 %v345_v8, %v313_v13  ;;  %v407_v28 = vmax.f32 %v375_v15, 0.0  ;;  %v315_v30 = vadd.f32 %v616_v2, %v276_v17  ;;  %v352_v55 = vld [vmem:[%s610_s26 + $0x98] sm:$0xff]  ;;  %v353_v56 = vld [vmem:[%s610_s26 + $0xa0] sm:$0xff]  ;;  %v354_v62 = vld [vmem:[%s610_s26 + $0xa8] sm:$0xff] }
  0x20   : > { %v378_v29 = vadd.f32 %v346_v14, %v314_v16  ;;  %v316_v31 = vadd.f32 %v616_v2, %v277_v18  ;;  %437 = vst [vmem:[%s646_s5 + $0x40] sm:$0xff] %v405_v21  ;;  %v408_v34 = vmax.f32 %v376_v23, 0.0  ;;  %v278_v36 = vmul.f32 %v598_v0, %v239_v19  ;;  %v247_v5 = vld [vmem:[%s604_s23 + $0xc0] sm:$0xff]  ;;  %v248_v6 = vld [vmem:[%s604_s23 + $0xc8] sm:$0xff]  ;;  %v355_v11 = vld [vmem:[%s610_s26 + $0xb0] sm:$0xff] }
  0x21   : > { %438 = vst [vmem:[%s646_s5 + $0x48] sm:$0xff] %v406_v22  ;;  %v409_v35 = vmax.f32 %v377_v24, 0.0  ;;  %v279_v37 = vmul.f32 %v598_v0, %v240_v20  ;;  %439 = vst [vmem:[%s646_s5 + $0x50] sm:$0xff] %v407_v28  ;;  %v379_v40 = vadd.f32 %v347_v25, %v315_v30  ;;  %v280_v44 = vmul.f32 %v598_v0, %v241_v27  ;;  %v356_v12 = vld [vmem:[%s610_s26 + $0xb8] sm:$0xff]  ;;  %v249_v13 = vld [vmem:[%s604_s23 + $0xd0] sm:$0xff] }
  0x22   : > { %v410_v39 = vmax.f32 %v378_v29, 0.0  ;;  %v380_v41 = vadd.f32 %v348_v26, %v316_v31  ;;  %440 = vst [vmem:[%s646_s5 + $0x58] sm:$0xff] %v408_v34  ;;  %v317_v45 = vadd.f32 %v616_v2, %v278_v36  ;;  %v281_v48 = vmul.f32 %v598_v0, %v242_v32  ;;  %v250_v18 = vld [vmem:[%s604_s23 + $0xd8] sm:$0xff]  ;;  %v251_v19 = vld [vmem:[%s604_s23 + $0xe0] sm:$0xff]  ;;  %v252_v24 = vld [vmem:[%s604_s23 + $0xe8] sm:$0xff] }
  0x23   : > { %441 = vst [vmem:[%s646_s5 + $0x60] sm:$0xff] %v409_v35  ;;  %v318_v46 = vadd.f32 %v616_v2, %v279_v37  ;;  %v282_v49 = vmul.f32 %v598_v0, %v243_v33  ;;  %v411_v52 = vmax.f32 %v379_v40, 0.0  ;;  %v319_v54 = vadd.f32 %v616_v2, %v280_v44  ;;  %v357_v28 = vld [vmem:[%s610_s26 + $0xc0] sm:$0xff]  ;;  %v358_v29 = vld [vmem:[%s610_s26 + $0xc8] sm:$0xff]  ;;  %v359_v33 = vld [vmem:[%s610_s26 + $0xd0] sm:$0xff] }
  0x24   : > { %442 = vst [vmem:[%s646_s5 + $0x68] sm:$0xff] %v410_v39  ;;  %v412_v53 = vmax.f32 %v380_v41, 0.0  ;;  %v283_v57 = vmul.f32 %v598_v0, %v244_v38  ;;  %v381_v58 = vadd.f32 %v349_v42, %v317_v45  ;;  %v320_v60 = vadd.f32 %v616_v2, %v281_v48  ;;  %v253_v36 = vld [vmem:[%s604_s23 + $0xf0] sm:$0xff]  ;;  %v254_v37 = vld [vmem:[%s604_s23 + $0xf8] sm:$0xff]  ;;  %v361_v42 = vld [vmem:[%s610_s26 + $0xe0] sm:$0xff] }
  0x25   : > { %v382_v59 = vadd.f32 %v350_v43, %v318_v46  ;;  %v321_v61 = vadd.f32 %v616_v2, %v282_v49  ;;  %443 = vst [vmem:[%s646_s5 + $0x70] sm:$0xff] %v411_v52  ;;  %v383_v63 = vadd.f32 %v351_v47, %v319_v54  ;;  %v284_v3 = vmul.f32 %v598_v0, %v245_v50  ;;  %v360_v41 = vld [vmem:[%s610_s26 + $0xd8] sm:$0xff]  ;;  %v362_v48 = vld [vmem:[%s610_s26 + $0xe8] sm:$0xff] }
  0x26   : > { %444 = vst [vmem:[%s646_s5 + $0x78] sm:$0xff] %v412_v53  ;;  %v322_v1 = vadd.f32 %v616_v2, %v283_v57  ;;  %v285_v4 = vmul.f32 %v598_v0, %v246_v51  ;;  %v413_v7 = vmax.f32 %v381_v58, 0.0  ;;  %v384_v9 = vadd.f32 %v352_v55, %v320_v60  ;;  %v363_v57 = vld [vmem:[%s610_s26 + $0xf0] sm:$0xff]  ;;  %v364_v58 = vld [vmem:[%s610_s26 + $0xf8] sm:$0xff] }
  0x27   : > { %v414_v8 = vmax.f32 %v382_v59, 0.0  ;;  %v385_v10 = vadd.f32 %v353_v56, %v321_v61  ;;  %v415_v14 = vmax.f32 %v383_v63, 0.0  ;;  %v323_v16 = vadd.f32 %v616_v2, %v284_v3 }
  0x28   : > { %v386_v15 = vadd.f32 %v354_v62, %v322_v1  ;;  %v324_v17 = vadd.f32 %v616_v2, %v285_v4  ;;  %445 = vst [vmem:[%s646_s5 + $0x80] sm:$0xff] %v413_v7  ;;  %v416_v20 = vmax.f32 %v384_v9, 0.0  ;;  %v286_v22 = vmul.f32 %v598_v0, %v247_v5 }
  0x29   : > { %446 = vst [vmem:[%s646_s5 + $0x88] sm:$0xff] %v414_v8  ;;  %v417_v21 = vmax.f32 %v385_v10, 0.0  ;;  %v287_v23 = vmul.f32 %v598_v0, %v248_v6  ;;  %447 = vst [vmem:[%s646_s5 + $0x90] sm:$0xff] %v415_v14  ;;  %v387_v26 = vadd.f32 %v355_v11, %v323_v16  ;;  %v288_v30 = vmul.f32 %v598_v0, %v249_v13 }
  0x2a   : > { %v418_v25 = vmax.f32 %v386_v15, 0.0  ;;  %v388_v27 = vadd.f32 %v356_v12, %v324_v17  ;;  %448 = vst [vmem:[%s646_s5 + $0x98] sm:$0xff] %v416_v20  ;;  %v325_v31 = vadd.f32 %v616_v2, %v286_v22  ;;  %v289_v34 = vmul.f32 %v598_v0, %v250_v18 }
  0x2b   : > { %449 = vst [vmem:[%s646_s5 + $0xa0] sm:$0xff] %v417_v21  ;;  %v326_v32 = vadd.f32 %v616_v2, %v287_v23  ;;  %v290_v35 = vmul.f32 %v598_v0, %v251_v19  ;;  %v419_v38 = vmax.f32 %v387_v26, 0.0  ;;  %v327_v40 = vadd.f32 %v616_v2, %v288_v30 }
  0x2c   : > { %450 = vst [vmem:[%s646_s5 + $0xa8] sm:$0xff] %v418_v25  ;;  %v420_v39 = vmax.f32 %v388_v27, 0.0  ;;  %v291_v43 = vmul.f32 %v598_v0, %v252_v24  ;;  %v389_v44 = vadd.f32 %v357_v28, %v325_v31  ;;  %v328_v46 = vadd.f32 %v616_v2, %v289_v34 }
  0x2d   : > { %v390_v45 = vadd.f32 %v358_v29, %v326_v32  ;;  %v329_v47 = vadd.f32 %v616_v2, %v290_v35  ;;  %451 = vst [vmem:[%s646_s5 + $0xb0] sm:$0xff] %v419_v38  ;;  %v391_v49 = vadd.f32 %v359_v33, %v327_v40  ;;  %v292_v51 = vmul.f32 %v598_v0, %v253_v36 }
  0x2e   : > { %452 = vst [vmem:[%s646_s5 + $0xb8] sm:$0xff] %v420_v39  ;;  %v330_v50 = vadd.f32 %v616_v2, %v291_v43  ;;  %v293_v52 = vmul.f32 %v598_v0, %v254_v37  ;;  %v421_v53 = vmax.f32 %v389_v44, 0.0  ;;  %v392_v55 = vadd.f32 %v360_v41, %v328_v46 }
  0x2f   : > { %v422_v54 = vmax.f32 %v390_v45, 0.0  ;;  %v393_v56 = vadd.f32 %v361_v42, %v329_v47  ;;  %v423_v59 = vmax.f32 %v391_v49, 0.0  ;;  %v331_v61 = vadd.f32 %v616_v2, %v292_v51 }
  0x30   : > { %v394_v60 = vadd.f32 %v362_v48, %v330_v50  ;;  %v332_v62 = vadd.f32 %v616_v2, %v293_v52  ;;  %453 = vst [vmem:[%s646_s5 + $0xc0] sm:$0xff] %v421_v53  ;;  %v424_v0 = vmax.f32 %v392_v55, 0.0 }
  0x31   : > { %454 = vst [vmem:[%s646_s5 + $0xc8] sm:$0xff] %v422_v54  ;;  %v425_v63 = vmax.f32 %v393_v56, 0.0  ;;  %455 = vst [vmem:[%s646_s5 + $0xd0] sm:$0xff] %v423_v59  ;;  %v395_v3 = vadd.f32 %v363_v57, %v331_v61 }
  0x32   : > { %v426_v1 = vmax.f32 %v394_v60, 0.0  ;;  %v396_v4 = vadd.f32 %v364_v58, %v332_v62  ;;  %456 = vst [vmem:[%s646_s5 + $0xd8] sm:$0xff] %v424_v0 }
  0x33   : > { %457 = vst [vmem:[%s646_s5 + $0xe0] sm:$0xff] %v425_v63  ;;  %v427_v5 = vmax.f32 %v395_v3, 0.0 }
  0x34   : > { %458 = vst [vmem:[%s646_s5 + $0xe8] sm:$0xff] %v426_v1  ;;  %v428_v6 = vmax.f32 %v396_v4, 0.0 }
  0x35   : > { %459 = vst [vmem:[%s646_s5 + $0xf0] sm:$0xff] %v427_v5 }
  0x36   : > { %460 = vst [vmem:[%s646_s5 + $0xf8] sm:$0xff] %v428_v6 }
  0x37 PF: > { %s14_s15 = sadd.s32 1, %s558_s15  }
  0x38   : > { %p11_p4 = scmp.ge.s32.totalorder %s14_s15, 4  }
  0x3a   :  { %13 = sbr.rel (!%p11_p4) target bundleno = 1 (0x1), region = 69 }

// kernel: _forward_impl.8
= control target key start
LH: loop header
LB: loop body
LE: loop exit
PB: predicated region body
PF: predicated region fallthrough
CT: control target
= control target key end

     0   :  { %s1355_s21 = smov 0   ;;  %s1357_s22 = smov 0   ;;  %s1658_s0 = inlined_call_operand.vmem [shape: f32[512,128], index: 0, kind: input, shape index: {}]   ;;  %s1659_s1 = inlined_call_operand.vmem [shape: f32[1,128], index: 1, kind: input, shape index: {}]   ;;  %s1660_s2 = inlined_call_operand.vmem [shape: f32[1,128], index: 2, kind: input, shape index: {}]   ;;  %s1661_s3 = inlined_call_operand.vmem [shape: bf16[128,128], index: 3, kind: input, shape index: {}]   ;;  %s1662_s4 = inlined_call_operand.vmem [shape: f32[512,128], index: 4, kind: output, shape index: {0}]   ;;  %s1663_s5 = inlined_call_operand.vmem [shape: f32[1,128], index: 5, kind: output, shape index: {1}]   ;;  %s1664_s6 = inlined_call_operand.vmem [shape: f32[1,128], index: 6, kind: output, shape index: {2}]  }
   0x1   :  { %s1359_s23 = smov 0  }
   0x2 LB: > { %s29_s24 = sadd.s32 1, %s1313_s22  ;;  %p1155_p0 = scmp.ge.s32.totalorder %s1317_s23, 1  ;;  %s1317_s23 = sphi %s1359_s23, %s17_s23   ;;  %s1313_s22 = sphi %s1357_s22, %s1666_s22   ;;  %s1309_s21 = sphi %s1355_s21, %s1665_s21  }
   0x3   : > { %p31_p1 = scmp.ge.s32.totalorder %s29_s24, 2  ;;  %p252_p2 = scmp.lt.s32.totalorder %s1317_s23, 3 }
   0x5   : > { %s1668_s24 = smov (%p31_p1, %s29_s24), 0  ;;  %p253_p3 = pnand %p1155_p0, %p252_p2 }
   0x6   : > { %s1156_s25 = sshll.u32 (!%p253_p3), %s1309_s21, 5  ;;  %p324_p4 = scmp.eq.s32.totalorder (!%p253_p3), %s1309_s21, 0 }
   0x7   : > { %256 = sbr.rel (%p253_p3) target bundleno = 356 (0x164), region = 36  ;;  %p297_p5 = scmp.lt.s32.totalorder (!%p253_p3), %s1156_s25, 63 }
   0xe   : > { %s1670_s25 = smov (!%p297_p5, %s1156_s25), 63  ;;  %329 = sbr.rel (!%p324_p4) target bundleno = 21 (0x15), region = 40 }
   0xf   : > { %s1157_s26 = sshll.u32 %s1670_s25, 3  ;;  %v1319_v0 = vmov (%p324_p4), 0.0  }
  0x10   : > { %s1376_s29 = scalar_lea.vmem %s1658_s0, %s1157_s26  ;;  %s1381_s8 = scalar_lea.vmem %s1662_s4, %s1157_s26  ;;  %330 = vst [vmem:[#allocation3] sm:$0x1] (%p324_p4), %v1319_v0  ;;  %331 = vst [vmem:[#allocation4] sm:$0x1] (%p324_p4), %v1319_v0 }
  0x15 PF: > { %v1287_v1 = vld [vmem:[%s1661_s3] sm:$0xff]   ;;  %v1288_v2 = vld [vmem:[%s1661_s3 + $0x8] sm:$0xff]   ;;  %v1289_v3 = vld [vmem:[%s1661_s3 + $0x10] sm:$0xff]  }
  0x16   : > { %1198 = vmatprep.subr.bf16.mxu0 %v1287_v1  ;;  %1246 = vmatprep.subr.bf16.mxu1 %v1287_v1  ;;  %v1290_v4 = vld [vmem:[%s1661_s3 + $0x18] sm:$0xff]   ;;  %v367_v5 = vld [vmem:[%s1376_s29] sm:$0xff]  ;;  %v368_v6 = vld [vmem:[%s1376_s29 + $0x8] sm:$0xff] }
  0x17   : > { %1199 = vmatpush3.bf16.msra.mxu0 %v1287_v1  ;;  %1254 = vmatpush3.bf16.msra.mxu1 %v1287_v1  ;;  %v1400_v7 = vld [vmem:[%s1659_s1] ss:$0 sm:$0xff]  ;;  %v369_v11 = vld [vmem:[%s1376_s29 + $0x10] sm:$0xff]  ;;  %v370_v12 = vld [vmem:[%s1376_s29 + $0x18] sm:$0xff] }
  0x18   : > { %1200 = vmatprep.subr.bf16.mxu0 %v1288_v2  ;;  %1247 = vmatprep.subr.bf16.mxu1 %v1288_v2  ;;  %v406_v8 = vmul.f32 %v1400_v7, %v367_v5  ;;  %v407_v9 = vmul.f32 %v1400_v7, %v368_v6  ;;  %v1407_v10 = vld [vmem:[%s1660_s2] ss:$0 sm:$0xff]  ;;  %v408_v13 = vmul.f32 %v1400_v7, %v369_v11  ;;  %v372_v21 = vld [vmem:[%s1376_s29 + $0x28] sm:$0xff]  ;;  %v373_v23 = vld [vmem:[%s1376_s29 + $0x30] sm:$0xff] }
  0x19   : > { %v409_v16 = vmul.f32 %v1400_v7, %v370_v12  ;;  %v371_v17 = vld [vmem:[%s1376_s29 + $0x20] sm:$0xff]  ;;  %v374_v27 = vld [vmem:[%s1376_s29 + $0x38] sm:$0xff]  ;;  %v1292_v28 = vld [vmem:[%s1661_s3 + $0x28] sm:$0xff]   ;;  %v411_v29 = vmul.f32 %v1400_v7, %v372_v21  ;;  %v412_v30 = vmul.f32 %v1400_v7, %v373_v23 }
  0x1a   : > { %v445_v14 = vadd.f32 %v1407_v10, %v406_v8  ;;  %v446_v15 = vadd.f32 %v1407_v10, %v407_v9  ;;  %v1291_v18 = vld [vmem:[%s1661_s3 + $0x20] sm:$0xff]   ;;  %v410_v22 = vmul.f32 %v1400_v7, %v371_v17  ;;  %v447_v25 = vadd.f32 %v1407_v10, %v408_v13  ;;  %v1293_v36 = vld [vmem:[%s1661_s3 + $0x30] sm:$0xff]   ;;  %v384_v39 = vld [vmem:[%s1376_s29 + $0x88] sm:$0xff] }
  0x1b   : > { %1201 = vmatpush3.bf16.msra.mxu0 %v1288_v2  ;;  %1255 = vmatpush3.bf16.msra.mxu1 %v1288_v2  ;;  %v448_v26 = vadd.f32 %v1407_v10, %v409_v16  ;;  %v413_v31 = vmul.f32 %v1400_v7, %v374_v27  ;;  %v383_v32 = vld [vmem:[%s1376_s29 + $0x80] sm:$0xff]  ;;  %v1439_v37 = vadd.f32 %v1407_v10, %v411_v29  ;;  %v376_v41 = vld [vmem:[%s1376_s29 + $0x48] sm:$0xff]  ;;  %v385_v43 = vld [vmem:[%s1376_s29 + $0x90] sm:$0xff] }
  0x1c   : > { %1202 = vmatprep.subr.bf16.mxu0 %v1289_v3  ;;  %1248 = vmatprep.subr.bf16.mxu1 %v1289_v3  ;;  %v477_v19 = vmax.f32 %v445_v14, 0.0  ;;  %v478_v20 = vmax.f32 %v446_v15, 0.0  ;;  %v479_v33 = vmax.f32 %v447_v25, 0.0  ;;  %v1433_v35 = vadd.f32 %v1407_v10, %v410_v22  ;;  %v375_v38 = vld [vmem:[%s1376_s29 + $0x40] sm:$0xff]  ;;  %v386_v45 = vld [vmem:[%s1376_s29 + $0x98] sm:$0xff]  ;;  %v388_v51 = vld [vmem:[%s1376_s29 + $0xa8] sm:$0xff] }
  0x1d   : > { %v480_v34 = vmax.f32 %v448_v26, 0.0  ;;  %v1444_v40 = vadd.f32 %v1407_v10, %v412_v30  ;;  %v422_v42 = vmul.f32 %v1400_v7, %v383_v32  ;;  %v1450_v44 = vadd.f32 %v1407_v10, %v413_v31  ;;  %v387_v46 = vld [vmem:[%s1376_s29 + $0xa0] sm:$0xff]  ;;  %v389_v52 = vld [vmem:[%s1376_s29 + $0xb0] sm:$0xff]  ;;  %v1294_v53 = vld [vmem:[%s1661_s3 + $0x38] sm:$0xff]  }
  0x1e   : > { %v541_v24 = vpack.c.bf16 %v478_v20, %v477_v19  ;;  %v481_v48 = vmax.f32 %v1433_v35, 0.0  ;;  %v414_v49 = vmul.f32 %v1400_v7, %v375_v38  ;;  %v423_v50 = vmul.f32 %v1400_v7, %v384_v39  ;;  %v390_v62 = vld [vmem:[%s1376_s29 + $0xb8] sm:$0xff]  ;;  %v392_v9 = vld [vmem:[%s1376_s29 + $0xc8] sm:$0xff]  ;;  %v377_v15 = vld [vmem:[%s1376_s29 + $0x50] sm:$0xff] }
  0x1f   : > { %1203 = vmatpush3.bf16.msra.mxu0 %v1289_v3  ;;  %1256 = vmatpush3.bf16.msra.mxu1 %v1289_v3  ;;  %v1454_v47 = vpack.c.bf16 %v480_v34, %v479_v33  ;;  %v482_v54 = vmax.f32 %v1439_v37, 0.0  ;;  %v415_v55 = vmul.f32 %v1400_v7, %v376_v41  ;;  %v461_v56 = vadd.f32 %v1407_v10, %v422_v42  ;;  %v391_v3 = vld [vmem:[%s1376_s29 + $0xc0] sm:$0xff]  ;;  %v378_v16 = vld [vmem:[%s1376_s29 + $0x58] sm:$0xff]  ;;  %v380_v22 = vld [vmem:[%s1376_s29 + $0x68] sm:$0xff] }
  0x20   : > { %1204 = vmatprep.subr.bf16.mxu0 %v1290_v4  ;;  %1249 = vmatprep.subr.bf16.mxu1 %v1290_v4  ;;  %v424_v57 = vmul.f32 %v1400_v7, %v385_v43  ;;  %v483_v58 = vmax.f32 %v1444_v40, 0.0  ;;  %v462_v59 = vadd.f32 %v1407_v10, %v423_v50  ;;  %v425_v60 = vmul.f32 %v1400_v7, %v386_v45  ;;  %v379_v21 = vld [vmem:[%s1376_s29 + $0x60] sm:$0xff]  ;;  %v393_v31 = vld [vmem:[%s1376_s29 + $0xd0] sm:$0xff]  ;;  %v394_v32 = vld [vmem:[%s1376_s29 + $0xd8] sm:$0xff] }
  0x21   : > { %1214 = vmatprep.mubr.bf16.mxu0 %v541_v24  ;;  %v426_v61 = vmul.f32 %v1400_v7, %v387_v46  ;;  %v493_v63 = vmax.f32 %v461_v56, 0.0  ;;  %v427_v1 = vmul.f32 %v1400_v7, %v388_v51  ;;  %v428_v2 = vmul.f32 %v1400_v7, %v389_v52  ;;  %v395_v37 = vld [vmem:[%s1376_s29 + $0xe0] sm:$0xff]  ;;  %v396_v38 = vld [vmem:[%s1376_s29 + $0xe8] sm:$0xff] }
  0x22   : > { %v463_v0 = vadd.f32 %v1407_v10, %v424_v57  ;;  %v494_v5 = vmax.f32 %v462_v59, 0.0  ;;  %v464_v6 = vadd.f32 %v1407_v10, %v425_v60  ;;  %v454_v11 = vadd.f32 %v1407_v10, %v415_v55  ;;  %v381_v57 = vld [vmem:[%s1376_s29 + $0x70] sm:$0xff]  ;;  %v382_v59 = vld [vmem:[%s1376_s29 + $0x78] sm:$0xff] }
  0x23   : > { %1205 = vmatpush3.bf16.msra.mxu0 %v1290_v4  ;;  %1257 = vmatpush3.bf16.msra.mxu1 %v1290_v4  ;;  %v1478_v4 = vadd.f32 %v1407_v10, %v414_v49  ;;  %v465_v8 = vadd.f32 %v1407_v10, %v426_v61  ;;  %v466_v13 = vadd.f32 %v1407_v10, %v427_v1  ;;  %v397_v1 = vld [vmem:[%s1376_s29 + $0xf0] sm:$0xff] }
  0x24   : > { %1206 = vmatprep.subr.bf16.mxu0 %v1291_v18  ;;  %1250 = vmatprep.subr.bf16.mxu1 %v1291_v18  ;;  %v495_v12 = vmax.f32 %v463_v0, 0.0  ;;  %v429_v14 = vmul.f32 %v1400_v7, %v390_v62  ;;  %v549_v17 = vpack.c.bf16 %v494_v5, %v493_v63  ;;  %v430_v20 = vmul.f32 %v1400_v7, %v391_v3 }
  0x25   : > { %v497_v19 = vmax.f32 %v465_v8, 0.0  ;;  %v498_v23 = vmax.f32 %v466_v13, 0.0  ;;  %v467_v24 = vadd.f32 %v1407_v10, %v428_v2  ;;  %v431_v26 = vmul.f32 %v1400_v7, %v392_v9  ;;  %v398_v2 = vld [vmem:[%s1376_s29 + $0xf8] sm:$0xff] }
  0x26   : > { %v468_v25 = vadd.f32 %v1407_v10, %v429_v14  ;;  %v543_v27 = vpack.c.bf16 %v482_v54, %v481_v48  ;;  %v469_v30 = vadd.f32 %v1407_v10, %v430_v20  ;;  %v416_v33 = vmul.f32 %v1400_v7, %v377_v15  ;;  %1230 = vmatprep.mubr.bf16.mxu1 %v549_v17 }
  0x27   : > { %1207 = vmatpush3.bf16.msra.mxu0 %v1291_v18  ;;  %1258 = vmatpush3.bf16.msra.mxu1 %v1291_v18  ;;  %v496_v18 = vmax.f32 %v464_v6, 0.0  ;;  %v417_v34 = vmul.f32 %v1400_v7, %v378_v16  ;;  %v551_v35 = vpack.c.bf16 %v498_v23, %v497_v19  ;;  %v485_v39 = vmax.f32 %v1478_v4, 0.0 }
  0x28   : > { %1208 = vmatprep.subr.bf16.mxu0 %v1292_v28  ;;  %1251 = vmatprep.subr.bf16.mxu1 %v1292_v28  ;;  %v486_v41 = vmax.f32 %v454_v11, 0.0  ;;  %v418_v42 = vmul.f32 %v1400_v7, %v379_v21  ;;  %v419_v43 = vmul.f32 %v1400_v7, %v380_v22  ;;  %v500_v45 = vmax.f32 %v468_v25, 0.0 }
  0x29   : > { %v550_v29 = vpack.c.bf16 %v496_v18, %v495_v12  ;;  %v432_v46 = vmul.f32 %v1400_v7, %v393_v31  ;;  %v433_v48 = vmul.f32 %v1400_v7, %v394_v32  ;;  %v501_v49 = vmax.f32 %v469_v30, 0.0 }
  0x2a   : > { %v434_v51 = vmul.f32 %v1400_v7, %v395_v37  ;;  %v435_v52 = vmul.f32 %v1400_v7, %v396_v38  ;;  %v456_v54 = vadd.f32 %v1407_v10, %v417_v34  ;;  %v457_v55 = vadd.f32 %v1407_v10, %v418_v42 }
  0x2b   : > { %1209 = vmatpush3.bf16.msra.mxu0 %v1292_v28  ;;  %1259 = vmatpush3.bf16.msra.mxu1 %v1292_v28  ;;  %v484_v28 = vmax.f32 %v1450_v44, 0.0  ;;  %v499_v44 = vmax.f32 %v467_v24, 0.0  ;;  %v458_v56 = vadd.f32 %v1407_v10, %v419_v43  ;;  %v471_v61 = vadd.f32 %v1407_v10, %v432_v46 }
  0x2c   : > { %1210 = vmatprep.subr.bf16.mxu0 %v1293_v36  ;;  %1252 = vmatprep.subr.bf16.mxu1 %v1293_v36  ;;  %v472_v62 = vadd.f32 %v1407_v10, %v433_v48  ;;  %v545_v63 = vpack.c.bf16 %v486_v41, %v485_v39  ;;  %v473_v40 = vadd.f32 %v1407_v10, %v434_v51  ;;  %v488_v4 = vmax.f32 %v456_v54, 0.0 }
  0x2d   : > { %v552_v60 = vpack.c.bf16 %v500_v45, %v499_v44  ;;  %v420_v5 = vmul.f32 %v1400_v7, %v381_v57  ;;  %v421_v6 = vmul.f32 %v1400_v7, %v382_v59  ;;  %v503_v8 = vmax.f32 %v471_v61, 0.0 }
  0x2e   : > { %v504_v9 = vmax.f32 %v472_v62, 0.0  ;;  %v436_v11 = vmul.f32 %v1400_v7, %v397_v1  ;;  %v437_v12 = vmul.f32 %v1400_v7, %v398_v2  ;;  %v489_v13 = vmax.f32 %v457_v55, 0.0 }
  0x2f   : > { %1211 = vmatpush3.bf16.msra.mxu0 %v1293_v36  ;;  %1260 = vmatpush3.bf16.msra.mxu1 %v1293_v36  ;;  %v470_v36 = vadd.f32 %v1407_v10, %v431_v26  ;;  %v490_v14 = vmax.f32 %v458_v56, 0.0  ;;  %v505_v15 = vmax.f32 %v473_v40, 0.0  ;;  %v459_v18 = vadd.f32 %v1407_v10, %v420_v5 }
  0x30   : > { %1212 = vmatprep.subr.bf16.mxu0 %v1294_v53  ;;  %1253 = vmatprep.subr.bf16.mxu1 %v1294_v53  ;;  %v460_v19 = vadd.f32 %v1407_v10, %v421_v6  ;;  %v554_v20 = vpack.c.bf16 %v504_v9, %v503_v8  ;;  %v475_v21 = vadd.f32 %v1407_v10, %v436_v11 }
  0x31   : > { %v502_v50 = vmax.f32 %v470_v36, 0.0  ;;  %v476_v22 = vadd.f32 %v1407_v10, %v437_v12  ;;  %v547_v23 = vpack.c.bf16 %v490_v14, %v489_v13  ;;  %v491_v7 = vmax.f32 %v459_v18, 0.0 }
  0x32   : > { %v492_v25 = vmax.f32 %v460_v19, 0.0  ;;  %v507_v26 = vmax.f32 %v475_v21, 0.0 }
  0x33   : > { %1213 = vmatpush3.bf16.msra.mxu0 %v1294_v53  ;;  %1261 = vmatpush3.bf16.msra.mxu1 %v1294_v53  ;;  %v455_v53 = vadd.f32 %v1407_v10, %v416_v33  ;;  %v553_v0 = vpack.c.bf16 %v502_v50, %v501_v49 }
  0x35   : > { %v487_v3 = vmax.f32 %v455_v53, 0.0 }
  0x36   : > { %1215 = vmatmul.mubr.bf16.vlgmr.msra.gmra.mrb[0].mxu0 %v1454_v47  ;;  %1231 = vmatmul.mubr.bf16.vlgmr.msra.gmra.mrb[0].mxu1 %v550_v29  ;;  %v544_v47 = vpack.c.bf16 %v484_v28, %v483_v58  ;;  %v474_v58 = vadd.f32 %v1407_v10, %v435_v52  ;;  %v548_v28 = vpack.c.bf16 %v492_v25, %v491_v7 }
  0x37   : > { %1218 = vmatprep.mubr.bf16.mxu0 %v543_v27  ;;  %1234 = vmatprep.mubr.bf16.mxu1 %v551_v35  ;;  %v546_v17 = vpack.c.bf16 %v488_v4, %v487_v3  ;;  %v508_v27 = vmax.f32 %v476_v22, 0.0 }
  0x38   : > { %v506_v16 = vmax.f32 %v474_v58, 0.0 }
  0x39   : > { %v556_v29 = vpack.c.bf16 %v508_v27, %v507_v26 }
  0x3a   : > { %v555_v24 = vpack.c.bf16 %v506_v16, %v505_v15 }
  0x3e   : > { %1219 = vmatmul.mubr.bf16.gmra.mrb[4].mxu0 %v544_v47  ;;  %1235 = vmatmul.mubr.bf16.gmra.mrb[4].mxu1 %v552_v60 }
  0x3f   : > { %1222 = vmatprep.mubr.bf16.mxu0 %v545_v63  ;;  %1238 = vmatprep.mubr.bf16.mxu1 %v553_v0 }
  0x46   : > { %1223 = vmatmul.mubr.bf16.gmra.mrb[8].mxu0 %v546_v17  ;;  %1239 = vmatmul.mubr.bf16.gmra.mrb[8].mxu1 %v554_v20 }
  0x47   : > { %1226 = vmatprep.mubr.bf16.mxu0 %v547_v23  ;;  %1242 = vmatprep.mubr.bf16.mxu1 %v555_v24 }
  0x4e   : > { %1227 = vmatmul.mubr.bf16.gmra.mrb[12].mxu0 %v548_v28  ;;  %1243 = vmatmul.mubr.bf16.gmra.mrb[12].mxu1 %v556_v29 }
 0x109   : > { %v1216_v10 = vpop.f32.mrb[0].mxu0  ;;  %v1533_v30 = vpop.f32.mrb[0].mxu1 }
 0x10a   : > { %883 = vst [vmem:[%s1381_s8 + $0x10] sm:$0xff] %v1216_v10  ;;  %v655_v31 = vpop.f32.mrb[1].mxu0  ;;  %899 = vst [vmem:[%s1381_s8 + $0x90] sm:$0xff] %v1533_v30  ;;  %v1538_v32 = vpop.f32.mrb[1].mxu1  ;;  %v956_v41 = vmul.f32 %v1216_v10, %v1216_v10 }
 0x10b   : > { %881 = vst [vmem:[%s1381_s8] sm:$0xff] %v655_v31  ;;  %v1217_v33 = vpop.f32.mrb[2].mxu0  ;;  %897 = vst [vmem:[%s1381_s8 + $0x80] sm:$0xff] %v1538_v32  ;;  %v1543_v34 = vpop.f32.mrb[2].mxu1  ;;  %v954_v37 = vmul.f32 %v655_v31, %v655_v31 }
 0x10c   : > { %884 = vst [vmem:[%s1381_s8 + $0x18] sm:$0xff] %v1217_v33  ;;  %v658_v35 = vpop.f32.mrb[3].mxu0  ;;  %900 = vst [vmem:[%s1381_s8 + $0x98] sm:$0xff] %v1543_v34  ;;  %v1548_v36 = vpop.f32.mrb[3].mxu1  ;;  %v957_v44 = vmul.f32 %v1217_v33, %v1217_v33 }
 0x10d   : > { %882 = vst [vmem:[%s1381_s8 + $0x8] sm:$0xff] %v658_v35  ;;  %v914_v38 = vadd.f32 %v658_v35, %v655_v31  ;;  %v955_v39 = vmul.f32 %v658_v35, %v658_v35  ;;  %898 = vst [vmem:[%s1381_s8 + $0x88] sm:$0xff] %v1548_v36 }
 0x10f   : > { %v915_v42 = vadd.f32 %v1216_v10, %v914_v38  ;;  %v986_v43 = vadd.f32 %v955_v39, %v954_v37 }
 0x111   : > { %v987_v45 = vadd.f32 %v986_v43, %v956_v41  ;;  %v1220_v46 = vpop.f32.mrb[4].mxu0  ;;  %v916_v48 = vadd.f32 %v1217_v33, %v915_v42  ;;  %v1553_v49 = vpop.f32.mrb[4].mxu1 }
 0x112   : > { %887 = vst [vmem:[%s1381_s8 + $0x30] sm:$0xff] %v1220_v46  ;;  %v671_v50 = vpop.f32.mrb[5].mxu0  ;;  %903 = vst [vmem:[%s1381_s8 + $0xb0] sm:$0xff] %v1553_v49  ;;  %v1558_v51 = vpop.f32.mrb[5].mxu1  ;;  %v960_v62 = vmul.f32 %v1220_v46, %v1220_v46 }
 0x113   : > { %885 = vst [vmem:[%s1381_s8 + $0x20] sm:$0xff] %v671_v50  ;;  %v917_v52 = vadd.f32 %v916_v48, %v671_v50  ;;  %v958_v47 = vmul.f32 %v671_v50, %v671_v50  ;;  %v988_v53 = vadd.f32 %v987_v45, %v957_v44  ;;  %v1221_v54 = vpop.f32.mrb[6].mxu0  ;;  %901 = vst [vmem:[%s1381_s8 + $0xa0] sm:$0xff] %v1558_v51  ;;  %v1563_v55 = vpop.f32.mrb[6].mxu1 }
 0x114   : > { %888 = vst [vmem:[%s1381_s8 + $0x38] sm:$0xff] %v1221_v54  ;;  %v674_v56 = vpop.f32.mrb[7].mxu0  ;;  %904 = vst [vmem:[%s1381_s8 + $0xb8] sm:$0xff] %v1563_v55  ;;  %v1568_v57 = vpop.f32.mrb[7].mxu1  ;;  %v961_v40 = vmul.f32 %v1221_v54, %v1221_v54  ;;  %v970_v48 = vmul.f32 %v1538_v32, %v1538_v32 }
 0x115   : > { %v989_v59 = vadd.f32 %v988_v53, %v958_v47  ;;  %886 = vst [vmem:[%s1381_s8 + $0x28] sm:$0xff] %v674_v56  ;;  %v918_v60 = vadd.f32 %v917_v52, %v674_v56  ;;  %v959_v61 = vmul.f32 %v674_v56, %v674_v56  ;;  %902 = vst [vmem:[%s1381_s8 + $0xa8] sm:$0xff] %v1568_v57 }
 0x116   : > { %v972_v56 = vmul.f32 %v1533_v30, %v1533_v30 }
 0x117   : > { %v919_v63 = vadd.f32 %v1220_v46, %v918_v60  ;;  %v990_v0 = vadd.f32 %v989_v59, %v959_v61  ;;  %v973_v61 = vmul.f32 %v1543_v34, %v1543_v34 }
 0x119   : > { %v991_v58 = vadd.f32 %v990_v0, %v960_v62  ;;  %v1224_v1 = vpop.f32.mrb[8].mxu0  ;;  %v920_v2 = vadd.f32 %v1221_v54, %v919_v63  ;;  %v1573_v3 = vpop.f32.mrb[8].mxu1  ;;  %v971_v54 = vmul.f32 %v1548_v36, %v1548_v36 }
 0x11a   : > { %891 = vst [vmem:[%s1381_s8 + $0x50] sm:$0xff] %v1224_v1  ;;  %v687_v4 = vpop.f32.mrb[9].mxu0  ;;  %907 = vst [vmem:[%s1381_s8 + $0xd0] sm:$0xff] %v1573_v3  ;;  %v1578_v5 = vpop.f32.mrb[9].mxu1  ;;  %v964_v18 = vmul.f32 %v1224_v1, %v1224_v1 }
 0x11b   : > { %889 = vst [vmem:[%s1381_s8 + $0x40] sm:$0xff] %v687_v4  ;;  %v921_v6 = vadd.f32 %v920_v2, %v687_v4  ;;  %v962_v8 = vmul.f32 %v687_v4, %v687_v4  ;;  %v992_v9 = vadd.f32 %v991_v58, %v961_v40  ;;  %v1225_v11 = vpop.f32.mrb[10].mxu0  ;;  %905 = vst [vmem:[%s1381_s8 + $0xc0] sm:$0xff] %v1578_v5  ;;  %v1583_v12 = vpop.f32.mrb[10].mxu1 }
 0x11c   : > { %892 = vst [vmem:[%s1381_s8 + $0x58] sm:$0xff] %v1225_v11  ;;  %v690_v13 = vpop.f32.mrb[11].mxu0  ;;  %908 = vst [vmem:[%s1381_s8 + $0xd8] sm:$0xff] %v1583_v12  ;;  %v1588_v14 = vpop.f32.mrb[11].mxu1  ;;  %v965_v21 = vmul.f32 %v1225_v11, %v1225_v11 }
 0x11d   : > { %v993_v15 = vadd.f32 %v992_v9, %v962_v8  ;;  %890 = vst [vmem:[%s1381_s8 + $0x48] sm:$0xff] %v690_v13  ;;  %v922_v16 = vadd.f32 %v921_v6, %v690_v13  ;;  %v963_v17 = vmul.f32 %v690_v13, %v690_v13  ;;  %906 = vst [vmem:[%s1381_s8 + $0xc8] sm:$0xff] %v1588_v14 }
 0x11f   : > { %v923_v19 = vadd.f32 %v1224_v1, %v922_v16  ;;  %v994_v20 = vadd.f32 %v993_v15, %v963_v17  ;;  %v975_v1 = vmul.f32 %v1568_v57, %v1568_v57  ;;  %v979_v15 = vmul.f32 %v1588_v14, %v1588_v14 }
 0x121   : > { %v995_v22 = vadd.f32 %v994_v20, %v964_v18  ;;  %v1228_v23 = vpop.f32.mrb[12].mxu0  ;;  %v924_v24 = vadd.f32 %v1225_v11, %v923_v19  ;;  %v1593_v7 = vpop.f32.mrb[12].mxu1 }
 0x122   : > { %895 = vst [vmem:[%s1381_s8 + $0x70] sm:$0xff] %v1228_v23  ;;  %v703_v25 = vpop.f32.mrb[13].mxu0  ;;  %911 = vst [vmem:[%s1381_s8 + $0xf0] sm:$0xff] %v1593_v7  ;;  %v767_v26 = vpop.f32.mrb[13].mxu1  ;;  %v968_v41 = vmul.f32 %v1228_v23, %v1228_v23 }
 0x123   : > { %893 = vst [vmem:[%s1381_s8 + $0x60] sm:$0xff] %v703_v25  ;;  %v925_v27 = vadd.f32 %v924_v24, %v703_v25  ;;  %v966_v28 = vmul.f32 %v703_v25, %v703_v25  ;;  %v996_v29 = vadd.f32 %v995_v22, %v965_v21  ;;  %v1229_v10 = vpop.f32.mrb[14].mxu0  ;;  %909 = vst [vmem:[%s1381_s8 + $0xe0] sm:$0xff] %v767_v26  ;;  %v1245_v31 = vpop.f32.mrb[14].mxu1 }
 0x124   : > { %896 = vst [vmem:[%s1381_s8 + $0x78] sm:$0xff] %v1229_v10  ;;  %v706_v33 = vpop.f32.mrb[15].mxu0  ;;  %912 = vst [vmem:[%s1381_s8 + $0xf8] sm:$0xff] %v1245_v31  ;;  %v770_v35 = vpop.f32.mrb[15].mxu1  ;;  %v969_v44 = vmul.f32 %v1229_v10, %v1229_v10 }
 0x125   : > { %v997_v37 = vadd.f32 %v996_v29, %v966_v28  ;;  %894 = vst [vmem:[%s1381_s8 + $0x68] sm:$0xff] %v706_v33  ;;  %v926_v38 = vadd.f32 %v925_v27, %v706_v33  ;;  %v967_v39 = vmul.f32 %v706_v33, %v706_v33  ;;  %910 = vst [vmem:[%s1381_s8 + $0xe8] sm:$0xff] %v770_v35 }
 0x126   : > { %v983_v24 = vmul.f32 %v770_v35, %v770_v35 }
 0x127   : > { %v927_v42 = vadd.f32 %v1228_v23, %v926_v38  ;;  %v998_v43 = vadd.f32 %v997_v37, %v967_v39 }
 0x129   : > { %v999_v45 = vadd.f32 %v998_v43, %v968_v41  ;;  %v928_v46 = vadd.f32 %v1229_v10, %v927_v42 }
 0x12b   : > { %v929_v50 = vadd.f32 %v928_v46, %v1538_v32  ;;  %v1000_v52 = vadd.f32 %v999_v45, %v969_v44  ;;  %v974_v32 = vmul.f32 %v1558_v51, %v1558_v51  ;;  %v953_v46 = vld [vmem:[#allocation4] sm:$0x1] }
 0x12d   : > { %v1001_v47 = vadd.f32 %v1000_v52, %v970_v48  ;;  %v930_v53 = vadd.f32 %v929_v50, %v1548_v36 }
 0x12f   : > { %v931_v59 = vadd.f32 %v1533_v30, %v930_v53  ;;  %v1002_v60 = vadd.f32 %v1001_v47, %v971_v54  ;;  %v976_v30 = vmul.f32 %v1553_v49, %v1553_v49 }
 0x131   : > { %v1003_v62 = vadd.f32 %v1002_v60, %v972_v56  ;;  %v932_v63 = vadd.f32 %v1543_v34, %v931_v59  ;;  %v977_v34 = vmul.f32 %v1563_v55, %v1563_v55 }
 0x133   : > { %v933_v0 = vadd.f32 %v932_v63, %v1558_v51  ;;  %v1004_v40 = vadd.f32 %v1003_v62, %v973_v61  ;;  %v978_v51 = vmul.f32 %v1578_v5, %v1578_v5 }
 0x135   : > { %v1005_v58 = vadd.f32 %v1004_v40, %v974_v32  ;;  %v934_v36 = vadd.f32 %v933_v0, %v1568_v57 }
 0x137   : > { %v935_v2 = vadd.f32 %v1553_v49, %v934_v36  ;;  %v1006_v4 = vadd.f32 %v1005_v58, %v975_v1  ;;  %v980_v49 = vmul.f32 %v1573_v3, %v1573_v3 }
 0x139   : > { %v1007_v6 = vadd.f32 %v1006_v4, %v976_v30  ;;  %v936_v8 = vadd.f32 %v1563_v55, %v935_v2  ;;  %v981_v55 = vmul.f32 %v1583_v12, %v1583_v12 }
 0x13b   : > { %v937_v9 = vadd.f32 %v936_v8, %v1578_v5  ;;  %v1008_v11 = vadd.f32 %v1007_v6, %v977_v34  ;;  %v982_v5 = vmul.f32 %v767_v26, %v767_v26 }
 0x13d   : > { %v1009_v13 = vadd.f32 %v1008_v11, %v978_v51  ;;  %v938_v57 = vadd.f32 %v937_v9, %v1588_v14  ;;  %v984_v14 = vmul.f32 %v1593_v7, %v1593_v7 }
 0x13f   : > { %v939_v16 = vadd.f32 %v1573_v3, %v938_v57  ;;  %v1010_v17 = vadd.f32 %v1009_v13, %v979_v15  ;;  %v985_v3 = vmul.f32 %v1245_v31, %v1245_v31 }
 0x141   : > { %v1011_v18 = vadd.f32 %v1010_v17, %v980_v49  ;;  %v940_v19 = vadd.f32 %v1583_v12, %v939_v16 }
 0x143   : > { %v941_v20 = vadd.f32 %v940_v19, %v767_v26  ;;  %v1012_v21 = vadd.f32 %v1011_v18, %v981_v55 }
 0x145   : > { %v1013_v22 = vadd.f32 %v1012_v21, %v982_v5  ;;  %v942_v23 = vadd.f32 %v941_v20, %v770_v35  ;;  %v913_v35 = vld [vmem:[#allocation3] sm:$0x1] }
 0x147   : > { %v943_v25 = vadd.f32 %v1593_v7, %v942_v23  ;;  %v1014_v27 = vadd.f32 %v1013_v22, %v983_v24 }
 0x149   : > { %v944_v28 = vadd.f32 %v1245_v31, %v943_v25  ;;  %v1015_v29 = vadd.f32 %v1014_v27, %v984_v14 }
 0x14b   : > { %v945_v10 = vrot.slane %v944_v28, 4  ;;  %v1016_v33 = vadd.f32 %v1015_v29, %v985_v3 }
 0x14d   : > { %v946_v37 = vadd.f32 %v945_v10, %v944_v28  ;;  %v1017_v38 = vrot.slane %v1016_v33, 4 }
 0x14f   : > { %v947_v12 = vrot.slane %v946_v37, 2  ;;  %v1018_v39 = vadd.f32 %v1017_v38, %v1016_v33 }
 0x151   : > { %v948_v26 = vadd.f32 %v947_v12, %v946_v37  ;;  %v1019_v41 = vrot.slane %v1018_v39, 2 }
 0x153   : > { %v949_v42 = vrot.slane %v948_v26, 1  ;;  %v1020_v43 = vadd.f32 %v1019_v41, %v1018_v39 }
 0x155   : > { %v950_v44 = vadd.f32 %v949_v42, %v948_v26  ;;  %v1021_v45 = vrot.slane %v1020_v43, 1 }
 0x157   : > { %v951_v48 = vadd.f32 %v950_v44, %v913_v35  ;;  %v1022_v7 = vadd.f32 %v1021_v45, %v1020_v43 }
 0x159   : > { %952 = vst [vmem:[#allocation3] sm:$0x1] %v951_v48  ;;  %v1023_v50 = vadd.f32 %v1022_v7, %v953_v46 }
 0x15b   : > { %1024 = vst [vmem:[#allocation4] sm:$0x1] %v1023_v50 }
 0x160   : > { %v1025_v31 = vld [vmem:[#allocation3] sm:$0x1] }
 0x161   : > { %1026 = vst [vmem:[%s1663_s5] sm:$0x1] %v1025_v31 }
 0x162   : > { %v1027_v52 = vld [vmem:[#allocation4] sm:$0x1] }
 0x163   : > { %1028 = vst [vmem:[%s1664_s6] sm:$0x1] %v1027_v52 }
 0x164 PF: > { %s17_s23 = sadd.s32 1, %s1317_s23   ;;  %s1665_s21 = smov %s1313_s22 }
 0x165   : > { %p14_p6 = scmp.ge.s32.totalorder %s17_s23, 4   ;;  %s1666_s22 = smov %s1668_s24 }
 0x167   :  { %16 = sbr.rel (!%p14_p6) target bundleno = 2 (0x2), region = 103 }

// kernel: _forward_impl.7
= control target key start
LH: loop header
LB: loop body
LE: loop exit
PB: predicated region body
PF: predicated region fallthrough
CT: control target
= control target key end

     0   :  { %s2236_s15 = smov 0   ;;  %s2238_s16 = smov 0   ;;  %s2766_s0 = inlined_call_operand.vmem [shape: bf16[512,1152], index: 0, kind: input, shape index: {}]   ;;  %s2767_s1 = inlined_call_operand.vmem [shape: bf16[1152,128], index: 1, kind: input, shape index: {}]   ;;  %s2768_s2 = inlined_call_operand.vmem [shape: f32[512,128], index: 2, kind: output, shape index: {0}]   ;;  %s2769_s3 = inlined_call_operand.vmem [shape: f32[1,128], index: 3, kind: output, shape index: {1}]   ;;  %s2770_s4 = inlined_call_operand.vmem [shape: f32[1,128], index: 4, kind: output, shape index: {2}]  }
   0x1   :  { %s2240_s17 = smov 0   ;;  %s2242_s18 = smov 0  }
   0x2   :  { %s2244_s19 = smov 0   ;;  %s2246_s20 = smov 0  }
   0x3   :  { %s2248_s21 = smov 0  }
   0x4 LB: > { %s24_s22 = sadd.s32 1, %s2199_s19  ;;  %s27_s23 = sadd.s32 1, %s2203_s20  ;;  %s2207_s21 = sphi %s2248_s21, %s15_s21   ;;  %s2203_s20 = sphi %s2246_s20, %s2776_s20   ;;  %s2199_s19 = sphi %s2244_s19, %s2775_s19   ;;  %s2195_s18 = sphi %s2242_s18, %s2774_s18   ;;  %s2191_s17 = sphi %s2240_s17, %s2773_s17   ;;  %s2187_s16 = sphi %s2238_s16, %s2772_s16   ;;  %s2183_s15 = sphi %s2236_s15, %s2771_s15  }
   0x5   : > { %p25_p0 = scmp.ge.s32.totalorder %s24_s22, 3  ;;  %p43_p1 = scmp.ne.s32.totalorder %s2187_s16, %s2183_s15 }
   0x6   : > { %p44_p2 = scmp.eq.s32.totalorder %s2207_s21, 0  ;;  %s36_s27 = sadd.s32 1, %s2187_s16 }
   0x7   : > { %s2778_s22 = smov (%p25_p0, %s24_s22), 0  ;;  %s2780_s23 = smov (!%p25_p0, %s27_s23), %s2203_s20 }
   0x8   : > { %p45_p3 = por %p44_p2, %p43_p1  ;;  %p29_p4 = scmp.ge.s32.totalorder %s2780_s23, 2 }
   0x9   : > { %s32_s24 = ssub.s32 %s2199_s19, %s2778_s22  ;;  %p1656_p6 = scmp.ge.s32.totalorder %s2207_s21, 6 }
   0xa   : > { %s2782_s23 = smov (%p29_p4, %s2780_s23), 0 }
   0xb   : > { %s31_s25 = ssub.s32 %s2203_s20, %s2782_s23  ;;  %163 = sbr.rel (%p1656_p6) target bundleno = 64 (0x40), region = 16 }
   0xc   : > { %s33_s26 = sor.u32 %s32_s24, %s31_s25 }
   0xd   : > { %p34_p5 = scmp.eq.s32.totalorder %s33_s26, 0 }
   0xf   : > { %s2287_s28 = scalar_select %p34_p5, %s2187_s16, %s36_s27  }
  0x12   : > { %166 = sbr.rel (!%p45_p3) target bundleno = 64 (0x40), region = 20  ;;  %s168_s29 = sand.u32 (%p45_p3), 1, %s2187_s16  }
  0x13   : > { %s172_s30 = smul.u32 (%p45_p3), 3, %s2199_s19 }
  0x14   : > { %s2004_s5 = smul.u32 (%p45_p3), 384, %s168_s29 }
  0x15   : > { %s2005_s6 = smul.u32 (%p45_p3), 288, %s2203_s20 }
  0x16   : > { %s2301_s12 = scalar_lea.vmem (%p45_p3), [#allocation5], %s2004_s5 }
  0x17   : > { %s174_s7 = sadd.s32 (%p45_p3), %s2005_s6, %s172_s30 }
  0x18   : > { %s1659_s8 = sshll.u32 (%p45_p3), %s174_s7, 2 }
  0x19   : > { %s2296_s11 = scalar_lea.vmem %s2766_s0, %s1659_s8 }
  0x1a   : > { %v191_v0 = vld [vmem:[%s2296_s11] sm:$0xff]  ;;  %v195_v2 = vld [vmem:[%s2296_s11 + $0x48] sm:$0xff]  ;;  %v199_v4 = vld [vmem:[%s2296_s11 + $0x90] sm:$0xff] }
  0x1b   : > { %v193_v1 = vld [vmem:[%s2296_s11 + $0x24] sm:$0xff]  ;;  %192 = vst [vmem:[%s2301_s12] sm:$0xff] %v191_v0  ;;  %196 = vst [vmem:[%s2301_s12 + $0x18] sm:$0xff] %v195_v2  ;;  %v197_v3 = vld [vmem:[%s2296_s11 + $0x6c] sm:$0xff] }
  0x1c   : > { %194 = vst [vmem:[%s2301_s12 + $0xc] sm:$0xff] %v193_v1  ;;  %v201_v5 = vld [vmem:[%s2296_s11 + $0xb4] sm:$0xff]  ;;  %198 = vst [vmem:[%s2301_s12 + $0x24] sm:$0xff] %v197_v3  ;;  %v205_v7 = vld [vmem:[%s2296_s11 + $0xfc] sm:$0xff] }
  0x1d   : > { %200 = vst [vmem:[%s2301_s12 + $0x30] sm:$0xff] %v199_v4  ;;  %202 = vst [vmem:[%s2301_s12 + $0x3c] sm:$0xff] %v201_v5  ;;  %v203_v6 = vld [vmem:[%s2296_s11 + $0xd8] sm:$0xff]  ;;  %v207_v8 = vld [vmem:[%s2296_s11 + $0x120] sm:$0xff] }
  0x1e   : > { %204 = vst [vmem:[%s2301_s12 + $0x48] sm:$0xff] %v203_v6  ;;  %206 = vst [vmem:[%s2301_s12 + $0x54] sm:$0xff] %v205_v7  ;;  %v209_v9 = vld [vmem:[%s2296_s11 + $0x144] sm:$0xff]  ;;  %v213_v11 = vld [vmem:[%s2296_s11 + $0x18c] sm:$0xff] }
  0x1f   : > { %208 = vst [vmem:[%s2301_s12 + $0x60] sm:$0xff] %v207_v8  ;;  %v211_v10 = vld [vmem:[%s2296_s11 + $0x168] sm:$0xff]  ;;  %210 = vst [vmem:[%s2301_s12 + $0x6c] sm:$0xff] %v209_v9  ;;  %v215_v12 = vld [vmem:[%s2296_s11 + $0x1b0] sm:$0xff] }
  0x20   : > { %212 = vst [vmem:[%s2301_s12 + $0x78] sm:$0xff] %v211_v10  ;;  %214 = vst [vmem:[%s2301_s12 + $0x84] sm:$0xff] %v213_v11  ;;  %v217_v13 = vld [vmem:[%s2296_s11 + $0x1d4] sm:$0xff]  ;;  %v221_v15 = vld [vmem:[%s2296_s11 + $0x21c] sm:$0xff] }
  0x21   : > { %v219_v14 = vld [vmem:[%s2296_s11 + $0x1f8] sm:$0xff]  ;;  %216 = vst [vmem:[%s2301_s12 + $0x90] sm:$0xff] %v215_v12  ;;  %218 = vst [vmem:[%s2301_s12 + $0x9c] sm:$0xff] %v217_v13  ;;  %v223_v16 = vld [vmem:[%s2296_s11 + $0x240] sm:$0xff] }
  0x22   : > { %220 = vst [vmem:[%s2301_s12 + $0xa8] sm:$0xff] %v219_v14  ;;  %v225_v17 = vld [vmem:[%s2296_s11 + $0x264] sm:$0xff]  ;;  %222 = vst [vmem:[%s2301_s12 + $0xb4] sm:$0xff] %v221_v15  ;;  %v229_v19 = vld [vmem:[%s2296_s11 + $0x2ac] sm:$0xff] }
  0x23   : > { %224 = vst [vmem:[%s2301_s12 + $0xc0] sm:$0xff] %v223_v16  ;;  %226 = vst [vmem:[%s2301_s12 + $0xcc] sm:$0xff] %v225_v17  ;;  %v227_v18 = vld [vmem:[%s2296_s11 + $0x288] sm:$0xff]  ;;  %v231_v20 = vld [vmem:[%s2296_s11 + $0x2d0] sm:$0xff] }
  0x24   : > { %228 = vst [vmem:[%s2301_s12 + $0xd8] sm:$0xff] %v227_v18  ;;  %230 = vst [vmem:[%s2301_s12 + $0xe4] sm:$0xff] %v229_v19  ;;  %v233_v21 = vld [vmem:[%s2296_s11 + $0x2f4] sm:$0xff]  ;;  %v237_v23 = vld [vmem:[%s2296_s11 + $0x33c] sm:$0xff] }
  0x25   : > { %232 = vst [vmem:[%s2301_s12 + $0xf0] sm:$0xff] %v231_v20  ;;  %v235_v22 = vld [vmem:[%s2296_s11 + $0x318] sm:$0xff]  ;;  %234 = vst [vmem:[%s2301_s12 + $0xfc] sm:$0xff] %v233_v21  ;;  %v239_v24 = vld [vmem:[%s2296_s11 + $0x360] sm:$0xff] }
  0x26   : > { %236 = vst [vmem:[%s2301_s12 + $0x108] sm:$0xff] %v235_v22  ;;  %238 = vst [vmem:[%s2301_s12 + $0x114] sm:$0xff] %v237_v23  ;;  %v241_v25 = vld [vmem:[%s2296_s11 + $0x384] sm:$0xff]  ;;  %v245_v27 = vld [vmem:[%s2296_s11 + $0x3cc] sm:$0xff] }
  0x27   : > { %v243_v26 = vld [vmem:[%s2296_s11 + $0x3a8] sm:$0xff]  ;;  %240 = vst [vmem:[%s2301_s12 + $0x120] sm:$0xff] %v239_v24  ;;  %242 = vst [vmem:[%s2301_s12 + $0x12c] sm:$0xff] %v241_v25  ;;  %v247_v28 = vld [vmem:[%s2296_s11 + $0x3f0] sm:$0xff] }
  0x28   : > { %244 = vst [vmem:[%s2301_s12 + $0x138] sm:$0xff] %v243_v26  ;;  %v249_v29 = vld [vmem:[%s2296_s11 + $0x414] sm:$0xff]  ;;  %246 = vst [vmem:[%s2301_s12 + $0x144] sm:$0xff] %v245_v27  ;;  %v253_v31 = vld [vmem:[%s2296_s11 + $0x45c] sm:$0xff] }
  0x29   : > { %248 = vst [vmem:[%s2301_s12 + $0x150] sm:$0xff] %v247_v28  ;;  %250 = vst [vmem:[%s2301_s12 + $0x15c] sm:$0xff] %v249_v29  ;;  %v251_v30 = vld [vmem:[%s2296_s11 + $0x438] sm:$0xff]  ;;  %v1660_v32 = vld [vmem:[%s2296_s11 + $0x8] sm:$0xf] }
  0x2a   : > { %252 = vst [vmem:[%s2301_s12 + $0x168] sm:$0xff] %v251_v30  ;;  %254 = vst [vmem:[%s2301_s12 + $0x174] sm:$0xff] %v253_v31  ;;  %v1662_v33 = vld [vmem:[%s2296_s11 + $0x2c] sm:$0xf]  ;;  %v1664_v34 = vld [vmem:[%s2296_s11 + $0x50] sm:$0xf] }
  0x2b   : > { %1661 = vst [vmem:[%s2301_s12 + $0x8] sm:$0xf] %v1660_v32  ;;  %v1666_v35 = vld [vmem:[%s2296_s11 + $0x74] sm:$0xf]  ;;  %1663 = vst [vmem:[%s2301_s12 + $0x14] sm:$0xf] %v1662_v33 }
  0x2c   : > { %1665 = vst [vmem:[%s2301_s12 + $0x20] sm:$0xf] %v1664_v34  ;;  %1667 = vst [vmem:[%s2301_s12 + $0x2c] sm:$0xf] %v1666_v35  ;;  %v1668_v36 = vld [vmem:[%s2296_s11 + $0x98] sm:$0xf] }
  0x2d   : > { %v1670_v37 = vld [vmem:[%s2296_s11 + $0xbc] sm:$0xf]  ;;  %v1672_v38 = vld [vmem:[%s2296_s11 + $0xe0] sm:$0xf]  ;;  %1669 = vst [vmem:[%s2301_s12 + $0x38] sm:$0xf] %v1668_v36 }
  0x2e   : > { %1671 = vst [vmem:[%s2301_s12 + $0x44] sm:$0xf] %v1670_v37  ;;  %1673 = vst [vmem:[%s2301_s12 + $0x50] sm:$0xf] %v1672_v38  ;;  %v1674_v39 = vld [vmem:[%s2296_s11 + $0x104] sm:$0xf] }
  0x2f   : > { %v1676_v40 = vld [vmem:[%s2296_s11 + $0x128] sm:$0xf]  ;;  %v1678_v41 = vld [vmem:[%s2296_s11 + $0x14c] sm:$0xf]  ;;  %1675 = vst [vmem:[%s2301_s12 + $0x5c] sm:$0xf] %v1674_v39 }
  0x30   : > { %1677 = vst [vmem:[%s2301_s12 + $0x68] sm:$0xf] %v1676_v40  ;;  %1679 = vst [vmem:[%s2301_s12 + $0x74] sm:$0xf] %v1678_v41  ;;  %v1680_v42 = vld [vmem:[%s2296_s11 + $0x170] sm:$0xf] }
  0x31   : > { %v1682_v43 = vld [vmem:[%s2296_s11 + $0x194] sm:$0xf]  ;;  %v1684_v44 = vld [vmem:[%s2296_s11 + $0x1b8] sm:$0xf]  ;;  %1681 = vst [vmem:[%s2301_s12 + $0x80] sm:$0xf] %v1680_v42 }
  0x32   : > { %1683 = vst [vmem:[%s2301_s12 + $0x8c] sm:$0xf] %v1682_v43  ;;  %1685 = vst [vmem:[%s2301_s12 + $0x98] sm:$0xf] %v1684_v44  ;;  %v1686_v45 = vld [vmem:[%s2296_s11 + $0x1dc] sm:$0xf] }
  0x33   : > { %v1688_v46 = vld [vmem:[%s2296_s11 + $0x200] sm:$0xf]  ;;  %v1690_v47 = vld [vmem:[%s2296_s11 + $0x224] sm:$0xf]  ;;  %1687 = vst [vmem:[%s2301_s12 + $0xa4] sm:$0xf] %v1686_v45 }
  0x34   : > { %1689 = vst [vmem:[%s2301_s12 + $0xb0] sm:$0xf] %v1688_v46  ;;  %1691 = vst [vmem:[%s2301_s12 + $0xbc] sm:$0xf] %v1690_v47  ;;  %v1692_v48 = vld [vmem:[%s2296_s11 + $0x248] sm:$0xf] }
  0x35   : > { %v1694_v49 = vld [vmem:[%s2296_s11 + $0x26c] sm:$0xf]  ;;  %v1696_v50 = vld [vmem:[%s2296_s11 + $0x290] sm:$0xf]  ;;  %1693 = vst [vmem:[%s2301_s12 + $0xc8] sm:$0xf] %v1692_v48 }
  0x36   : > { %1695 = vst [vmem:[%s2301_s12 + $0xd4] sm:$0xf] %v1694_v49  ;;  %1697 = vst [vmem:[%s2301_s12 + $0xe0] sm:$0xf] %v1696_v50  ;;  %v1698_v51 = vld [vmem:[%s2296_s11 + $0x2b4] sm:$0xf] }
  0x37   : > { %v1700_v52 = vld [vmem:[%s2296_s11 + $0x2d8] sm:$0xf]  ;;  %v1702_v53 = vld [vmem:[%s2296_s11 + $0x2fc] sm:$0xf]  ;;  %1699 = vst [vmem:[%s2301_s12 + $0xec] sm:$0xf] %v1698_v51 }
  0x38   : > { %1701 = vst [vmem:[%s2301_s12 + $0xf8] sm:$0xf] %v1700_v52  ;;  %1703 = vst [vmem:[%s2301_s12 + $0x104] sm:$0xf] %v1702_v53  ;;  %v1704_v54 = vld [vmem:[%s2296_s11 + $0x320] sm:$0xf] }
  0x39   : > { %v1706_v55 = vld [vmem:[%s2296_s11 + $0x344] sm:$0xf]  ;;  %v1708_v56 = vld [vmem:[%s2296_s11 + $0x368] sm:$0xf]  ;;  %1705 = vst [vmem:[%s2301_s12 + $0x110] sm:$0xf] %v1704_v54 }
  0x3a   : > { %1707 = vst [vmem:[%s2301_s12 + $0x11c] sm:$0xf] %v1706_v55  ;;  %1709 = vst [vmem:[%s2301_s12 + $0x128] sm:$0xf] %v1708_v56  ;;  %v1710_v57 = vld [vmem:[%s2296_s11 + $0x38c] sm:$0xf] }
  0x3b   : > { %v1712_v58 = vld [vmem:[%s2296_s11 + $0x3b0] sm:$0xf]  ;;  %v1714_v59 = vld [vmem:[%s2296_s11 + $0x3d4] sm:$0xf]  ;;  %1711 = vst [vmem:[%s2301_s12 + $0x134] sm:$0xf] %v1710_v57 }
  0x3c   : > { %1713 = vst [vmem:[%s2301_s12 + $0x140] sm:$0xf] %v1712_v58  ;;  %1715 = vst [vmem:[%s2301_s12 + $0x14c] sm:$0xf] %v1714_v59  ;;  %v1716_v60 = vld [vmem:[%s2296_s11 + $0x3f8] sm:$0xf] }
  0x3d   : > { %v1718_v61 = vld [vmem:[%s2296_s11 + $0x41c] sm:$0xf]  ;;  %v1720_v62 = vld [vmem:[%s2296_s11 + $0x440] sm:$0xf]  ;;  %1717 = vst [vmem:[%s2301_s12 + $0x158] sm:$0xf] %v1716_v60 }
  0x3e   : > { %1719 = vst [vmem:[%s2301_s12 + $0x164] sm:$0xf] %v1718_v61  ;;  %1721 = vst [vmem:[%s2301_s12 + $0x170] sm:$0xf] %v1720_v62  ;;  %v1722_v63 = vld [vmem:[%s2296_s11 + $0x464] sm:$0xf] }
  0x3f   : > { %1723 = vst [vmem:[%s2301_s12 + $0x17c] sm:$0xf] %v1722_v63 }
  0x40 PF: > { %p1724_p7 = scmp.ge.s32.totalorder %s2207_s21, 1  ;;  %p339_p8 = scmp.lt.s32.totalorder %s2207_s21, 7 }
  0x42   : > { %p340_p9 = pnand %p1724_p7, %p339_p8 }
  0x43   : > { %s346_s13 = sand.u32 (!%p340_p9), 1, %s2183_s15   ;;  %s378_s14 = smul.u32 (!%p340_p9), 48, %s2191_s17 }
  0x44   : > { %343 = sbr.rel (%p340_p9) target bundleno = 529 (0x211), region = 50  ;;  %s1726_s25 = sshll.u32 (!%p340_p9), %s2195_s18, 5 }
  0x45   : > { %s2006_s24 = smul.u32 (!%p340_p9), 384, %s346_s13  ;;  %p379_p10 = scmp.lt.s32.totalorder (!%p340_p9), %s378_s14, 143 }
  0x46   : > { %p385_p11 = scmp.lt.s32.totalorder (!%p340_p9), %s1726_s25, 63  ;;  %p391_p12 = scmp.eq.s32.totalorder (!%p340_p9), %s2195_s18, 0 }
  0x47   : > { %p392_p13 = scmp.eq.s32.totalorder (!%p340_p9), %s2191_s17, 0  ;;  %s2445_s8 = scalar_lea.vmem (!%p340_p9), [#allocation5], %s2006_s24 }
  0x49   : > { %p393_p0 = pnand (!%p340_p9), %p392_p13, %p391_p12 }
  0x4b   : > { %s2784_s14 = smov (!%p379_p10, %s378_s14), 143  ;;  %s2786_s25 = smov (!%p385_p11, %s1726_s25), 63 }
  0x4c   : > { %s1725_s26 = sshll.u32 %s2784_s14, 2  ;;  %s1727_s5 = sshll.u32 %s2786_s25, 3  ;;  %v2209_v0 = vmov (!%p393_p0), 0.0  }
  0x4d   : > { %s2438_s30 = scalar_lea.vmem %s2767_s1, %s1725_s26  ;;  %s2443_s15 = scalar_lea.vmem %s2768_s2, %s1727_s5  ;;  %397 = vst [vmem:[#allocation3] sm:$0x1] (!%p393_p0), %v2209_v0  ;;  %398 = vst [vmem:[#allocation4] sm:$0x1] (!%p393_p0), %v2209_v0 }
  0x4e   : > { %396 = sbr.rel (%p393_p0) target bundleno = 85 (0x55), region = 58 }
  0x55 PF: > { %p1728_p1 = scmp.ne.s32.totalorder %s2191_s17, 0 }
  0x56   : > { %v2210_v1 = vmov (!%p1728_p1), 0.0  }
  0x57   : > { %401 = sbr.rel (%p1728_p1) target bundleno = 103 (0x67), region = 62  ;;  %402 = vst [vmem:[#allocation2] sm:$0xff] (!%p1728_p1), %v2210_v1  ;;  %403 = vst [vmem:[#allocation2 + $0x8] sm:$0xff] (!%p1728_p1), %v2210_v1 }
  0x58   : > { %404 = vst [vmem:[#allocation2 + $0x10] sm:$0xff] (!%p1728_p1), %v2210_v1  ;;  %405 = vst [vmem:[#allocation2 + $0x18] sm:$0xff] (!%p1728_p1), %v2210_v1 }
  0x59   : > { %406 = vst [vmem:[#allocation2 + $0x20] sm:$0xff] (!%p1728_p1), %v2210_v1  ;;  %407 = vst [vmem:[#allocation2 + $0x28] sm:$0xff] (!%p1728_p1), %v2210_v1 }
  0x5a   : > { %408 = vst [vmem:[#allocation2 + $0x30] sm:$0xff] (!%p1728_p1), %v2210_v1  ;;  %409 = vst [vmem:[#allocation2 + $0x38] sm:$0xff] (!%p1728_p1), %v2210_v1 }
  0x5b   : > { %410 = vst [vmem:[#allocation2 + $0x40] sm:$0xff] (!%p1728_p1), %v2210_v1  ;;  %411 = vst [vmem:[#allocation2 + $0x48] sm:$0xff] (!%p1728_p1), %v2210_v1 }
  0x5c   : > { %412 = vst [vmem:[#allocation2 + $0x50] sm:$0xff] (!%p1728_p1), %v2210_v1  ;;  %413 = vst [vmem:[#allocation2 + $0x58] sm:$0xff] (!%p1728_p1), %v2210_v1 }
  0x5d   : > { %414 = vst [vmem:[#allocation2 + $0x60] sm:$0xff] (!%p1728_p1), %v2210_v1  ;;  %415 = vst [vmem:[#allocation2 + $0x68] sm:$0xff] (!%p1728_p1), %v2210_v1 }
  0x5e   : > { %416 = vst [vmem:[#allocation2 + $0x70] sm:$0xff] %v2210_v1  ;;  %417 = vst [vmem:[#allocation2 + $0x78] sm:$0xff] %v2210_v1 }
  0x5f   : > { %418 = vst [vmem:[#allocation2 + $0x80] sm:$0xff] %v2210_v1  ;;  %419 = vst [vmem:[#allocation2 + $0x88] sm:$0xff] %v2210_v1 }
  0x60   : > { %420 = vst [vmem:[#allocation2 + $0x90] sm:$0xff] %v2210_v1  ;;  %421 = vst [vmem:[#allocation2 + $0x98] sm:$0xff] %v2210_v1 }
  0x61   : > { %422 = vst [vmem:[#allocation2 + $0xa0] sm:$0xff] %v2210_v1  ;;  %423 = vst [vmem:[#allocation2 + $0xa8] sm:$0xff] %v2210_v1 }
  0x62   : > { %424 = vst [vmem:[#allocation2 + $0xb0] sm:$0xff] %v2210_v1  ;;  %425 = vst [vmem:[#allocation2 + $0xb8] sm:$0xff] %v2210_v1 }
  0x63   : > { %426 = vst [vmem:[#allocation2 + $0xc0] sm:$0xff] %v2210_v1  ;;  %427 = vst [vmem:[#allocation2 + $0xc8] sm:$0xff] %v2210_v1 }
  0x64   : > { %428 = vst [vmem:[#allocation2 + $0xd0] sm:$0xff] %v2210_v1  ;;  %429 = vst [vmem:[#allocation2 + $0xd8] sm:$0xff] %v2210_v1 }
  0x65   : > { %430 = vst [vmem:[#allocation2 + $0xe0] sm:$0xff] %v2210_v1  ;;  %431 = vst [vmem:[#allocation2 + $0xe8] sm:$0xff] %v2210_v1 }
  0x66   : > { %432 = vst [vmem:[#allocation2 + $0xf0] sm:$0xff] %v2210_v1  ;;  %433 = vst [vmem:[#allocation2 + $0xf8] sm:$0xff] %v2210_v1 }
  0x67 PF: > { %v2065_v2 = vld [vmem:[%s2438_s30 + $0x40] sm:$0xff]   ;;  %v2067_v4 = vld [vmem:[%s2438_s30 + $0x48] sm:$0xff]   ;;  %v2069_v6 = vld [vmem:[%s2438_s30 + $0x50] sm:$0xff]   ;;  %p1801_p2 = scmp.ne.s32.totalorder %s2191_s17, 2 }
  0x68   : > { %v2066_v3 = vld [vmem:[%s2438_s30] sm:$0xff]   ;;  %1804 = vmatprep.subr.bf16.mxu0 %v2065_v2  ;;  %1988 = vmatprep.subr.bf16.mxu1 %v2065_v2  ;;  %v2068_v5 = vld [vmem:[%s2438_s30 + $0x8] sm:$0xff]   ;;  %v2070_v7 = vld [vmem:[%s2438_s30 + $0x10] sm:$0xff]  }
  0x69   : > { %1805 = vmatpush3.bf16.msra.mxu0 %v2066_v3  ;;  %1996 = vmatpush3.bf16.msra.mxu1 %v2066_v3  ;;  %v2071_v8 = vld [vmem:[%s2438_s30 + $0x58] sm:$0xff]   ;;  %v2073_v10 = vld [vmem:[%s2438_s30 + $0x60] sm:$0xff]   ;;  %v2075_v12 = vld [vmem:[%s2438_s30 + $0x68] sm:$0xff]  }
  0x6a   : > { %1806 = vmatprep.subr.bf16.mxu0 %v2067_v4  ;;  %1989 = vmatprep.subr.bf16.mxu1 %v2067_v4  ;;  %v2072_v9 = vld [vmem:[%s2438_s30 + $0x18] sm:$0xff]   ;;  %v2074_v11 = vld [vmem:[%s2438_s30 + $0x20] sm:$0xff]   ;;  %v2076_v15 = vld [vmem:[%s2438_s30 + $0x28] sm:$0xff]  }
  0x6b   : > { %v2083_v13 = vld [vmem:[%s2445_s8 + $0x4] ss:$12 sps:$4 sm:$0xff]   ;;  %v2079_v18 = vld [vmem:[%s2438_s30 + $0x78] sm:$0xff]   ;;  %v2081_v21 = vld [vmem:[%s2445_s8] ss:$12 sps:$4 sm:$0xff]  }
  0x6c   : > { %v2086_v14 = vld [vmem:[%s2445_s8 + $0x124] ss:$12 sps:$4 sm:$0xff]   ;;  %1010 = vmatprep.mubr.bf16.mxu0 %v2083_v13  ;;  %v2080_v19 = vld [vmem:[%s2438_s30 + $0x38] sm:$0xff]   ;;  %v2084_v22 = vld [vmem:[%s2445_s8 + $0x120] ss:$12 sps:$4 sm:$0xff]  }
  0x6d   : > { %1807 = vmatpush3.bf16.msra.mxu0 %v2068_v5  ;;  %1997 = vmatpush3.bf16.msra.mxu1 %v2068_v5  ;;  %v2077_v16 = vld [vmem:[%s2438_s30 + $0x70] sm:$0xff]   ;;  %v2087_v20 = vld [vmem:[%s2438_s30 + $0x80] sm:$0xff]   ;;  %v2088_v24 = vld [vmem:[%s2438_s30 + $0x88] sm:$0xff]  }
  0x6e   : > { %1808 = vmatprep.subr.bf16.mxu0 %v2069_v6  ;;  %1990 = vmatprep.subr.bf16.mxu1 %v2069_v6  ;;  %v2078_v17 = vld [vmem:[%s2438_s30 + $0x30] sm:$0xff]   ;;  %v2089_v23 = vld [vmem:[%s2445_s8 + $0x1c] ss:$12 sps:$4 sm:$0xff]   ;;  %v2093_v26 = vld [vmem:[%s2445_s8 + $0x18] ss:$12 sps:$4 sm:$0xff]  }
  0x6f   : > { %1106 = vmatprep.mubr.bf16.mxu1 %v2086_v14  ;;  %v2091_v25 = vld [vmem:[%s2445_s8 + $0x13c] ss:$12 sps:$4 sm:$0xff]   ;;  %v2095_v27 = vld [vmem:[%s2438_s30 + $0x90] sm:$0xff]   ;;  %v2094_v28 = vld [vmem:[%s2445_s8 + $0x138] ss:$12 sps:$4 sm:$0xff]  }
  0x70   : > { %v2096_v29 = vld [vmem:[%s2438_s30 + $0x98] sm:$0xff]   ;;  %v2103_v32 = vld [vmem:[%s2438_s30 + $0xa0] sm:$0xff]   ;;  %v2104_v35 = vld [vmem:[%s2438_s30 + $0xa8] sm:$0xff]  }
  0x71   : > { %1809 = vmatpush3.bf16.msra.mxu0 %v2070_v7  ;;  %1998 = vmatpush3.bf16.msra.mxu1 %v2070_v7  ;;  %v2097_v30 = vld [vmem:[%s2445_s8 + $0x34] ss:$12 sps:$4 sm:$0xff]   ;;  %v2101_v33 = vld [vmem:[%s2445_s8 + $0x30] ss:$12 sps:$4 sm:$0xff]   ;;  %v2105_v36 = vld [vmem:[%s2445_s8 + $0x4c] ss:$12 sps:$4 sm:$0xff]  }
  0x72   : > { %1810 = vmatprep.subr.bf16.mxu0 %v2071_v8  ;;  %1991 = vmatprep.subr.bf16.mxu1 %v2071_v8  ;;  %v2099_v31 = vld [vmem:[%s2445_s8 + $0x154] ss:$12 sps:$4 sm:$0xff]   ;;  %v2102_v34 = vld [vmem:[%s2445_s8 + $0x150] ss:$12 sps:$4 sm:$0xff]   ;;  %v2107_v37 = vld [vmem:[%s2445_s8 + $0x16c] ss:$12 sps:$4 sm:$0xff]  }
  0x73   : > { %v2111_v38 = vld [vmem:[%s2438_s30 + $0xb0] sm:$0xff]   ;;  %v2112_v42 = vld [vmem:[%s2438_s30 + $0xb8] sm:$0xff]  }
  0x74   : > { %v2109_v39 = vld [vmem:[%s2445_s8 + $0x48] ss:$12 sps:$4 sm:$0xff]   ;;  %v2113_v41 = vld [vmem:[%s2445_s8 + $0x64] ss:$12 sps:$4 sm:$0xff]   ;;  %v2116_v44 = vld [vmem:[%s2445_s8 + $0x60] ss:$12 sps:$4 sm:$0xff]  }
  0x75   : > { %1811 = vmatpush3.bf16.msra.mxu0 %v2072_v9  ;;  %1999 = vmatpush3.bf16.msra.mxu1 %v2072_v9  ;;  %v2110_v40 = vld [vmem:[%s2445_s8 + $0x168] ss:$12 sps:$4 sm:$0xff]   ;;  %v2117_v45 = vld [vmem:[%s2445_s8 + $0x20] ss:$12 sps:$4 sm:$0xff]   ;;  %v2120_v47 = vld [vmem:[%s2445_s8 + $0x38] ss:$12 sps:$4 sm:$0xff]  }
  0x76   : > { %1812 = vmatprep.subr.bf16.mxu0 %v2073_v10  ;;  %1992 = vmatprep.subr.bf16.mxu1 %v2073_v10  ;;  %v2115_v43 = vld [vmem:[%s2445_s8 + $0x8] ss:$12 sps:$4 sm:$0xff]   ;;  %v2121_v48 = vld [vmem:[%s2445_s8 + $0x78] ss:$12 sps:$4 sm:$0xff]   ;;  %v2122_v49 = vld [vmem:[%s2445_s8 + $0x50] ss:$12 sps:$4 sm:$0xff]  }
  0x77   : > { %v2118_v46 = vld [vmem:[%s2445_s8 + $0x7c] ss:$12 sps:$4 sm:$0xff]   ;;  %v2123_v50 = vld [vmem:[%s2445_s8 + $0x94] ss:$12 sps:$4 sm:$0xff]   ;;  %v2128_v54 = vld [vmem:[%s2445_s8 + $0xac] ss:$12 sps:$4 sm:$0xff]  }
  0x78   : > { %v2125_v51 = vld [vmem:[%s2445_s8 + $0x68] ss:$12 sps:$4 sm:$0xff]   ;;  %v2126_v52 = vld [vmem:[%s2445_s8 + $0x90] ss:$12 sps:$4 sm:$0xff]   ;;  %v2127_v53 = vld [vmem:[%s2445_s8 + $0x80] ss:$12 sps:$4 sm:$0xff]  }
  0x79   : > { %1813 = vmatpush3.bf16.msra.mxu0 %v2074_v11  ;;  %2000 = vmatpush3.bf16.msra.mxu1 %v2074_v11  ;;  %v2130_v55 = vld [vmem:[%s2445_s8 + $0x98] ss:$12 sps:$4 sm:$0xff]   ;;  %v2131_v56 = vld [vmem:[%s2445_s8 + $0xa8] ss:$12 sps:$4 sm:$0xff]   ;;  %v2132_v57 = vld [vmem:[%s2445_s8 + $0xb0] ss:$12 sps:$4 sm:$0xff]  }
  0x7a   : > { %1814 = vmatprep.subr.bf16.mxu0 %v2075_v12  ;;  %1993 = vmatprep.subr.bf16.mxu1 %v2075_v12  ;;  %v2133_v58 = vld [vmem:[%s2445_s8 + $0xc4] ss:$12 sps:$4 sm:$0xff]   ;;  %v2135_v59 = vld [vmem:[%s2445_s8 + $0xc8] ss:$12 sps:$4 sm:$0xff]   ;;  %v2136_v60 = vld [vmem:[%s2445_s8 + $0xc0] ss:$12 sps:$4 sm:$0xff]  }
  0x7b   : > { %v2137_v61 = vld [vmem:[%s2445_s8 + $0xe0] ss:$12 sps:$4 sm:$0xff]   ;;  %v2138_v62 = vld [vmem:[%s2445_s8 + $0xdc] ss:$12 sps:$4 sm:$0xff]   ;;  %v2140_v63 = vld [vmem:[%s2445_s8 + $0xf8] ss:$12 sps:$4 sm:$0xff]  }
  0x7c   : > { %v2141_v0 = vld [vmem:[%s2445_s8 + $0xd8] ss:$12 sps:$4 sm:$0xff]   ;;  %v2142_v1 = vld [vmem:[%s2445_s8 + $0x110] ss:$12 sps:$4 sm:$0xff]   ;;  %v2143_v2 = vld [vmem:[%s2445_s8 + $0xf4] ss:$12 sps:$4 sm:$0xff]  }
  0x7d   : > { %1815 = vmatpush3.bf16.msra.mxu0 %v2076_v15  ;;  %2001 = vmatpush3.bf16.msra.mxu1 %v2076_v15  ;;  %v2145_v3 = vld [vmem:[%s2445_s8 + $0x128] ss:$12 sps:$4 sm:$0xff]   ;;  %v2146_v4 = vld [vmem:[%s2445_s8 + $0xf0] ss:$12 sps:$4 sm:$0xff]   ;;  %v2147_v5 = vld [vmem:[%s2445_s8 + $0x140] ss:$12 sps:$4 sm:$0xff]  }
  0x7e   : > { %1816 = vmatprep.subr.bf16.mxu0 %v2077_v16  ;;  %1994 = vmatprep.subr.bf16.mxu1 %v2077_v16  ;;  %v2148_v6 = vld [vmem:[%s2445_s8 + $0x10c] ss:$12 sps:$4 sm:$0xff]   ;;  %v2151_v8 = vld [vmem:[%s2445_s8 + $0x108] ss:$12 sps:$4 sm:$0xff]   ;;  %v2152_v9 = vld [vmem:[%s2445_s8 + $0x170] ss:$12 sps:$4 sm:$0xff]  }
  0x7f   : > { %v2150_v7 = vld [vmem:[%s2445_s8 + $0x158] ss:$12 sps:$4 sm:$0xff]  }
  0x81   : > { %1817 = vmatpush3.bf16.msra.mxu0 %v2078_v17  ;;  %2002 = vmatpush3.bf16.msra.mxu1 %v2078_v17 }
  0x82   : > { %1818 = vmatprep.subr.bf16.mxu0 %v2079_v18  ;;  %1995 = vmatprep.subr.bf16.mxu1 %v2079_v18 }
  0x85   : > { %1819 = vmatpush3.bf16.msra.mxu0 %v2080_v19  ;;  %2003 = vmatpush3.bf16.msra.mxu1 %v2080_v19 }
  0x86   : > { %1940 = vmatprep.subr.bf16.mxu1 %v2087_v20 }
  0x88   : > { %1011 = vmatmul.mubr.bf16.vlgmr.msra.gmra.mrb[0].mxu0 %v2081_v21  ;;  %1107 = vmatmul.mubr.bf16.vlgmr.msra.gmra.mrb[0].mxu1 %v2084_v22 }
  0x89   : > { %1941 = vmatpush3.bf16.msra.mxu1 %v2087_v20  ;;  %1018 = vmatprep.mubr.bf16.mxu0 %v2089_v23 }
  0x8a   : > { %1942 = vmatprep.subr.bf16.mxu1 %v2088_v24  ;;  %1114 = vmatprep.mubr.bf16.mxu1 %v2091_v25 }
  0x8d   : > { %1943 = vmatpush3.bf16.msra.mxu1 %v2088_v24 }
  0x8e   : > { %1944 = vmatprep.subr.bf16.mxu1 %v2095_v27 }
  0x90   : > { %1019 = vmatmul.mubr.bf16.gmra.mrb[4].mxu0 %v2093_v26  ;;  %1115 = vmatmul.mubr.bf16.gmra.mrb[4].mxu1 %v2094_v28 }
  0x91   : > { %1945 = vmatpush3.bf16.msra.mxu1 %v2095_v27  ;;  %1026 = vmatprep.mubr.bf16.mxu0 %v2097_v30 }
  0x92   : > { %1946 = vmatprep.subr.bf16.mxu1 %v2096_v29  ;;  %1122 = vmatprep.mubr.bf16.mxu1 %v2099_v31 }
  0x95   : > { %1947 = vmatpush3.bf16.msra.mxu1 %v2096_v29 }
  0x96   : > { %1948 = vmatprep.subr.bf16.mxu1 %v2103_v32 }
  0x98   : > { %1027 = vmatmul.mubr.bf16.gmra.mrb[8].mxu0 %v2101_v33  ;;  %1123 = vmatmul.mubr.bf16.gmra.mrb[8].mxu1 %v2102_v34 }
  0x99   : > { %1949 = vmatpush3.bf16.msra.mxu1 %v2103_v32  ;;  %1034 = vmatprep.mubr.bf16.mxu0 %v2105_v36 }
  0x9a   : > { %1950 = vmatprep.subr.bf16.mxu1 %v2104_v35  ;;  %1130 = vmatprep.mubr.bf16.mxu1 %v2107_v37 }
  0x9d   : > { %1951 = vmatpush3.bf16.msra.mxu1 %v2104_v35 }
  0x9e   : > { %1952 = vmatprep.subr.bf16.mxu1 %v2111_v38 }
  0xa0   : > { %1035 = vmatmul.mubr.bf16.gmra.mrb[12].mxu0 %v2109_v39  ;;  %1131 = vmatmul.mubr.bf16.gmra.mrb[12].mxu1 %v2110_v40 }
  0xa1   : > { %1953 = vmatpush3.bf16.msra.mxu1 %v2111_v38  ;;  %1042 = vmatprep.mubr.bf16.mxu0 %v2113_v41 }
  0xa2   : > { %1954 = vmatprep.subr.bf16.mxu1 %v2112_v42  ;;  %1956 = vmatprep.mubr.bf16.mxu1 %v2115_v43 }
  0xa5   : > { %1955 = vmatpush3.bf16.msra.mxu1 %v2112_v42 }
  0xa8   : > { %1043 = vmatmul.mubr.bf16.gmra.mrb[16].mxu0 %v2116_v44  ;;  %1957 = vmatmul.mubr.bf16.vlgmr.msra.gmra.mrb[16].mxu1 %v2117_v45 }
  0xa9   : > { %1050 = vmatprep.mubr.bf16.mxu0 %v2118_v46  ;;  %1960 = vmatprep.mubr.bf16.mxu1 %v2120_v47 }
  0xb0   : > { %1051 = vmatmul.mubr.bf16.gmra.mrb[20].mxu0 %v2121_v48  ;;  %1961 = vmatmul.mubr.bf16.gmra.mrb[20].mxu1 %v2122_v49 }
  0xb1   : > { %1058 = vmatprep.mubr.bf16.mxu0 %v2123_v50  ;;  %1964 = vmatprep.mubr.bf16.mxu1 %v2125_v51 }
  0xb8   : > { %1059 = vmatmul.mubr.bf16.gmra.mrb[24].mxu0 %v2126_v52  ;;  %1965 = vmatmul.mubr.bf16.gmra.mrb[24].mxu1 %v2127_v53 }
  0xb9   : > { %1066 = vmatprep.mubr.bf16.mxu0 %v2128_v54  ;;  %1968 = vmatprep.mubr.bf16.mxu1 %v2130_v55 }
  0xc0   : > { %1067 = vmatmul.mubr.bf16.gmra.mrb[28].mxu0 %v2131_v56  ;;  %1969 = vmatmul.mubr.bf16.gmra.mrb[28].mxu1 %v2132_v57 }
  0xc1   : > { %1074 = vmatprep.mubr.bf16.mxu0 %v2133_v58  ;;  %1972 = vmatprep.mubr.bf16.mxu1 %v2135_v59  ;;  %v436_v59 = vld [vmem:[#allocation2 + $0x10] sm:$0xff] }
  0xc8   : > { %1075 = vmatmul.mubr.bf16.gmra.mrb[32].mxu0 %v2136_v60  ;;  %1973 = vmatmul.mubr.bf16.gmra.mrb[32].mxu1 %v2137_v61 }
  0xc9   : > { %1082 = vmatprep.mubr.bf16.mxu0 %v2138_v62  ;;  %1976 = vmatprep.mubr.bf16.mxu1 %v2140_v63  ;;  %v434_v63 = vld [vmem:[#allocation2] sm:$0xff] }
  0xd0   : > { %1083 = vmatmul.mubr.bf16.gmra.mrb[36].mxu0 %v2141_v0  ;;  %1977 = vmatmul.mubr.bf16.gmra.mrb[36].mxu1 %v2142_v1 }
  0xd1   : > { %1090 = vmatprep.mubr.bf16.mxu0 %v2143_v2  ;;  %1980 = vmatprep.mubr.bf16.mxu1 %v2145_v3 }
  0xd8   : > { %1091 = vmatmul.mubr.bf16.gmra.mrb[40].mxu0 %v2146_v4  ;;  %1981 = vmatmul.mubr.bf16.gmra.mrb[40].mxu1 %v2147_v5  ;;  %v437_v4 = vld [vmem:[#allocation2 + $0x18] sm:$0xff] }
  0xd9   : > { %1098 = vmatprep.mubr.bf16.mxu0 %v2148_v6  ;;  %1984 = vmatprep.mubr.bf16.mxu1 %v2150_v7 }
  0xe0   : > { %1099 = vmatmul.mubr.bf16.gmra.mrb[44].mxu0 %v2151_v8  ;;  %1985 = vmatmul.mubr.bf16.gmra.mrb[44].mxu1 %v2152_v9  ;;  %v435_v9 = vld [vmem:[#allocation2 + $0x8] sm:$0xff] }
 0x15b   : > { %v1820_v10 = vpop.f32.mrb[0].mxu0  ;;  %v1892_v11 = vpop.f32.mrb[0].mxu1 }
 0x15c   : > { %v1821_v12 = vpop.f32.mrb[1].mxu0  ;;  %v1893_v13 = vpop.f32.mrb[1].mxu1 }
 0x15d   : > { %v1822_v14 = vadd.f32 %v1821_v12, %v1820_v10  ;;  %v2520_v15 = vadd.f32 %v1893_v13, %v1892_v11  ;;  %v1823_v16 = vpop.f32.mrb[2].mxu0  ;;  %v1895_v17 = vpop.f32.mrb[2].mxu1 }
 0x15e   : > { %v1824_v18 = vpop.f32.mrb[3].mxu0  ;;  %v1896_v19 = vpop.f32.mrb[3].mxu1 }
 0x15f   : > { %v1825_v20 = vadd.f32 %v1824_v18, %v1823_v16  ;;  %v2522_v21 = vadd.f32 %v1896_v19, %v1895_v17  ;;  %v440_v19 = vld [vmem:[#allocation2 + $0x30] sm:$0xff] }
 0x163   : > { %v1826_v22 = vpop.f32.mrb[4].mxu0  ;;  %v1898_v23 = vpop.f32.mrb[4].mxu1 }
 0x164   : > { %v1827_v24 = vpop.f32.mrb[5].mxu0  ;;  %v1899_v25 = vpop.f32.mrb[5].mxu1 }
 0x165   : > { %v1828_v26 = vadd.f32 %v1827_v24, %v1826_v22  ;;  %v2524_v27 = vadd.f32 %v1899_v25, %v1898_v23  ;;  %v1829_v28 = vpop.f32.mrb[6].mxu0  ;;  %v1901_v29 = vpop.f32.mrb[6].mxu1  ;;  %v438_v24 = vld [vmem:[#allocation2 + $0x20] sm:$0xff] }
 0x166   : > { %v1830_v30 = vpop.f32.mrb[7].mxu0  ;;  %v1902_v31 = vpop.f32.mrb[7].mxu1 }
 0x167   : > { %v1831_v32 = vadd.f32 %v1830_v30, %v1829_v28  ;;  %v2526_v33 = vadd.f32 %v1902_v31, %v1901_v29  ;;  %v441_v30 = vld [vmem:[#allocation2 + $0x38] sm:$0xff] }
 0x16b   : > { %v1832_v34 = vpop.f32.mrb[8].mxu0  ;;  %v1904_v35 = vpop.f32.mrb[8].mxu1 }
 0x16c   : > { %v1833_v36 = vpop.f32.mrb[9].mxu0  ;;  %v1905_v37 = vpop.f32.mrb[9].mxu1 }
 0x16d   : > { %v1834_v38 = vadd.f32 %v1833_v36, %v1832_v34  ;;  %v2528_v39 = vadd.f32 %v1905_v37, %v1904_v35  ;;  %v1835_v40 = vpop.f32.mrb[10].mxu0  ;;  %v1907_v41 = vpop.f32.mrb[10].mxu1  ;;  %v439_v35 = vld [vmem:[#allocation2 + $0x28] sm:$0xff] }
 0x16e   : > { %v1836_v42 = vpop.f32.mrb[11].mxu0  ;;  %v1908_v43 = vpop.f32.mrb[11].mxu1 }
 0x16f   : > { %v1837_v44 = vadd.f32 %v1836_v42, %v1835_v40  ;;  %v2530_v45 = vadd.f32 %v1908_v43, %v1907_v41 }
 0x173   : > { %v1838_v46 = vpop.f32.mrb[12].mxu0  ;;  %v1910_v47 = vpop.f32.mrb[12].mxu1 }
 0x174   : > { %v1839_v48 = vpop.f32.mrb[13].mxu0  ;;  %v1911_v49 = vpop.f32.mrb[13].mxu1 }
 0x175   : > { %v1840_v50 = vadd.f32 %v1839_v48, %v1838_v46  ;;  %v2532_v51 = vadd.f32 %v1911_v49, %v1910_v47  ;;  %v1841_v52 = vpop.f32.mrb[14].mxu0  ;;  %v1913_v53 = vpop.f32.mrb[14].mxu1  ;;  %v444_v47 = vld [vmem:[#allocation2 + $0x50] sm:$0xff] }
 0x176   : > { %v1842_v54 = vpop.f32.mrb[15].mxu0  ;;  %v1914_v55 = vpop.f32.mrb[15].mxu1 }
 0x177   : > { %v1843_v56 = vadd.f32 %v1842_v54, %v1841_v52  ;;  %v2534_v57 = vadd.f32 %v1914_v55, %v1913_v53 }
 0x17b   : > { %v1844_v58 = vpop.f32.mrb[16].mxu0  ;;  %v1958_v60 = vpop.f32.mrb[16].mxu1 }
 0x17c   : > { %v1182_v61 = vadd.f32 %v1958_v60, %v1828_v26  ;;  %v1845_v62 = vpop.f32.mrb[17].mxu0  ;;  %v1173_v0 = vpop.f32.mrb[17].mxu1 }
 0x17d   : > { %v1846_v1 = vadd.f32 %v1845_v62, %v1844_v58  ;;  %v1174_v2 = vadd.f32 %v1822_v14, %v1173_v0  ;;  %v1847_v3 = vpop.f32.mrb[18].mxu0  ;;  %v1959_v5 = vpop.f32.mrb[18].mxu1 }
 0x17e   : > { %v1302_v6 = vadd.f32 %v1182_v61, %v436_v59  ;;  %v1185_v7 = vadd.f32 %v1959_v5, %v1831_v32  ;;  %v1848_v8 = vpop.f32.mrb[19].mxu0  ;;  %v1176_v10 = vpop.f32.mrb[19].mxu1  ;;  %v443_v61 = vld [vmem:[#allocation2 + $0x48] sm:$0xff] }
 0x17f   : > { %v1300_v11 = vadd.f32 %v1174_v2, %v434_v63  ;;  %v1849_v12 = vadd.f32 %v1848_v8, %v1847_v3  ;;  %v1177_v13 = vadd.f32 %v1825_v20, %v1176_v10 }
 0x180   : > { %1334 = vst [vmem:[#allocation2 + $0x10] sm:$0xff] %v1302_v6  ;;  %v1303_v16 = vadd.f32 %v1185_v7, %v437_v4  ;;  %v446_v7 = vld [vmem:[#allocation2 + $0x60] sm:$0xff] }
 0x181   : > { %1332 = vst [vmem:[#allocation2] sm:$0xff] %v1300_v11  ;;  %v1301_v17 = vadd.f32 %v1177_v13, %v435_v9 }
 0x182   : > { %1335 = vst [vmem:[#allocation2 + $0x18] sm:$0xff] %v1303_v16  ;;  %v448_v16 = vld [vmem:[#allocation2 + $0x70] sm:$0xff] }
 0x183   : > { %1333 = vst [vmem:[#allocation2 + $0x8] sm:$0xff] %v1301_v17  ;;  %v1850_v18 = vpop.f32.mrb[20].mxu0  ;;  %v1962_v14 = vpop.f32.mrb[20].mxu1 }
 0x184   : > { %v1198_v22 = vadd.f32 %v1962_v14, %v1840_v50  ;;  %v1851_v23 = vpop.f32.mrb[21].mxu0  ;;  %v1189_v25 = vpop.f32.mrb[21].mxu1  ;;  %v442_v50 = vld [vmem:[#allocation2 + $0x40] sm:$0xff] }
 0x185   : > { %v1852_v26 = vadd.f32 %v1851_v23, %v1850_v18  ;;  %v1190_v28 = vadd.f32 %v1834_v38, %v1189_v25  ;;  %v1853_v29 = vpop.f32.mrb[22].mxu0  ;;  %v1963_v31 = vpop.f32.mrb[22].mxu1  ;;  %v447_v18 = vld [vmem:[#allocation2 + $0x68] sm:$0xff] }
 0x186   : > { %v1306_v32 = vadd.f32 %v1198_v22, %v440_v19  ;;  %v1201_v20 = vadd.f32 %v1963_v31, %v1843_v56  ;;  %v1854_v34 = vpop.f32.mrb[23].mxu0  ;;  %v1192_v36 = vpop.f32.mrb[23].mxu1  ;;  %v445_v56 = vld [vmem:[#allocation2 + $0x58] sm:$0xff] }
 0x187   : > { %v1304_v37 = vadd.f32 %v1190_v28, %v438_v24  ;;  %v1855_v40 = vadd.f32 %v1854_v34, %v1853_v29  ;;  %v1193_v41 = vadd.f32 %v1837_v44, %v1192_v36  ;;  %v449_v24 = vld [vmem:[#allocation2 + $0x78] sm:$0xff] }
 0x188   : > { %1338 = vst [vmem:[#allocation2 + $0x30] sm:$0xff] %v1306_v32  ;;  %v1307_v42 = vadd.f32 %v1201_v20, %v441_v30 }
 0x189   : > { %1336 = vst [vmem:[#allocation2 + $0x20] sm:$0xff] %v1304_v37  ;;  %v1305_v43 = vadd.f32 %v1193_v41, %v439_v35  ;;  %v450_v37 = vld [vmem:[#allocation2 + $0x80] sm:$0xff] }
 0x18a   : > { %1339 = vst [vmem:[#allocation2 + $0x38] sm:$0xff] %v1307_v42 }
 0x18b   : > { %1337 = vst [vmem:[#allocation2 + $0x28] sm:$0xff] %v1305_v43  ;;  %v1856_v46 = vpop.f32.mrb[24].mxu0  ;;  %v1966_v38 = vpop.f32.mrb[24].mxu1 }
 0x18c   : > { %v1214_v48 = vadd.f32 %v1966_v38, %v1852_v26  ;;  %v1857_v49 = vpop.f32.mrb[25].mxu0  ;;  %v1205_v52 = vpop.f32.mrb[25].mxu1 }
 0x18d   : > { %v1858_v53 = vadd.f32 %v1857_v49, %v1856_v46  ;;  %v1206_v54 = vadd.f32 %v1846_v1, %v1205_v52  ;;  %v1859_v55 = vpop.f32.mrb[26].mxu0  ;;  %v1967_v58 = vpop.f32.mrb[26].mxu1  ;;  %v451_v46 = vld [vmem:[#allocation2 + $0x88] sm:$0xff] }
 0x18e   : > { %v1310_v59 = vadd.f32 %v1214_v48, %v444_v47  ;;  %v1217_v44 = vadd.f32 %v1967_v58, %v1855_v40  ;;  %v1860_v60 = vpop.f32.mrb[27].mxu0  ;;  %v1208_v62 = vpop.f32.mrb[27].mxu1  ;;  %v452_v58 = vld [vmem:[#allocation2 + $0x90] sm:$0xff] }
 0x18f   : > { %v1308_v63 = vadd.f32 %v1206_v54, %v442_v50  ;;  %v1861_v0 = vadd.f32 %v1860_v60, %v1859_v55  ;;  %v1209_v2 = vadd.f32 %v1849_v12, %v1208_v62  ;;  %v453_v62 = vld [vmem:[#allocation2 + $0x98] sm:$0xff] }
 0x190   : > { %1342 = vst [vmem:[#allocation2 + $0x50] sm:$0xff] %v1310_v59  ;;  %v1311_v3 = vadd.f32 %v1217_v44, %v445_v56 }
 0x191   : > { %1340 = vst [vmem:[#allocation2 + $0x40] sm:$0xff] %v1308_v63  ;;  %v1309_v4 = vadd.f32 %v1209_v2, %v443_v61 }
 0x192   : > { %1343 = vst [vmem:[#allocation2 + $0x58] sm:$0xff] %v1311_v3 }
 0x193   : > { %1341 = vst [vmem:[#allocation2 + $0x48] sm:$0xff] %v1309_v4  ;;  %v1862_v5 = vpop.f32.mrb[28].mxu0  ;;  %v1970_v6 = vpop.f32.mrb[28].mxu1  ;;  %v460_v4 = vld [vmem:[#allocation2 + $0xd0] sm:$0xff] }
 0x194   : > { %v1863_v1 = vpop.f32.mrb[29].mxu0  ;;  %v1221_v8 = vpop.f32.mrb[29].mxu1 }
 0x195   : > { %v1864_v9 = vadd.f32 %v1863_v1, %v1862_v5  ;;  %v1222_v10 = vadd.f32 %v1858_v53, %v1221_v8  ;;  %v1865_v11 = vpop.f32.mrb[30].mxu0  ;;  %v1971_v13 = vpop.f32.mrb[30].mxu1 }
 0x196   : > { %v1866_v17 = vpop.f32.mrb[31].mxu0  ;;  %v1224_v19 = vpop.f32.mrb[31].mxu1 }
 0x197   : > { %v1230_v12 = vadd.f32 %v1970_v6, %v1864_v9  ;;  %v1312_v14 = vadd.f32 %v1222_v10, %v446_v7  ;;  %v1867_v22 = vadd.f32 %v1866_v17, %v1865_v11  ;;  %v1225_v23 = vadd.f32 %v1861_v0, %v1224_v19  ;;  %v458_v7 = vld [vmem:[#allocation2 + $0xc0] sm:$0xff] }
 0x199   : > { %v1314_v25 = vadd.f32 %v1230_v12, %v448_v16  ;;  %1344 = vst [vmem:[#allocation2 + $0x60] sm:$0xff] %v1312_v14  ;;  %v1233_v26 = vadd.f32 %v1971_v13, %v1867_v22  ;;  %v1313_v28 = vadd.f32 %v1225_v23, %v447_v18  ;;  %v461_v13 = vld [vmem:[#allocation2 + $0xd8] sm:$0xff]  ;;  %v454_v18 = vld [vmem:[#allocation2 + $0xa0] sm:$0xff]  ;;  %v459_v14 = vld [vmem:[#allocation2 + $0xc8] sm:$0xff] }
 0x19b   : > { %1346 = vst [vmem:[#allocation2 + $0x70] sm:$0xff] %v1314_v25  ;;  %v1315_v29 = vadd.f32 %v1233_v26, %v449_v24  ;;  %1345 = vst [vmem:[#allocation2 + $0x68] sm:$0xff] %v1313_v28  ;;  %v1868_v30 = vpop.f32.mrb[32].mxu0  ;;  %v1974_v31 = vpop.f32.mrb[32].mxu1  ;;  %v455_v28 = vld [vmem:[#allocation2 + $0xa8] sm:$0xff] }
 0x19c   : > { %v1869_v32 = vpop.f32.mrb[33].mxu0  ;;  %v1237_v20 = vpop.f32.mrb[33].mxu1 }
 0x19d   : > { %1347 = vst [vmem:[#allocation2 + $0x78] sm:$0xff] %v1315_v29  ;;  %v1870_v34 = vadd.f32 %v1869_v32, %v1868_v30  ;;  %v1871_v35 = vpop.f32.mrb[34].mxu0  ;;  %v1975_v36 = vpop.f32.mrb[34].mxu1  ;;  %v464_v32 = vld [vmem:[#allocation2 + $0xf0] sm:$0xff] }
 0x19e   : > { %v1872_v40 = vpop.f32.mrb[35].mxu0  ;;  %v1240_v41 = vpop.f32.mrb[35].mxu1 }
 0x19f   : > { %v1238_v42 = vadd.f32 %v1870_v34, %v1237_v20  ;;  %v1873_v43 = vadd.f32 %v1872_v40, %v1871_v35 }
 0x1a1   : > { %v1316_v47 = vadd.f32 %v1238_v42, %v450_v37  ;;  %v1241_v38 = vadd.f32 %v1873_v43, %v1240_v41  ;;  %v465_v42 = vld [vmem:[#allocation2 + $0xf8] sm:$0xff] }
 0x1a3   : > { %1348 = vst [vmem:[#allocation2 + $0x80] sm:$0xff] %v1316_v47  ;;  %v1317_v48 = vadd.f32 %v1241_v38, %v451_v46  ;;  %v1874_v49 = vpop.f32.mrb[36].mxu0  ;;  %v2536_v50 = vpop.f32.mrb[36].mxu1  ;;  %v456_v47 = vld [vmem:[#allocation2 + $0xb0] sm:$0xff] }
 0x1a4   : > { %v1875_v52 = vpop.f32.mrb[37].mxu0  ;;  %v1253_v53 = vpop.f32.mrb[37].mxu1 }
 0x1a5   : > { %1349 = vst [vmem:[#allocation2 + $0x88] sm:$0xff] %v1317_v48  ;;  %v1876_v54 = vadd.f32 %v1875_v52, %v1874_v49  ;;  %v1877_v55 = vpop.f32.mrb[38].mxu0  ;;  %v2538_v56 = vpop.f32.mrb[38].mxu1  ;;  %v463_v49 = vld [vmem:[#allocation2 + $0xe8] sm:$0xff] }
 0x1a6   : > { %v1878_v59 = vpop.f32.mrb[39].mxu0  ;;  %v1256_v44 = vpop.f32.mrb[39].mxu1 }
 0x1a7   : > { %v1246_v60 = vadd.f32 %v1974_v31, %v1876_v54  ;;  %v1879_v61 = vadd.f32 %v1878_v59, %v1877_v55  ;;  %v457_v59 = vld [vmem:[#allocation2 + $0xb8] sm:$0xff] }
 0x1a9   : > { %v1318_v63 = vadd.f32 %v1246_v60, %v452_v58  ;;  %v1249_v0 = vadd.f32 %v1975_v36, %v1879_v61  ;;  %v462_v36 = vld [vmem:[#allocation2 + $0xe0] sm:$0xff]  ;;  %v1370_v61 = vld [vmem:[#allocation2 + $0x10] sm:$0xff] (!%p1801_p2) }
 0x1aa   : > { %1402 = vst [vmem:[%s2443_s15 + $0x10] sm:$0xff] (!%p1801_p2), %v1370_v61 }
 0x1ab   : > { %1350 = vst [vmem:[#allocation2 + $0x90] sm:$0xff] %v1318_v63  ;;  %v1319_v2 = vadd.f32 %v1249_v0, %v453_v62  ;;  %v1880_v3 = vpop.f32.mrb[40].mxu0  ;;  %v1982_v5 = vpop.f32.mrb[40].mxu1  ;;  %v1371_v62 = vld [vmem:[#allocation2 + $0x18] sm:$0xff] (!%p1801_p2)  ;;  %v1373_v63 = vld [vmem:[#allocation2 + $0x28] sm:$0xff] (!%p1801_p2) }
 0x1ac   : > { %v1278_v6 = vadd.f32 %v1982_v5, %v2524_v27  ;;  %v1881_v1 = vpop.f32.mrb[41].mxu0  ;;  %v1269_v8 = vpop.f32.mrb[41].mxu1  ;;  %v2556_v5 = vld [vmem:[#allocation2 + $0x38] sm:$0xff] (!%p1801_p2)  ;;  %1403 = vst [vmem:[%s2443_s15 + $0x18] sm:$0xff] (!%p1801_p2), %v1371_v62  ;;  %1405 = vst [vmem:[%s2443_s15 + $0x28] sm:$0xff] (!%p1801_p2), %v1373_v63 }
 0x1ad   : > { %1351 = vst [vmem:[#allocation2 + $0x98] sm:$0xff] %v1319_v2  ;;  %v1882_v9 = vadd.f32 %v1881_v1, %v1880_v3  ;;  %v1270_v10 = vadd.f32 %v2520_v15, %v1269_v8  ;;  %v1883_v11 = vpop.f32.mrb[42].mxu0  ;;  %v1983_v16 = vpop.f32.mrb[42].mxu1  ;;  %v1475_v1 = vmul.f32 (!%p1801_p2), %v1370_v61, %v1370_v61  ;;  %v2565_v8 = vld [vmem:[#allocation2 + $0x50] sm:$0xff] (!%p1801_p2)  ;;  %1407 = vst [vmem:[%s2443_s15 + $0x38] sm:$0xff] (!%p1801_p2), %v2556_v5 }
 0x1ae   : > { %v1326_v17 = vadd.f32 %v1278_v6, %v460_v4  ;;  %v1281_v19 = vadd.f32 %v1983_v16, %v2526_v33  ;;  %v1884_v12 = vpop.f32.mrb[43].mxu0  ;;  %v1272_v22 = vpop.f32.mrb[43].mxu1  ;;  %v2554_v4 = vld [vmem:[#allocation2 + $0x30] sm:$0xff] (!%p1801_p2)  ;;  %v2558_v6 = vld [vmem:[#allocation2 + $0x40] sm:$0xff] (!%p1801_p2)  ;;  %1410 = vst [vmem:[%s2443_s15 + $0x50] sm:$0xff] (!%p1801_p2), %v2565_v8 }
 0x1af   : > { %v1254_v23 = vadd.f32 %v1882_v9, %v1253_v53  ;;  %v1324_v24 = vadd.f32 %v1270_v10, %v458_v7  ;;  %v1885_v27 = vadd.f32 %v1884_v12, %v1883_v11  ;;  %v1273_v25 = vadd.f32 %v2522_v21, %v1272_v22  ;;  %v2563_v7 = vld [vmem:[#allocation2 + $0x48] sm:$0xff] (!%p1801_p2)  ;;  %v2567_v9 = vld [vmem:[#allocation2 + $0x58] sm:$0xff] (!%p1801_p2)  ;;  %1406 = vst [vmem:[%s2443_s15 + $0x30] sm:$0xff] (!%p1801_p2), %v2554_v4  ;;  %v2575_v11 = vld [vmem:[#allocation2 + $0x60] sm:$0xff] (!%p1801_p2) }
 0x1b0   : > { %1358 = vst [vmem:[#allocation2 + $0xd0] sm:$0xff] %v1326_v17  ;;  %v1327_v26 = vadd.f32 %v1281_v19, %v461_v13  ;;  %1408 = vst [vmem:[%s2443_s15 + $0x40] sm:$0xff] (!%p1801_p2), %v2558_v6  ;;  %v2577_v13 = vld [vmem:[#allocation2 + $0x68] sm:$0xff] (!%p1801_p2)  ;;  %v2579_v16 = vld [vmem:[#allocation2 + $0x70] sm:$0xff] (!%p1801_p2)  ;;  %v1476_v17 = vmul.f32 (!%p1801_p2), %v1371_v62, %v1371_v62 }
 0x1b1   : > { %v1320_v29 = vadd.f32 %v1254_v23, %v454_v18  ;;  %1356 = vst [vmem:[#allocation2 + $0xc0] sm:$0xff] %v1324_v24  ;;  %v1257_v15 = vadd.f32 %v1885_v27, %v1256_v44  ;;  %v1325_v30 = vadd.f32 %v1273_v25, %v459_v14  ;;  %1409 = vst [vmem:[%s2443_s15 + $0x48] sm:$0xff] (!%p1801_p2), %v2563_v7  ;;  %v2587_v19 = vld [vmem:[#allocation2 + $0x78] sm:$0xff] (!%p1801_p2)  ;;  %v2589_v12 = vld [vmem:[#allocation2 + $0x80] sm:$0xff] (!%p1801_p2) }
 0x1b2   : > { %1359 = vst [vmem:[#allocation2 + $0xd8] sm:$0xff] %v1327_v26  ;;  %1411 = vst [vmem:[%s2443_s15 + $0x58] sm:$0xff] (!%p1801_p2), %v2567_v9  ;;  %v2591_v14 = vld [vmem:[#allocation2 + $0x88] sm:$0xff] (!%p1801_p2)  ;;  %v2599_v23 = vld [vmem:[#allocation2 + $0x90] sm:$0xff] (!%p1801_p2) }
 0x1b3   : > { %1352 = vst [vmem:[#allocation2 + $0xa0] sm:$0xff] %v1320_v29  ;;  %v1321_v31 = vadd.f32 %v1257_v15, %v455_v28  ;;  %1357 = vst [vmem:[#allocation2 + $0xc8] sm:$0xff] %v1325_v30  ;;  %v1886_v33 = vpop.f32.mrb[44].mxu0  ;;  %v1986_v20 = vpop.f32.mrb[44].mxu1 }
 0x1b4   : > { %v1294_v34 = vadd.f32 %v1986_v20, %v2532_v51  ;;  %v1887_v35 = vpop.f32.mrb[45].mxu0  ;;  %v1285_v37 = vpop.f32.mrb[45].mxu1  ;;  %1412 = vst [vmem:[%s2443_s15 + $0x60] sm:$0xff] (!%p1801_p2), %v2575_v11  ;;  %1413 = vst [vmem:[%s2443_s15 + $0x68] sm:$0xff] (!%p1801_p2), %v2577_v13  ;;  %v2601_v24 = vld [vmem:[#allocation2 + $0x98] sm:$0xff] (!%p1801_p2)  ;;  %v1478_v20 = vmul.f32 (!%p1801_p2), %v1373_v63, %v1373_v63 }
 0x1b5   : > { %1353 = vst [vmem:[#allocation2 + $0xa8] sm:$0xff] %v1321_v31  ;;  %v1888_v21 = vadd.f32 %v1887_v35, %v1886_v33  ;;  %v1286_v40 = vadd.f32 %v2528_v39, %v1285_v37  ;;  %v1889_v41 = vpop.f32.mrb[46].mxu0  ;;  %v1987_v43 = vpop.f32.mrb[46].mxu1  ;;  %1414 = vst [vmem:[%s2443_s15 + $0x70] sm:$0xff] (!%p1801_p2), %v2579_v16 }
 0x1b6   : > { %v1330_v46 = vadd.f32 %v1294_v34, %v464_v32  ;;  %v1297_v38 = vadd.f32 %v1987_v43, %v2534_v57  ;;  %v1890_v48 = vpop.f32.mrb[47].mxu0  ;;  %v1288_v52 = vpop.f32.mrb[47].mxu1  ;;  %1415 = vst [vmem:[%s2443_s15 + $0x78] sm:$0xff] (!%p1801_p2), %v2587_v19  ;;  %1416 = vst [vmem:[%s2443_s15 + $0x80] sm:$0xff] (!%p1801_p2), %v2589_v12 }
 0x1b7   : > { %v1262_v53 = vadd.f32 %v2536_v50, %v1888_v21  ;;  %v1328_v51 = vadd.f32 %v1286_v40, %v462_v36  ;;  %v1891_v54 = vadd.f32 %v1890_v48, %v1889_v41  ;;  %v1289_v55 = vadd.f32 %v2530_v45, %v1288_v52  ;;  %1367 = sbr.rel (%p1801_p2) target bundleno = 529 (0x211), region = 66  ;;  %v1368_v50 = vld [vmem:[#allocation2] sm:$0xff] (!%p1801_p2)  ;;  %v1369_v45 = vld [vmem:[#allocation2 + $0x8] sm:$0xff] (!%p1801_p2)  ;;  %1417 = vst [vmem:[%s2443_s15 + $0x88] sm:$0xff] (!%p1801_p2), %v2591_v14  ;;  %v2627_v32 = vld [vmem:[#allocation2 + $0xd0] sm:$0xff] (!%p1801_p2) }
 0x1b8   : > { %1362 = vst [vmem:[#allocation2 + $0xf0] sm:$0xff] %v1330_v46  ;;  %v1331_v58 = vadd.f32 %v1297_v38, %v465_v42  ;;  %v1433_v0 = vadd.f32 (!%p1801_p2), %v1369_v45, %v1368_v50  ;;  %1400 = vst [vmem:[%s2443_s15] sm:$0xff] (!%p1801_p2), %v1368_v50  ;;  %v1473_v2 = vmul.f32 (!%p1801_p2), %v1368_v50, %v1368_v50  ;;  %v2623_v31 = vld [vmem:[#allocation2 + $0xc0] sm:$0xff] (!%p1801_p2) }
 0x1b9   : > { %v1322_v39 = vadd.f32 %v1262_v53, %v456_v47  ;;  %1360 = vst [vmem:[#allocation2 + $0xe0] sm:$0xff] %v1328_v51  ;;  %v1265_v44 = vadd.f32 %v2538_v56, %v1891_v54  ;;  %v1329_v60 = vadd.f32 %v1289_v55, %v463_v49  ;;  %v1372_v56 = vld [vmem:[#allocation2 + $0x20] sm:$0xff] (!%p1801_p2)  ;;  %1401 = vst [vmem:[%s2443_s15 + $0x8] sm:$0xff] (!%p1801_p2), %v1369_v45  ;;  %v2635_v35 = vld [vmem:[#allocation2 + $0xd8] sm:$0xff] (!%p1801_p2) }
 0x1ba   : > { %1363 = vst [vmem:[#allocation2 + $0xf8] sm:$0xff] %v1331_v58  ;;  %v1474_v3 = vmul.f32 (!%p1801_p2), %v1369_v45, %v1369_v45  ;;  %1404 = vst [vmem:[%s2443_s15 + $0x20] sm:$0xff] (!%p1801_p2), %v1372_v56  ;;  %v1434_v10 = vadd.f32 (!%p1801_p2), %v1433_v0, %v1370_v61  ;;  %v2603_v27 = vld [vmem:[#allocation2 + $0xa0] sm:$0xff] (!%p1801_p2)  ;;  %v1477_v25 = vmul.f32 (!%p1801_p2), %v1372_v56, %v1372_v56  ;;  %v2625_v33 = vld [vmem:[#allocation2 + $0xc8] sm:$0xff] (!%p1801_p2) }
 0x1bb   : > { %1354 = vst [vmem:[#allocation2 + $0xb0] sm:$0xff] %v1322_v39  ;;  %v1323_v57 = vadd.f32 %v1265_v44, %v457_v59  ;;  %1361 = vst [vmem:[#allocation2 + $0xe8] sm:$0xff] %v1329_v60  ;;  %v1479_v42 = vmul.f32 (!%p1801_p2), %v2554_v4, %v2554_v4  ;;  %v1480_v47 = vmul.f32 (!%p1801_p2), %v2556_v5, %v2556_v5 }
 0x1bc   : > { %v1505_v18 = vadd.f32 (!%p1801_p2), %v1474_v3, %v1473_v2  ;;  %v1435_v22 = vadd.f32 (!%p1801_p2), %v1434_v10, %v1371_v62  ;;  %v2611_v28 = vld [vmem:[#allocation2 + $0xa8] sm:$0xff] (!%p1801_p2)  ;;  %1418 = vst [vmem:[%s2443_s15 + $0x90] sm:$0xff] (!%p1801_p2), %v2599_v23  ;;  %1419 = vst [vmem:[%s2443_s15 + $0x98] sm:$0xff] (!%p1801_p2), %v2601_v24  ;;  %v1481_v49 = vmul.f32 (!%p1801_p2), %v2558_v6, %v2558_v6 }
 0x1bd   : > { %1355 = vst [vmem:[#allocation2 + $0xb8] sm:$0xff] %v1323_v57  ;;  %1420 = vst [vmem:[%s2443_s15 + $0xa0] sm:$0xff] (!%p1801_p2), %v2603_v27  ;;  %v1482_v51 = vmul.f32 (!%p1801_p2), %v2563_v7, %v2563_v7  ;;  %v1483_v58 = vmul.f32 (!%p1801_p2), %v2565_v8, %v2565_v8  ;;  %v1484_v44 = vmul.f32 (!%p1801_p2), %v2567_v9, %v2567_v9 }
 0x1be   : > { %v1506_v26 = vadd.f32 %v1505_v18, %v1475_v1  ;;  %v1436_v30 = vadd.f32 %v1435_v22, %v1372_v56  ;;  %1421 = vst [vmem:[%s2443_s15 + $0xa8] sm:$0xff] %v2611_v28  ;;  %1424 = vst [vmem:[%s2443_s15 + $0xc0] sm:$0xff] %v2623_v31  ;;  %v1485_v50 = vmul.f32 %v2575_v11, %v2575_v11 }
 0x1bf   : > { %1425 = vst [vmem:[%s2443_s15 + $0xc8] sm:$0xff] %v2625_v33  ;;  %1426 = vst [vmem:[%s2443_s15 + $0xd0] sm:$0xff] %v2627_v32  ;;  %v2647_v40 = vld [vmem:[#allocation2 + $0xf0] sm:$0xff]  ;;  %v1486_v62 = vmul.f32 %v2577_v13, %v2577_v13  ;;  %v1487_v0 = vmul.f32 %v2579_v16, %v2579_v16  ;;  %v1489_v1 = vmul.f32 %v2589_v12, %v2589_v12 }
 0x1c0   : > { %v1507_v34 = vadd.f32 %v1506_v26, %v1476_v17  ;;  %v2637_v36 = vld [vmem:[#allocation2 + $0xe0] sm:$0xff]  ;;  %v1437_v21 = vadd.f32 %v1436_v30, %v1373_v63  ;;  %1427 = vst [vmem:[%s2443_s15 + $0xd8] sm:$0xff] %v2635_v35  ;;  %1430 = vst [vmem:[%s2443_s15 + $0xf0] sm:$0xff] %v2647_v40  ;;  %v1492_v18 = vmul.f32 %v2601_v24, %v2601_v24 }
 0x1c1   : > { %v2649_v41 = vld [vmem:[#allocation2 + $0xf8] sm:$0xff]  ;;  %1428 = vst [vmem:[%s2443_s15 + $0xe0] sm:$0xff] %v2637_v36 }
 0x1c2   : > { %v2613_v29 = vld [vmem:[#allocation2 + $0xb0] sm:$0xff]  ;;  %v2639_v37 = vld [vmem:[#allocation2 + $0xe8] sm:$0xff]  ;;  %v1508_v43 = vadd.f32 %v1507_v34, %v1477_v25  ;;  %v1438_v46 = vadd.f32 %v1437_v21, %v2554_v4  ;;  %1431 = vst [vmem:[%s2443_s15 + $0xf8] sm:$0xff] %v2649_v41  ;;  %v1488_v4 = vmul.f32 %v2587_v19, %v2587_v19 }
 0x1c3   : > { %1422 = vst [vmem:[%s2443_s15 + $0xb0] sm:$0xff] %v2613_v29  ;;  %1429 = vst [vmem:[%s2443_s15 + $0xe8] sm:$0xff] %v2639_v37 }
 0x1c4   : > { %v2615_v15 = vld [vmem:[#allocation2 + $0xb8] sm:$0xff]  ;;  %v1509_v38 = vadd.f32 %v1508_v43, %v1478_v20  ;;  %v1439_v48 = vadd.f32 %v1438_v46, %v2556_v5 }
 0x1c5   : > { %1423 = vst [vmem:[%s2443_s15 + $0xb8] sm:$0xff] %v2615_v15 }
 0x1c6   : > { %v1510_v52 = vadd.f32 %v1509_v38, %v1479_v42  ;;  %v1440_v53 = vadd.f32 %v1439_v48, %v2558_v6 }
 0x1c8   : > { %v1511_v54 = vadd.f32 %v1510_v52, %v1480_v47  ;;  %v1441_v55 = vadd.f32 %v1440_v53, %v2563_v7 }
 0x1ca   : > { %v1512_v59 = vadd.f32 %v1511_v54, %v1481_v49  ;;  %v1442_v39 = vadd.f32 %v1441_v55, %v2565_v8 }
 0x1cc   : > { %v1513_v60 = vadd.f32 %v1512_v59, %v1482_v51  ;;  %v1443_v57 = vadd.f32 %v1442_v39, %v2567_v9  ;;  %v1490_v9 = vmul.f32 %v2591_v14, %v2591_v14 }
 0x1ce   : > { %v1514_v45 = vadd.f32 %v1513_v60, %v1483_v58  ;;  %v1444_v61 = vadd.f32 %v1443_v57, %v2575_v11 }
 0x1d0   : > { %v1515_v56 = vadd.f32 %v1514_v45, %v1484_v44  ;;  %v1445_v63 = vadd.f32 %v1444_v61, %v2577_v13  ;;  %v1491_v13 = vmul.f32 %v2599_v23, %v2599_v23 }
 0x1d2   : > { %v1516_v2 = vadd.f32 %v1515_v56, %v1485_v50  ;;  %v1446_v3 = vadd.f32 %v1445_v63, %v2579_v16 }
 0x1d4   : > { %v1517_v5 = vadd.f32 %v1516_v2, %v1486_v62  ;;  %v1447_v6 = vadd.f32 %v1446_v3, %v2587_v19  ;;  %v1432_v3 = vld [vmem:[#allocation3] sm:$0x1] }
 0x1d6   : > { %v1518_v7 = vadd.f32 %v1517_v5, %v1487_v0  ;;  %v1448_v8 = vadd.f32 %v1447_v6, %v2589_v12  ;;  %v1493_v12 = vmul.f32 %v2603_v27, %v2603_v27 }
 0x1d8   : > { %v1519_v10 = vadd.f32 %v1518_v7, %v1488_v4  ;;  %v1449_v11 = vadd.f32 %v1448_v8, %v2591_v14  ;;  %v1494_v14 = vmul.f32 %v2611_v28, %v2611_v28 }
 0x1da   : > { %v1520_v16 = vadd.f32 %v1519_v10, %v1489_v1  ;;  %v1450_v17 = vadd.f32 %v1449_v11, %v2599_v23  ;;  %v1495_v23 = vmul.f32 %v2613_v29, %v2613_v29  ;;  %v1472_v1 = vld [vmem:[#allocation4] sm:$0x1] }
 0x1dc   : > { %v1521_v19 = vadd.f32 %v1520_v16, %v1490_v9  ;;  %v1451_v22 = vadd.f32 %v1450_v17, %v2601_v24  ;;  %v1496_v24 = vmul.f32 %v2615_v15, %v2615_v15 }
 0x1de   : > { %v1522_v25 = vadd.f32 %v1521_v19, %v1491_v13  ;;  %v1452_v26 = vadd.f32 %v1451_v22, %v2603_v27  ;;  %v1497_v27 = vmul.f32 %v2623_v31, %v2623_v31 }
 0x1e0   : > { %v1523_v30 = vadd.f32 %v1522_v25, %v1492_v18  ;;  %v1453_v20 = vadd.f32 %v1452_v26, %v2611_v28  ;;  %v1498_v28 = vmul.f32 %v2625_v33, %v2625_v33 }
 0x1e2   : > { %v1524_v34 = vadd.f32 %v1523_v30, %v1493_v12  ;;  %v1454_v21 = vadd.f32 %v1453_v20, %v2613_v29  ;;  %v1499_v29 = vmul.f32 %v2627_v32, %v2627_v32 }
 0x1e4   : > { %v1525_v42 = vadd.f32 %v1524_v34, %v1494_v14  ;;  %v1455_v43 = vadd.f32 %v1454_v21, %v2615_v15  ;;  %v1500_v15 = vmul.f32 %v2635_v35, %v2635_v35 }
 0x1e6   : > { %v1526_v46 = vadd.f32 %v1525_v42, %v1495_v23  ;;  %v1456_v47 = vadd.f32 %v1455_v43, %v2623_v31  ;;  %v1501_v31 = vmul.f32 %v2637_v36, %v2637_v36 }
 0x1e8   : > { %v1527_v38 = vadd.f32 %v1526_v46, %v1496_v24  ;;  %v1457_v48 = vadd.f32 %v1456_v47, %v2625_v33  ;;  %v1502_v33 = vmul.f32 %v2639_v37, %v2639_v37 }
 0x1ea   : > { %v1528_v49 = vadd.f32 %v1527_v38, %v1497_v27  ;;  %v1458_v52 = vadd.f32 %v1457_v48, %v2627_v32  ;;  %v1503_v32 = vmul.f32 %v2647_v40, %v2647_v40 }
 0x1ec   : > { %v1529_v53 = vadd.f32 %v1528_v49, %v1498_v28  ;;  %v1459_v51 = vadd.f32 %v1458_v52, %v2635_v35  ;;  %v1504_v35 = vmul.f32 %v2649_v41, %v2649_v41 }
 0x1ee   : > { %v1530_v54 = vadd.f32 %v1529_v53, %v1499_v29  ;;  %v1460_v55 = vadd.f32 %v1459_v51, %v2637_v36 }
 0x1f0   : > { %v1531_v58 = vadd.f32 %v1530_v54, %v1500_v15  ;;  %v1461_v59 = vadd.f32 %v1460_v55, %v2639_v37 }
 0x1f2   : > { %v1532_v39 = vadd.f32 %v1531_v58, %v1501_v31  ;;  %v1462_v44 = vadd.f32 %v1461_v59, %v2647_v40 }
 0x1f4   : > { %v1533_v60 = vadd.f32 %v1532_v39, %v1502_v33  ;;  %v1463_v57 = vadd.f32 %v1462_v44, %v2649_v41 }
 0x1f6   : > { %v1534_v50 = vadd.f32 %v1533_v60, %v1503_v32  ;;  %v1464_v36 = vrot.slane %v1463_v57, 4 }
 0x1f8   : > { %v1535_v45 = vadd.f32 %v1534_v50, %v1504_v35  ;;  %v1465_v61 = vadd.f32 %v1464_v36, %v1463_v57 }
 0x1fa   : > { %v1536_v62 = vrot.slane %v1535_v45, 4  ;;  %v1466_v56 = vrot.slane %v1465_v61, 2 }
 0x1fc   : > { %v1537_v63 = vadd.f32 %v1536_v62, %v1535_v45  ;;  %v1467_v37 = vadd.f32 %v1466_v56, %v1465_v61 }
 0x1fe   : > { %v1538_v0 = vrot.slane %v1537_v63, 2  ;;  %v1468_v2 = vrot.slane %v1467_v37, 1 }
 0x200   : > { %v1539_v4 = vadd.f32 %v1538_v0, %v1537_v63  ;;  %v1469_v5 = vadd.f32 %v1468_v2, %v1467_v37 }
 0x202   : > { %v1540_v40 = vrot.slane %v1539_v4, 1  ;;  %v1470_v6 = vadd.f32 %v1469_v5, %v1432_v3 }
 0x204   : > { %v1541_v7 = vadd.f32 %v1540_v40, %v1539_v4  ;;  %1471 = vst [vmem:[#allocation3] sm:$0x1] %v1470_v6 }
 0x206   : > { %v1542_v8 = vadd.f32 %v1541_v7, %v1472_v1 }
 0x208   : > { %1543 = vst [vmem:[#allocation4] sm:$0x1] %v1542_v8 }
 0x20b   : > { %v1544_v41 = vld [vmem:[#allocation3] sm:$0x1] }
 0x20c   : > { %1545 = vst [vmem:[%s2769_s3] sm:$0x1] %v1544_v41 }
 0x20f   : > { %v1546_v9 = vld [vmem:[#allocation4] sm:$0x1] }
 0x210   : > { %1547 = vst [vmem:[%s2770_s4] sm:$0x1] %v1546_v9 }
 0x211 PF: > { %s15_s21 = sadd.s32 1, %s2207_s21   ;;  %s2771_s15 = smov %s2187_s16 }
 0x212   : > { %p12_p3 = scmp.ge.s32.totalorder %s15_s21, 8   ;;  %s2772_s16 = smov %s2287_s28 }
 0x213   : > { %s2773_s17 = smov %s2199_s19  ;;  %s2774_s18 = smov %s2203_s20 }
 0x214   : > { %s2775_s19 = smov %s2778_s22  ;;  %s2776_s20 = smov %s2782_s23 }
 0x215   :  { %14 = sbr.rel (!%p12_p3) target bundleno = 4 (0x4), region = 126 }

</bundles_post_ra>
